<compile_context>
chip_gen: v6e
topology: v6e:2x2x1
jax: 0.10.0
libtpu: 0.0.40
codegen_flags: <defaults>
</compile_context>

<pallas_src>
import math
import functools

import jax
import jax.numpy as jnp
from jax.experimental import pallas as pl
from jax.experimental.pallas import tpu as pltpu


# ----------------------------------------------------------------------------
# Pallas kernel: one grid step == `bb` batch elements; the whole forward
# (fused qkv projection, focused linear attention, depthwise conv, output
# projection) happens in VMEM.
# ----------------------------------------------------------------------------
def _flpvt2_kernel(x_ref, wqkv_ref, bqkv_ref, wp_ref, bp_ref,
                   ff_ref, isc_ref, blk_ref, dwcw_ref, dwcb_ref,
                   o_ref,
                   vpad_ref,
                   *, bb, num_heads, head_dim, H, W, ksize, pad_rows):
    N = H * W
    C = num_heads * head_dim
    p = ksize // 2
    seg = N + pad_rows            # per-batch segment in the padded scratch
    M = bb * N                    # fused matmul rows
    L = bb * N + (bb - 1) * pad_rows   # conv interior length (images + gaps)

    x = x_ref[...]                                                   # (M, C) bf16

    # fused q/kv projection: bf16 operands, f32 accumulation on the MXU
    qkv = jnp.dot(x, wqkv_ref[...], preferred_element_type=jnp.float32) + bqkv_ref[...]
    q = qkv[:, :C]
    k = qkv[:, C:2 * C]
    v = qkv[:, 2 * C:]                                               # f32, reused by conv

    ff = ff_ref[...]                                                 # (1, C)
    inv_scale = isc_ref[...]                                         # 1 / softplus(scale)

    q = (jnp.maximum(q, 0.0) + 1e-6) * inv_scale
    k = (jnp.maximum(k, 0.0) + 1e-6) * inv_scale

    # focusing: q <- q**ff / ||q**ff|| * ||q||  (norms over the full C axis)
    q_ss = jnp.sum(q * q, axis=-1, keepdims=True)
    k_ss = jnp.sum(k * k, axis=-1, keepdims=True)
    qp = jnp.exp(ff * jnp.log(q))                                    # q ** ff (q > 0)
    kp = jnp.exp(ff * jnp.log(k))
    qp_ss = jnp.sum(qp * qp, axis=-1, keepdims=True)
    kp_ss = jnp.sum(kp * kp, axis=-1, keepdims=True)
    q = qp * (jnp.sqrt(q_ss) * jax.lax.rsqrt(qp_ss))
    k = kp * (jnp.sqrt(k_ss) * jax.lax.rsqrt(kp_ss))

    blk = blk_ref[...]                                               # (C, C) bf16 0/1
    n_is = 1.0 / math.sqrt(N)

    # ---- focused linear attention; per-head fusion via the block-diagonal
    #      mask, per-batch K^T V via a short static loop.
    qm_parts = []
    att_parts = []
    for b in range(bb):
        r0 = b * N
        q_b = q[r0:r0 + N, :]
        k_b = k[r0:r0 + N, :]
        v_b = v[r0:r0 + N, :]
        kmean_b = jnp.mean(k_b, axis=0, keepdims=True)               # (1, C)
        qm_parts.append(q_b * kmean_b)
        kb = (k_b * n_is).astype(jnp.bfloat16)
        vb = (v_b * n_is).astype(jnp.bfloat16)
        kvm = jax.lax.dot_general(kb, vb,
                                  dimension_numbers=(((0,), (0,)), ((), ())),
                                  preferred_element_type=jnp.float32)  # (C, C)
        kvm = kvm.astype(jnp.bfloat16) * blk                         # per-head block diag
        att_parts.append(jnp.dot(q_b.astype(jnp.bfloat16), kvm,
                                 preferred_element_type=jnp.float32))

    qm = jnp.concatenate(qm_parts, axis=0)                           # (M, C)
    denom = jnp.dot(qm.astype(jnp.bfloat16), blk,
                    preferred_element_type=jnp.float32)              # (M, C)
    z = pl.reciprocal(denom + 1e-6, approx=True)
    att = jnp.concatenate(att_parts, axis=0) * z                     # (M, C)

    # ---- depthwise ksize x ksize conv over all C channels on a row-padded
    #      flat (L, C) image stack.  Halo/gap rows are zero so vertical taps
    #      outside an image read 0; a per-column-offset mask kills taps that
    #      would wrap across an image-row boundary.  All stores 8-aligned.
    zhalo = jnp.zeros((pad_rows, C), jnp.float32)
    for b in range(bb + 1):
        vpad_ref[b * seg:b * seg + pad_rows, :] = zhalo
    for b in range(bb):
        vpad_ref[pad_rows + b * seg:pad_rows + b * seg + N, :] = v[b * N:(b + 1) * N, :]

    dwcw = dwcw_ref[...]                                             # (k*k, C), loaded once
    col = jax.lax.broadcasted_iota(jnp.int32, (L, 1), 0) % W
    conv = jnp.zeros((L, C), jnp.float32)
    for dj in range(ksize):
        dc = dj - p
        part = jnp.zeros((L, C), jnp.float32)
        for di in range(ksize):
            off = (di - p) * W + dc
            t = di * ksize + dj
            sl = vpad_ref[pad_rows + off:pad_rows + off + L, :]      # (L, C)
            part = part + sl * dwcw[t:t + 1, :]
        if dc == 0:
            conv = conv + part
        else:
            cm = ((col + dc >= 0) & (col + dc < W)).astype(jnp.float32)
            conv = conv + part * cm

    conv_cat = jnp.concatenate(
        [conv[b * seg:b * seg + N, :] for b in range(bb)], axis=0)   # (M, C)

    # ---- output projection (no VMEM round-trip for att/conv)
    y = (att + conv_cat + dwcb_ref[...]).astype(jnp.bfloat16)
    o_ref[...] = jnp.dot(y, wp_ref[...], preferred_element_type=jnp.float32) + bp_ref[...]


# ----------------------------------------------------------------------------
# Wrapper: layout plumbing (weight fusion / transposes / bf16 casts / softplus
# inverse / block-diag mask / dwc weight tiling) happens once here.
# ----------------------------------------------------------------------------
def flpvt2_forward(x, params, *, num_heads, resol, ksize=5, batch_block=None):
    wq, bq, wkv, bkv, wp, bp, ff, scale_p, dwc_w, dwc_b = params
    H, W = resol
    B, N, C = x.shape
    assert N == H * W and C % num_heads == 0
    assert N % 8 == 0, "sublane-aligned stores require N % 8 == 0"
    head_dim = C // num_heads
    p = ksize // 2

    # one grid step processes `bb` batch elements (default: all of B fused)
    bb = B if batch_block is None else batch_block
    assert B % bb == 0
    nb = B // bb

    # halo/gap rows: >= p*W + p, multiple of 8 (sublane align) and of W
    # (keeps the column phase consistent across stacked batch images)
    m = 8 * W // math.gcd(8, W)
    pad_rows = -(-(p * W + p) // m) * m
    seg = N + pad_rows
    R = bb * seg + pad_rows                    # padded scratch rows

    # fused qkv weight: (in, 3*out), bf16 for the MXU
    w_qkv = jnp.concatenate([wq.T, wkv.T], axis=1).astype(jnp.bfloat16)   # (C, 3C)
    b_qkv = jnp.concatenate([bq, bkv]).reshape(1, 3 * C).astype(jnp.float32)
    wp_t = wp.T.astype(jnp.bfloat16)
    bp_r = bp.reshape(1, C).astype(jnp.float32)
    ff_r = ff.reshape(1, C).astype(jnp.float32)
    inv_scale = (1.0 / jax.nn.softplus(scale_p)).reshape(1, C).astype(jnp.float32)
    hid = jnp.arange(C) // head_dim
    blk = (hid[:, None] == hid[None, :]).astype(jnp.bfloat16)             # (C, C)
    # depthwise weights: (head_dim,1,k,k) -> (k*k, head_dim) -> tiled to (k*k, C)
    dwcw = jnp.tile(dwc_w.reshape(head_dim, ksize * ksize).T,
                    (1, num_heads)).astype(jnp.float32)
    dwcb = jnp.tile(dwc_b.reshape(1, head_dim), (1, num_heads)).astype(jnp.float32)

    x_flat = x.reshape(B * N, C).astype(jnp.bfloat16)

    kernel = functools.partial(_flpvt2_kernel, bb=bb, num_heads=num_heads,
                               head_dim=head_dim, H=H, W=W, ksize=ksize,
                               pad_rows=pad_rows)

    def full(shape):
        return pl.BlockSpec(shape, lambda i: (0,) * len(shape))

    in_specs = [
        pl.BlockSpec((bb * N, C), lambda i: (i, 0)),   # x (bf16, batch-fused rows)
        full((C, 3 * C)),             # fused qkv weight (bf16)
        full((1, 3 * C)),             # fused qkv bias
        full((C, C)),                 # proj weight (bf16)
        full((1, C)),                 # proj bias
        full((1, C)),                 # focusing_factor
        full((1, C)),                 # 1 / softplus(scale)
        full((C, C)),                 # per-head block-diag mask (bf16)
        full((ksize * ksize, C)),     # dwc weight, tap-major, tiled over heads
        full((1, C)),                 # dwc bias, tiled over heads
    ]
    out_spec = pl.BlockSpec((bb * N, C), lambda i: (i, 0))

    out = pl.pallas_call(
        kernel,
        out_shape=jax.ShapeDtypeStruct((B * N, C), jnp.float32),
        grid_spec=pltpu.PrefetchScalarGridSpec(
            num_scalar_prefetch=0,
            grid=(nb,),
            in_specs=in_specs,
            out_specs=out_spec,
            scratch_shapes=[
                pltpu.VMEM((R, C), jnp.float32),   # row-padded v image stack
            ]),
        compiler_params=pltpu.CompilerParams(
            dimension_semantics=("parallel",),
            vmem_limit_bytes=32 * 1024 * 1024),
    )(x_flat, w_qkv, b_qkv, wp_t, bp_r, ff_r, inv_scale, blk, dwcw, dwcb)
    return out.reshape(B, N, C)


# ----------------------------------------------------------------------------
# Pure-JAX reference (mirrors the PyTorch forward) for a correctness check.
# ----------------------------------------------------------------------------
def flpvt2_reference(x, params, *, num_heads, resol, ksize=5):
    wq, bq, wkv, bkv, wp, bp, ff, scale_p, dwc_w, dwc_b = params
    H, W = resol
    B, N, C = x.shape
    d = C // num_heads

    q = x @ wq.T + bq
    kv = x @ wkv.T + bkv
    k, v = kv[..., :C], kv[..., C:]

    scale = jax.nn.softplus(scale_p)
    q = jax.nn.relu(q) + 1e-6
    k = jax.nn.relu(k) + 1e-6
    q = q / scale
    k = k / scale
    q_norm = jnp.linalg.norm(q, axis=-1, keepdims=True)
    k_norm = jnp.linalg.norm(k, axis=-1, keepdims=True)
    q = q ** ff
    k = k ** ff
    q = q / jnp.linalg.norm(q, axis=-1, keepdims=True) * q_norm
    k = k / jnp.linalg.norm(k, axis=-1, keepdims=True) * k_norm

    qh = q.reshape(B, N, num_heads, d).transpose(0, 2, 1, 3)
    kh = k.reshape(B, N, num_heads, d).transpose(0, 2, 1, 3)
    vh = v.reshape(B, N, num_heads, d).transpose(0, 2, 1, 3)

    kmean = kh.mean(axis=2, keepdims=True)                               # (B,h,1,d)
    z = 1.0 / (jnp.einsum('bhnd,bhmd->bhnm', qh, kmean) + 1e-6)          # (B,h,N,1)
    n_is = N ** -0.5
    kvm = jnp.einsum('bhnd,bhne->bhde', kh * n_is, vh * n_is)
    att = jnp.einsum('bhnd,bhde->bhne', qh, kvm) * z
    xatt = att.transpose(0, 2, 1, 3).reshape(B, N, C)

    # depthwise conv on v (grouped conv, channels-last)
    v_img = vh.reshape(B * num_heads, H, W, d)
    w_hwio = jnp.transpose(dwc_w, (2, 3, 1, 0))                          # (k,k,1,d)
    conv = jax.lax.conv_general_dilated(
        v_img, w_hwio, window_strides=(1, 1), padding='SAME',
        dimension_numbers=('NHWC', 'HWIO', 'NHWC'),
        feature_group_count=d)
    conv = conv + dwc_b.reshape(1, 1, 1, d)
    conv_flat = conv.reshape(B, num_heads, N, d).transpose(0, 2, 1, 3).reshape(B, N, C)

    return (xatt + conv_flat) @ wp.T + bp


# ----------------------------------------------------------------------------
if __name__ == "__main__":
    dim = 32
    num_heads = 4            # dim % num_heads == 0  -> head_dim = 8
    head_dim = dim // num_heads
    H = W = 8
    N = H * W
    B = 2
    ksize = 5

    key = jax.random.PRNGKey(0)
    k1, k2, k3, k4, k5, k6, k7, k8, k9, k10 = jax.random.split(key, 10)

    # Deterministic synthetic parameters (shapes follow the module __init__).
    # TODO(synk): PyTorch uses trunc_normal_(std=0.02); plain normal(0, 0.02) used here.
    wq = (jax.random.normal(k1, (dim, dim)) * 0.02).astype(jnp.float32)          # (out, in)
    wkv = (jax.random.normal(k2, (2 * dim, dim)) * 0.02).astype(jnp.float32)
    wp = (jax.random.normal(k3, (dim, dim)) * 0.02).astype(jnp.float32)
    dwc_w = (jax.random.normal(k4, (head_dim, 1, ksize, ksize))
             * math.sqrt(2.0 / (ksize * ksize))).astype(jnp.float32)

    # small nonzero biases / scale to exercise every broadcast path
    bq = (jax.random.normal(k6, (dim,)) * 0.02).astype(jnp.float32)
    bkv = (jax.random.normal(k7, (2 * dim,)) * 0.02).astype(jnp.float32)
    bp = (jax.random.normal(k8, (dim,)) * 0.02).astype(jnp.float32)
    dwc_b = (jax.random.normal(k9, (head_dim,)) * 0.02).astype(jnp.float32)
    scale_p = (jax.random.normal(k10, (dim,)) * 0.1).astype(jnp.float32)
    ff = jnp.full((dim,), 3.0, jnp.float32)           # focusing_factor

    params = (wq, bq, wkv, bkv, wp, bp, ff, scale_p, dwc_w, dwc_b)

    x = jax.random.normal(k5, (B, N, dim), jnp.float32)

    out = flpvt2_forward(x, params, num_heads=num_heads, resol=(H, W), ksize=ksize)
    out = jax.block_until_ready(out)

    ref = flpvt2_reference(x, params, num_heads=num_heads, resol=(H, W), ksize=ksize)
    ref = jax.block_until_ready(ref)

    err = float(jnp.max(jnp.abs(out - ref)))
    assert out.shape == (B, N, dim), out.shape
    # tolerance accounts for bf16 MXU operands (f32 accumulation) vs. f32 reference
    assert err < 5e-3, f"max abs err {err}"

    print("KERNEL_OK")
</pallas_src>

<mosaic_0001>
module attributes {stable_mosaic.version = 11 : i64} {
  func.func @_flpvt2_kernel(%arg0: i32, %arg1: memref<128x32xbf16, #tpu.memory_space<vmem>>, %arg2: memref<32x96xbf16, #tpu.memory_space<vmem>>, %arg3: memref<1x96xf32, #tpu.memory_space<vmem>>, %arg4: memref<32x32xbf16, #tpu.memory_space<vmem>>, %arg5: memref<1x32xf32, #tpu.memory_space<vmem>>, %arg6: memref<1x32xf32, #tpu.memory_space<vmem>>, %arg7: memref<1x32xf32, #tpu.memory_space<vmem>>, %arg8: memref<32x32xbf16, #tpu.memory_space<vmem>>, %arg9: memref<25x32xf32, #tpu.memory_space<vmem>>, %arg10: memref<1x32xf32, #tpu.memory_space<vmem>>, %arg11: memref<128x32xf32, #tpu.memory_space<vmem>>, %arg12: memref<200x32xf32, #tpu.memory_space<vmem>>) attributes {dimension_semantics = [#tpu.dimension_semantics<parallel>], iteration_bounds = array<i64: 1>, scalar_prefetch = 0 : i64, scratch_operands = 1 : i64, tpu.core_type = #tpu.core_type<tc>, window_params = [{transform_indices = @transform_0, window_bounds = array<i64: 128, 32>}, {pipeline_mode = #tpu.pipeline_mode<synchronous>, transform_indices = @transform_1, window_bounds = array<i64: 32, 96>}, {pipeline_mode = #tpu.pipeline_mode<synchronous>, transform_indices = @transform_2, window_bounds = array<i64: 1, 96>}, {pipeline_mode = #tpu.pipeline_mode<synchronous>, transform_indices = @transform_3, window_bounds = array<i64: 32, 32>}, {pipeline_mode = #tpu.pipeline_mode<synchronous>, transform_indices = @transform_4, window_bounds = array<i64: 1, 32>}, {pipeline_mode = #tpu.pipeline_mode<synchronous>, transform_indices = @transform_5, window_bounds = array<i64: 1, 32>}, {pipeline_mode = #tpu.pipeline_mode<synchronous>, transform_indices = @transform_6, window_bounds = array<i64: 1, 32>}, {pipeline_mode = #tpu.pipeline_mode<synchronous>, transform_indices = @transform_7, window_bounds = array<i64: 32, 32>}, {pipeline_mode = #tpu.pipeline_mode<synchronous>, transform_indices = @transform_8, window_bounds = array<i64: 25, 32>}, {pipeline_mode = #tpu.pipeline_mode<synchronous>, transform_indices = @transform_9, window_bounds = array<i64: 1, 32>}, {transform_indices = @transform_10, window_bounds = array<i64: 128, 32>}]} {
    %c0 = arith.constant 0 : index
    %c0_0 = arith.constant 0 : index
    %0 = vector.load %arg1[%c0, %c0_0] : memref<128x32xbf16, #tpu.memory_space<vmem>>, vector<128x32xbf16>
    %c0_1 = arith.constant 0 : index
    %c0_2 = arith.constant 0 : index
    %1 = vector.load %arg2[%c0_1, %c0_2] : memref<32x96xbf16, #tpu.memory_space<vmem>>, vector<32x96xbf16>
    %cst = arith.constant dense<0.000000e+00> : vector<128x96xf32>
    %2 = tpu.matmul %0, %1, %cst {dimension_numbers = #tpu.dot_dimension_numbers<[1], [0], [0], [1], [0, 0, 1, 1], [], []>} : vector<128x32xbf16>, vector<32x96xbf16>, vector<128x96xf32> -> vector<128x96xf32>
    %c0_3 = arith.constant 0 : index
    %c0_4 = arith.constant 0 : index
    %3 = vector.load %arg3[%c0_3, %c0_4] : memref<1x96xf32, #tpu.memory_space<vmem>>, vector<1x96xf32>
    %4 = vector.broadcast %3 : vector<1x96xf32> to vector<128x96xf32>
    %5 = arith.addf %2, %4 : vector<128x96xf32>
    %6 = vector.extract_strided_slice %5 {offsets = [0, 0], sizes = [128, 32], strides = [1, 1]} : vector<128x96xf32> to vector<128x32xf32>
    %7 = vector.extract_strided_slice %5 {offsets = [0, 32], sizes = [128, 32], strides = [1, 1]} : vector<128x96xf32> to vector<128x32xf32>
    %8 = vector.extract_strided_slice %5 {offsets = [0, 64], sizes = [128, 32], strides = [1, 1]} : vector<128x96xf32> to vector<128x32xf32>
    %c0_5 = arith.constant 0 : index
    %c0_6 = arith.constant 0 : index
    %9 = vector.load %arg6[%c0_5, %c0_6] : memref<1x32xf32, #tpu.memory_space<vmem>>, vector<1x32xf32>
    %c0_7 = arith.constant 0 : index
    %c0_8 = arith.constant 0 : index
    %10 = vector.load %arg7[%c0_7, %c0_8] : memref<1x32xf32, #tpu.memory_space<vmem>>, vector<1x32xf32>
    %cst_9 = arith.constant 0.000000e+00 : f32
    %11 = vector.broadcast %cst_9 : f32 to vector<128x32xf32>
    %12 = arith.maximumf %6, %11 : vector<128x32xf32>
    %cst_10 = arith.constant 9.99999997E-7 : f32
    %13 = vector.broadcast %cst_10 : f32 to vector<128x32xf32>
    %14 = arith.addf %12, %13 : vector<128x32xf32>
    %15 = vector.broadcast %10 : vector<1x32xf32> to vector<128x32xf32>
    %16 = arith.mulf %14, %15 : vector<128x32xf32>
    %cst_11 = arith.constant 0.000000e+00 : f32
    %17 = vector.broadcast %cst_11 : f32 to vector<128x32xf32>
    %18 = arith.maximumf %7, %17 : vector<128x32xf32>
    %cst_12 = arith.constant 9.99999997E-7 : f32
    %19 = vector.broadcast %cst_12 : f32 to vector<128x32xf32>
    %20 = arith.addf %18, %19 : vector<128x32xf32>
    %21 = vector.broadcast %10 : vector<1x32xf32> to vector<128x32xf32>
    %22 = arith.mulf %20, %21 : vector<128x32xf32>
    %23 = arith.mulf %16, %16 : vector<128x32xf32>
    %cst_13 = arith.constant dense<0.000000e+00> : vector<128xf32>
    %24 = vector.multi_reduction <add>, %23, %cst_13 [1] : vector<128x32xf32> to vector<128xf32>
    %25 = vector.shape_cast %24 : vector<128xf32> to vector<128x1xf32>
    %26 = arith.mulf %22, %22 : vector<128x32xf32>
    %cst_14 = arith.constant dense<0.000000e+00> : vector<128xf32>
    %27 = vector.multi_reduction <add>, %26, %cst_14 [1] : vector<128x32xf32> to vector<128xf32>
    %28 = vector.shape_cast %27 : vector<128xf32> to vector<128x1xf32>
    %29 = math.log %16 : vector<128x32xf32>
    %30 = vector.broadcast %9 : vector<1x32xf32> to vector<128x32xf32>
    %31 = arith.mulf %30, %29 : vector<128x32xf32>
    %32 = math.exp %31 : vector<128x32xf32>
    %33 = math.log %22 : vector<128x32xf32>
    %34 = vector.broadcast %9 : vector<1x32xf32> to vector<128x32xf32>
    %35 = arith.mulf %34, %33 : vector<128x32xf32>
    %36 = math.exp %35 : vector<128x32xf32>
    %37 = arith.mulf %32, %32 : vector<128x32xf32>
    %cst_15 = arith.constant dense<0.000000e+00> : vector<128xf32>
    %38 = vector.multi_reduction <add>, %37, %cst_15 [1] : vector<128x32xf32> to vector<128xf32>
    %39 = vector.shape_cast %38 : vector<128xf32> to vector<128x1xf32>
    %40 = arith.mulf %36, %36 : vector<128x32xf32>
    %cst_16 = arith.constant dense<0.000000e+00> : vector<128xf32>
    %41 = vector.multi_reduction <add>, %40, %cst_16 [1] : vector<128x32xf32> to vector<128xf32>
    %42 = vector.shape_cast %41 : vector<128xf32> to vector<128x1xf32>
    %43 = math.sqrt %25 : vector<128x1xf32>
    %44 = math.rsqrt %39 : vector<128x1xf32>
    %45 = arith.mulf %43, %44 : vector<128x1xf32>
    %46 = vector.broadcast %45 : vector<128x1xf32> to vector<128x32xf32>
    %47 = arith.mulf %32, %46 : vector<128x32xf32>
    %48 = math.sqrt %28 : vector<128x1xf32>
    %49 = math.rsqrt %42 : vector<128x1xf32>
    %50 = arith.mulf %48, %49 : vector<128x1xf32>
    %51 = vector.broadcast %50 : vector<128x1xf32> to vector<128x32xf32>
    %52 = arith.mulf %36, %51 : vector<128x32xf32>
    %c0_17 = arith.constant 0 : index
    %c0_18 = arith.constant 0 : index
    %53 = vector.load %arg8[%c0_17, %c0_18] : memref<32x32xbf16, #tpu.memory_space<vmem>>, vector<32x32xbf16>
    %54 = vector.extract_strided_slice %47 {offsets = [0, 0], sizes = [64, 32], strides = [1, 1]} : vector<128x32xf32> to vector<64x32xf32>
    %55 = vector.extract_strided_slice %52 {offsets = [0, 0], sizes = [64, 32], strides = [1, 1]} : vector<128x32xf32> to vector<64x32xf32>
    %56 = vector.extract_strided_slice %8 {offsets = [0, 0], sizes = [64, 32], strides = [1, 1]} : vector<128x32xf32> to vector<64x32xf32>
    %cst_19 = arith.constant dense<0.000000e+00> : vector<32xf32>
    %57 = vector.multi_reduction <add>, %55, %cst_19 [0] : vector<64x32xf32> to vector<32xf32>
    %58 = vector.shape_cast %57 : vector<32xf32> to vector<1x32xf32>
    %cst_20 = arith.constant 6.400000e+01 : f32
    %59 = vector.broadcast %cst_20 : f32 to vector<1x32xf32>
    %60 = arith.divf %58, %59 : vector<1x32xf32>
    %61 = vector.broadcast %60 : vector<1x32xf32> to vector<64x32xf32>
    %62 = arith.mulf %54, %61 : vector<64x32xf32>
    %cst_21 = arith.constant 1.250000e-01 : f32
    %63 = vector.broadcast %cst_21 : f32 to vector<64x32xf32>
    %64 = arith.mulf %55, %63 : vector<64x32xf32>
    %65 = arith.truncf %64 : vector<64x32xf32> to vector<64x32xbf16>
    %cst_22 = arith.constant 1.250000e-01 : f32
    %66 = vector.broadcast %cst_22 : f32 to vector<64x32xf32>
    %67 = arith.mulf %56, %66 : vector<64x32xf32>
    %68 = arith.truncf %67 : vector<64x32xf32> to vector<64x32xbf16>
    %cst_23 = arith.constant dense<0.000000e+00> : vector<32x32xf32>
    %69 = tpu.matmul %65, %68, %cst_23 {dimension_numbers = #tpu.dot_dimension_numbers<[0], [0], [1], [1], [0, 1, 1, 1], [], []>} : vector<64x32xbf16>, vector<64x32xbf16>, vector<32x32xf32> -> vector<32x32xf32>
    %70 = arith.truncf %69 : vector<32x32xf32> to vector<32x32xbf16>
    %71 = arith.mulf %70, %53 : vector<32x32xbf16>
    %72 = arith.truncf %54 : vector<64x32xf32> to vector<64x32xbf16>
    %cst_24 = arith.constant dense<0.000000e+00> : vector<64x32xf32>
    %73 = tpu.matmul %72, %71, %cst_24 {dimension_numbers = #tpu.dot_dimension_numbers<[1], [0], [0], [1], [0, 0, 1, 1], [], []>} : vector<64x32xbf16>, vector<32x32xbf16>, vector<64x32xf32> -> vector<64x32xf32>
    %74 = vector.extract_strided_slice %47 {offsets = [64, 0], sizes = [64, 32], strides = [1, 1]} : vector<128x32xf32> to vector<64x32xf32>
    %75 = vector.extract_strided_slice %52 {offsets = [64, 0], sizes = [64, 32], strides = [1, 1]} : vector<128x32xf32> to vector<64x32xf32>
    %76 = vector.extract_strided_slice %8 {offsets = [64, 0], sizes = [64, 32], strides = [1, 1]} : vector<128x32xf32> to vector<64x32xf32>
    %cst_25 = arith.constant dense<0.000000e+00> : vector<32xf32>
    %77 = vector.multi_reduction <add>, %75, %cst_25 [0] : vector<64x32xf32> to vector<32xf32>
    %78 = vector.shape_cast %77 : vector<32xf32> to vector<1x32xf32>
    %cst_26 = arith.constant 6.400000e+01 : f32
    %79 = vector.broadcast %cst_26 : f32 to vector<1x32xf32>
    %80 = arith.divf %78, %79 : vector<1x32xf32>
    %81 = vector.broadcast %80 : vector<1x32xf32> to vector<64x32xf32>
    %82 = arith.mulf %74, %81 : vector<64x32xf32>
    %cst_27 = arith.constant 1.250000e-01 : f32
    %83 = vector.broadcast %cst_27 : f32 to vector<64x32xf32>
    %84 = arith.mulf %75, %83 : vector<64x32xf32>
    %85 = arith.truncf %84 : vector<64x32xf32> to vector<64x32xbf16>
    %cst_28 = arith.constant 1.250000e-01 : f32
    %86 = vector.broadcast %cst_28 : f32 to vector<64x32xf32>
    %87 = arith.mulf %76, %86 : vector<64x32xf32>
    %88 = arith.truncf %87 : vector<64x32xf32> to vector<64x32xbf16>
    %cst_29 = arith.constant dense<0.000000e+00> : vector<32x32xf32>
    %89 = tpu.matmul %85, %88, %cst_29 {dimension_numbers = #tpu.dot_dimension_numbers<[0], [0], [1], [1], [0, 1, 1, 1], [], []>} : vector<64x32xbf16>, vector<64x32xbf16>, vector<32x32xf32> -> vector<32x32xf32>
    %90 = arith.truncf %89 : vector<32x32xf32> to vector<32x32xbf16>
    %91 = arith.mulf %90, %53 : vector<32x32xbf16>
    %92 = arith.truncf %74 : vector<64x32xf32> to vector<64x32xbf16>
    %cst_30 = arith.constant dense<0.000000e+00> : vector<64x32xf32>
    %93 = tpu.matmul %92, %91, %cst_30 {dimension_numbers = #tpu.dot_dimension_numbers<[1], [0], [0], [1], [0, 0, 1, 1], [], []>} : vector<64x32xbf16>, vector<32x32xbf16>, vector<64x32xf32> -> vector<64x32xf32>
    %94 = tpu.concatenate %62, %82 in 0 : vector<64x32xf32>, vector<64x32xf32> -> vector<128x32xf32>
    %95 = arith.truncf %94 : vector<128x32xf32> to vector<128x32xbf16>
    %cst_31 = arith.constant dense<0.000000e+00> : vector<128x32xf32>
    %96 = tpu.matmul %95, %53, %cst_31 {dimension_numbers = #tpu.dot_dimension_numbers<[1], [0], [0], [1], [0, 0, 1, 1], [], []>} : vector<128x32xbf16>, vector<32x32xbf16>, vector<128x32xf32> -> vector<128x32xf32>
    %cst_32 = arith.constant 9.99999997E-7 : f32
    %97 = vector.broadcast %cst_32 : f32 to vector<128x32xf32>
    %98 = arith.addf %96, %97 : vector<128x32xf32>
    %99 = tpu.reciprocal %98 {approx = true} : vector<128x32xf32> -> vector<128x32xf32>
    %100 = tpu.concatenate %73, %93 in 0 : vector<64x32xf32>, vector<64x32xf32> -> vector<128x32xf32>
    %101 = arith.mulf %100, %99 : vector<128x32xf32>
    %cst_33 = arith.constant 0.000000e+00 : f32
    %102 = vector.broadcast %cst_33 : f32 to vector<24x32xf32>
    %c0_34 = arith.constant 0 : index
    %c0_35 = arith.constant 0 : index
    %103 = vector.load %arg12[%c0_34, %c0_35] : memref<200x32xf32, #tpu.memory_space<vmem>>, vector<24x32xf32>
    tpu.vector_store %arg12[%c0_34, %c0_35], %102 {strides = array<i32>} : memref<200x32xf32, #tpu.memory_space<vmem>>, vector<24x32xf32>,
    %c88 = arith.constant 88 : index
    %c0_36 = arith.constant 0 : index
    %104 = vector.load %arg12[%c88, %c0_36] : memref<200x32xf32, #tpu.memory_space<vmem>>, vector<24x32xf32>
    tpu.vector_store %arg12[%c88, %c0_36], %102 {strides = array<i32>} : memref<200x32xf32, #tpu.memory_space<vmem>>, vector<24x32xf32>,
    %c176 = arith.constant 176 : index
    %c0_37 = arith.constant 0 : index
    %105 = vector.load %arg12[%c176, %c0_37] : memref<200x32xf32, #tpu.memory_space<vmem>>, vector<24x32xf32>
    tpu.vector_store %arg12[%c176, %c0_37], %102 {strides = array<i32>} : memref<200x32xf32, #tpu.memory_space<vmem>>, vector<24x32xf32>,
    %106 = vector.extract_strided_slice %8 {offsets = [0, 0], sizes = [64, 32], strides = [1, 1]} : vector<128x32xf32> to vector<64x32xf32>
    %c24 = arith.constant 24 : index
    %c0_38 = arith.constant 0 : index
    %107 = vector.load %arg12[%c24, %c0_38] : memref<200x32xf32, #tpu.memory_space<vmem>>, vector<64x32xf32>
    tpu.vector_store %arg12[%c24, %c0_38], %106 {strides = array<i32>} : memref<200x32xf32, #tpu.memory_space<vmem>>, vector<64x32xf32>,
    %108 = vector.extract_strided_slice %8 {offsets = [64, 0], sizes = [64, 32], strides = [1, 1]} : vector<128x32xf32> to vector<64x32xf32>
    %c112 = arith.constant 112 : index
    %c0_39 = arith.constant 0 : index
    %109 = vector.load %arg12[%c112, %c0_39] : memref<200x32xf32, #tpu.memory_space<vmem>>, vector<64x32xf32>
    tpu.vector_store %arg12[%c112, %c0_39], %108 {strides = array<i32>} : memref<200x32xf32, #tpu.memory_space<vmem>>, vector<64x32xf32>,
    %c0_40 = arith.constant 0 : index
    %c0_41 = arith.constant 0 : index
    %110 = vector.load %arg9[%c0_40, %c0_41] : memref<25x32xf32, #tpu.memory_space<vmem>>, vector<25x32xf32>
    %111 = tpu.iota {dimensions = array<i32: 0>} : vector<152x1xi32>
    %c8_i32 = arith.constant 8 : i32
    %c0_i32 = arith.constant 0 : i32
    %112 = arith.cmpi eq, %c8_i32, %c0_i32 : i32
    %c1_i32 = arith.constant 1 : i32
    %113 = arith.select %112, %c1_i32, %c8_i32 : i32
    %114 = vector.broadcast %113 : i32 to vector<152x1xi32>
    %115 = arith.remsi %111, %114 : vector<152x1xi32>
    %c0_i32_42 = arith.constant 0 : i32
    %116 = vector.broadcast %c0_i32_42 : i32 to vector<152x1xi32>
    %117 = arith.cmpi ne, %115, %116 : vector<152x1xi32>
    %c0_i32_43 = arith.constant 0 : i32
    %118 = vector.broadcast %c0_i32_43 : i32 to vector<152x1xi32>
    %119 = arith.cmpi slt, %115, %118 : vector<152x1xi32>
    %c0_i32_44 = arith.constant 0 : i32
    %120 = arith.cmpi slt, %113, %c0_i32_44 : i32
    %121 = vector.broadcast %120 : i1 to vector<152x1xi1>
    %122 = vector.broadcast %121 : vector<152x1xi1> to vector<152x1xi1>
    %123 = arith.xori %119, %122 : vector<152x1xi1>
    %124 = arith.andi %123, %117 : vector<152x1xi1>
    %125 = vector.broadcast %113 : i32 to vector<152x1xi32>
    %126 = arith.addi %115, %125 : vector<152x1xi32>
    %127 = arith.select %124, %126, %115 : vector<152x1xi1>, vector<152x1xi32>
    %cst_45 = arith.constant 0.000000e+00 : f32
    %128 = vector.broadcast %cst_45 : f32 to vector<152x32xf32>
    %cst_46 = arith.constant 0.000000e+00 : f32
    %129 = vector.broadcast %cst_46 : f32 to vector<152x32xf32>
    %c6 = arith.constant 6 : index
    %c0_47 = arith.constant 0 : index
    %130 = vector.load %arg12[%c6, %c0_47] : memref<200x32xf32, #tpu.memory_space<vmem>>, vector<152x32xf32>
    %131 = vector.extract_strided_slice %110 {offsets = [0, 0], sizes = [1, 32], strides = [1, 1]} : vector<25x32xf32> to vector<1x32xf32>
    %132 = vector.broadcast %131 : vector<1x32xf32> to vector<152x32xf32>
    %133 = arith.mulf %130, %132 : vector<152x32xf32>
    %134 = arith.addf %129, %133 : vector<152x32xf32>
    %c14 = arith.constant 14 : index
    %c0_48 = arith.constant 0 : index
    %135 = vector.load %arg12[%c14, %c0_48] : memref<200x32xf32, #tpu.memory_space<vmem>>, vector<152x32xf32>
    %136 = vector.extract_strided_slice %110 {offsets = [5, 0], sizes = [1, 32], strides = [1, 1]} : vector<25x32xf32> to vector<1x32xf32>
    %137 = vector.broadcast %136 : vector<1x32xf32> to vector<152x32xf32>
    %138 = arith.mulf %135, %137 : vector<152x32xf32>
    %139 = arith.addf %134, %138 : vector<152x32xf32>
    %c22 = arith.constant 22 : index
    %c0_49 = arith.constant 0 : index
    %140 = vector.load %arg12[%c22, %c0_49] : memref<200x32xf32, #tpu.memory_space<vmem>>, vector<152x32xf32>
    %141 = vector.extract_strided_slice %110 {offsets = [10, 0], sizes = [1, 32], strides = [1, 1]} : vector<25x32xf32> to vector<1x32xf32>
    %142 = vector.broadcast %141 : vector<1x32xf32> to vector<152x32xf32>
    %143 = arith.mulf %140, %142 : vector<152x32xf32>
    %144 = arith.addf %139, %143 : vector<152x32xf32>
    %c30 = arith.constant 30 : index
    %c0_50 = arith.constant 0 : index
    %145 = vector.load %arg12[%c30, %c0_50] : memref<200x32xf32, #tpu.memory_space<vmem>>, vector<152x32xf32>
    %146 = vector.extract_strided_slice %110 {offsets = [15, 0], sizes = [1, 32], strides = [1, 1]} : vector<25x32xf32> to vector<1x32xf32>
    %147 = vector.broadcast %146 : vector<1x32xf32> to vector<152x32xf32>
    %148 = arith.mulf %145, %147 : vector<152x32xf32>
    %149 = arith.addf %144, %148 : vector<152x32xf32>
    %c38 = arith.constant 38 : index
    %c0_51 = arith.constant 0 : index
    %150 = vector.load %arg12[%c38, %c0_51] : memref<200x32xf32, #tpu.memory_space<vmem>>, vector<152x32xf32>
    %151 = vector.extract_strided_slice %110 {offsets = [20, 0], sizes = [1, 32], strides = [1, 1]} : vector<25x32xf32> to vector<1x32xf32>
    %152 = vector.broadcast %151 : vector<1x32xf32> to vector<152x32xf32>
    %153 = arith.mulf %150, %152 : vector<152x32xf32>
    %154 = arith.addf %149, %153 : vector<152x32xf32>
    %c-2_i32 = arith.constant -2 : i32
    %155 = vector.broadcast %c-2_i32 : i32 to vector<152x1xi32>
    %156 = arith.addi %127, %155 : vector<152x1xi32>
    %c0_i32_52 = arith.constant 0 : i32
    %157 = vector.broadcast %c0_i32_52 : i32 to vector<152x1xi32>
    %158 = arith.cmpi sge, %156, %157 : vector<152x1xi32>
    %c-2_i32_53 = arith.constant -2 : i32
    %159 = vector.broadcast %c-2_i32_53 : i32 to vector<152x1xi32>
    %160 = arith.addi %127, %159 : vector<152x1xi32>
    %c8_i32_54 = arith.constant 8 : i32
    %161 = vector.broadcast %c8_i32_54 : i32 to vector<152x1xi32>
    %162 = arith.cmpi slt, %160, %161 : vector<152x1xi32>
    %163 = arith.andi %158, %162 : vector<152x1xi1>
    %164 = arith.extui %163 : vector<152x1xi1> to vector<152x1xi32>
    %165 = arith.sitofp %164 : vector<152x1xi32> to vector<152x1xf32>
    %166 = vector.broadcast %165 : vector<152x1xf32> to vector<152x32xf32>
    %167 = arith.mulf %154, %166 : vector<152x32xf32>
    %168 = arith.addf %128, %167 : vector<152x32xf32>
    %cst_55 = arith.constant 0.000000e+00 : f32
    %169 = vector.broadcast %cst_55 : f32 to vector<152x32xf32>
    %c7 = arith.constant 7 : index
    %c0_56 = arith.constant 0 : index
    %170 = vector.load %arg12[%c7, %c0_56] : memref<200x32xf32, #tpu.memory_space<vmem>>, vector<152x32xf32>
    %171 = vector.extract_strided_slice %110 {offsets = [1, 0], sizes = [1, 32], strides = [1, 1]} : vector<25x32xf32> to vector<1x32xf32>
    %172 = vector.broadcast %171 : vector<1x32xf32> to vector<152x32xf32>
    %173 = arith.mulf %170, %172 : vector<152x32xf32>
    %174 = arith.addf %169, %173 : vector<152x32xf32>
    %c15 = arith.constant 15 : index
    %c0_57 = arith.constant 0 : index
    %175 = vector.load %arg12[%c15, %c0_57] : memref<200x32xf32, #tpu.memory_space<vmem>>, vector<152x32xf32>
    %176 = vector.extract_strided_slice %110 {offsets = [6, 0], sizes = [1, 32], strides = [1, 1]} : vector<25x32xf32> to vector<1x32xf32>
    %177 = vector.broadcast %176 : vector<1x32xf32> to vector<152x32xf32>
    %178 = arith.mulf %175, %177 : vector<152x32xf32>
    %179 = arith.addf %174, %178 : vector<152x32xf32>
    %c23 = arith.constant 23 : index
    %c0_58 = arith.constant 0 : index
    %180 = vector.load %arg12[%c23, %c0_58] : memref<200x32xf32, #tpu.memory_space<vmem>>, vector<152x32xf32>
    %181 = vector.extract_strided_slice %110 {offsets = [11, 0], sizes = [1, 32], strides = [1, 1]} : vector<25x32xf32> to vector<1x32xf32>
    %182 = vector.broadcast %181 : vector<1x32xf32> to vector<152x32xf32>
    %183 = arith.mulf %180, %182 : vector<152x32xf32>
    %184 = arith.addf %179, %183 : vector<152x32xf32>
    %c31 = arith.constant 31 : index
    %c0_59 = arith.constant 0 : index
    %185 = vector.load %arg12[%c31, %c0_59] : memref<200x32xf32, #tpu.memory_space<vmem>>, vector<152x32xf32>
    %186 = vector.extract_strided_slice %110 {offsets = [16, 0], sizes = [1, 32], strides = [1, 1]} : vector<25x32xf32> to vector<1x32xf32>
    %187 = vector.broadcast %186 : vector<1x32xf32> to vector<152x32xf32>
    %188 = arith.mulf %185, %187 : vector<152x32xf32>
    %189 = arith.addf %184, %188 : vector<152x32xf32>
    %c39 = arith.constant 39 : index
    %c0_60 = arith.constant 0 : index
    %190 = vector.load %arg12[%c39, %c0_60] : memref<200x32xf32, #tpu.memory_space<vmem>>, vector<152x32xf32>
    %191 = vector.extract_strided_slice %110 {offsets = [21, 0], sizes = [1, 32], strides = [1, 1]} : vector<25x32xf32> to vector<1x32xf32>
    %192 = vector.broadcast %191 : vector<1x32xf32> to vector<152x32xf32>
    %193 = arith.mulf %190, %192 : vector<152x32xf32>
    %194 = arith.addf %189, %193 : vector<152x32xf32>
    %c-1_i32 = arith.constant -1 : i32
    %195 = vector.broadcast %c-1_i32 : i32 to vector<152x1xi32>
    %196 = arith.addi %127, %195 : vector<152x1xi32>
    %c0_i32_61 = arith.constant 0 : i32
    %197 = vector.broadcast %c0_i32_61 : i32 to vector<152x1xi32>
    %198 = arith.cmpi sge, %196, %197 : vector<152x1xi32>
    %c-1_i32_62 = arith.constant -1 : i32
    %199 = vector.broadcast %c-1_i32_62 : i32 to vector<152x1xi32>
    %200 = arith.addi %127, %199 : vector<152x1xi32>
    %c8_i32_63 = arith.constant 8 : i32
    %201 = vector.broadcast %c8_i32_63 : i32 to vector<152x1xi32>
    %202 = arith.cmpi slt, %200, %201 : vector<152x1xi32>
    %203 = arith.andi %198, %202 : vector<152x1xi1>
    %204 = arith.extui %203 : vector<152x1xi1> to vector<152x1xi32>
    %205 = arith.sitofp %204 : vector<152x1xi32> to vector<152x1xf32>
    %206 = vector.broadcast %205 : vector<152x1xf32> to vector<152x32xf32>
    %207 = arith.mulf %194, %206 : vector<152x32xf32>
    %208 = arith.addf %168, %207 : vector<152x32xf32>
    %cst_64 = arith.constant 0.000000e+00 : f32
    %209 = vector.broadcast %cst_64 : f32 to vector<152x32xf32>
    %c8 = arith.constant 8 : index
    %c0_65 = arith.constant 0 : index
    %210 = vector.load %arg12[%c8, %c0_65] : memref<200x32xf32, #tpu.memory_space<vmem>>, vector<152x32xf32>
    %211 = vector.extract_strided_slice %110 {offsets = [2, 0], sizes = [1, 32], strides = [1, 1]} : vector<25x32xf32> to vector<1x32xf32>
    %212 = vector.broadcast %211 : vector<1x32xf32> to vector<152x32xf32>
    %213 = arith.mulf %210, %212 : vector<152x32xf32>
    %214 = arith.addf %209, %213 : vector<152x32xf32>
    %c16 = arith.constant 16 : index
    %c0_66 = arith.constant 0 : index
    %215 = vector.load %arg12[%c16, %c0_66] : memref<200x32xf32, #tpu.memory_space<vmem>>, vector<152x32xf32>
    %216 = vector.extract_strided_slice %110 {offsets = [7, 0], sizes = [1, 32], strides = [1, 1]} : vector<25x32xf32> to vector<1x32xf32>
    %217 = vector.broadcast %216 : vector<1x32xf32> to vector<152x32xf32>
    %218 = arith.mulf %215, %217 : vector<152x32xf32>
    %219 = arith.addf %214, %218 : vector<152x32xf32>
    %c24_67 = arith.constant 24 : index
    %c0_68 = arith.constant 0 : index
    %220 = vector.load %arg12[%c24_67, %c0_68] : memref<200x32xf32, #tpu.memory_space<vmem>>, vector<152x32xf32>
    %221 = vector.extract_strided_slice %110 {offsets = [12, 0], sizes = [1, 32], strides = [1, 1]} : vector<25x32xf32> to vector<1x32xf32>
    %222 = vector.broadcast %221 : vector<1x32xf32> to vector<152x32xf32>
    %223 = arith.mulf %220, %222 : vector<152x32xf32>
    %224 = arith.addf %219, %223 : vector<152x32xf32>
    %c32 = arith.constant 32 : index
    %c0_69 = arith.constant 0 : index
    %225 = vector.load %arg12[%c32, %c0_69] : memref<200x32xf32, #tpu.memory_space<vmem>>, vector<152x32xf32>
    %226 = vector.extract_strided_slice %110 {offsets = [17, 0], sizes = [1, 32], strides = [1, 1]} : vector<25x32xf32> to vector<1x32xf32>
    %227 = vector.broadcast %226 : vector<1x32xf32> to vector<152x32xf32>
    %228 = arith.mulf %225, %227 : vector<152x32xf32>
    %229 = arith.addf %224, %228 : vector<152x32xf32>
    %c40 = arith.constant 40 : index
    %c0_70 = arith.constant 0 : index
    %230 = vector.load %arg12[%c40, %c0_70] : memref<200x32xf32, #tpu.memory_space<vmem>>, vector<152x32xf32>
    %231 = vector.extract_strided_slice %110 {offsets = [22, 0], sizes = [1, 32], strides = [1, 1]} : vector<25x32xf32> to vector<1x32xf32>
    %232 = vector.broadcast %231 : vector<1x32xf32> to vector<152x32xf32>
    %233 = arith.mulf %230, %232 : vector<152x32xf32>
    %234 = arith.addf %229, %233 : vector<152x32xf32>
    %235 = arith.addf %208, %234 : vector<152x32xf32>
    %cst_71 = arith.constant 0.000000e+00 : f32
    %236 = vector.broadcast %cst_71 : f32 to vector<152x32xf32>
    %c9 = arith.constant 9 : index
    %c0_72 = arith.constant 0 : index
    %237 = vector.load %arg12[%c9, %c0_72] : memref<200x32xf32, #tpu.memory_space<vmem>>, vector<152x32xf32>
    %238 = vector.extract_strided_slice %110 {offsets = [3, 0], sizes = [1, 32], strides = [1, 1]} : vector<25x32xf32> to vector<1x32xf32>
    %239 = vector.broadcast %238 : vector<1x32xf32> to vector<152x32xf32>
    %240 = arith.mulf %237, %239 : vector<152x32xf32>
    %241 = arith.addf %236, %240 : vector<152x32xf32>
    %c17 = arith.constant 17 : index
    %c0_73 = arith.constant 0 : index
    %242 = vector.load %arg12[%c17, %c0_73] : memref<200x32xf32, #tpu.memory_space<vmem>>, vector<152x32xf32>
    %243 = vector.extract_strided_slice %110 {offsets = [8, 0], sizes = [1, 32], strides = [1, 1]} : vector<25x32xf32> to vector<1x32xf32>
    %244 = vector.broadcast %243 : vector<1x32xf32> to vector<152x32xf32>
    %245 = arith.mulf %242, %244 : vector<152x32xf32>
    %246 = arith.addf %241, %245 : vector<152x32xf32>
    %c25 = arith.constant 25 : index
    %c0_74 = arith.constant 0 : index
    %247 = vector.load %arg12[%c25, %c0_74] : memref<200x32xf32, #tpu.memory_space<vmem>>, vector<152x32xf32>
    %248 = vector.extract_strided_slice %110 {offsets = [13, 0], sizes = [1, 32], strides = [1, 1]} : vector<25x32xf32> to vector<1x32xf32>
    %249 = vector.broadcast %248 : vector<1x32xf32> to vector<152x32xf32>
    %250 = arith.mulf %247, %249 : vector<152x32xf32>
    %251 = arith.addf %246, %250 : vector<152x32xf32>
    %c33 = arith.constant 33 : index
    %c0_75 = arith.constant 0 : index
    %252 = vector.load %arg12[%c33, %c0_75] : memref<200x32xf32, #tpu.memory_space<vmem>>, vector<152x32xf32>
    %253 = vector.extract_strided_slice %110 {offsets = [18, 0], sizes = [1, 32], strides = [1, 1]} : vector<25x32xf32> to vector<1x32xf32>
    %254 = vector.broadcast %253 : vector<1x32xf32> to vector<152x32xf32>
    %255 = arith.mulf %252, %254 : vector<152x32xf32>
    %256 = arith.addf %251, %255 : vector<152x32xf32>
    %c41 = arith.constant 41 : index
    %c0_76 = arith.constant 0 : index
    %257 = vector.load %arg12[%c41, %c0_76] : memref<200x32xf32, #tpu.memory_space<vmem>>, vector<152x32xf32>
    %258 = vector.extract_strided_slice %110 {offsets = [23, 0], sizes = [1, 32], strides = [1, 1]} : vector<25x32xf32> to vector<1x32xf32>
    %259 = vector.broadcast %258 : vector<1x32xf32> to vector<152x32xf32>
    %260 = arith.mulf %257, %259 : vector<152x32xf32>
    %261 = arith.addf %256, %260 : vector<152x32xf32>
    %c1_i32_77 = arith.constant 1 : i32
    %262 = vector.broadcast %c1_i32_77 : i32 to vector<152x1xi32>
    %263 = arith.addi %127, %262 : vector<152x1xi32>
    %c0_i32_78 = arith.constant 0 : i32
    %264 = vector.broadcast %c0_i32_78 : i32 to vector<152x1xi32>
    %265 = arith.cmpi sge, %263, %264 : vector<152x1xi32>
    %c1_i32_79 = arith.constant 1 : i32
    %266 = vector.broadcast %c1_i32_79 : i32 to vector<152x1xi32>
    %267 = arith.addi %127, %266 : vector<152x1xi32>
    %c8_i32_80 = arith.constant 8 : i32
    %268 = vector.broadcast %c8_i32_80 : i32 to vector<152x1xi32>
    %269 = arith.cmpi slt, %267, %268 : vector<152x1xi32>
    %270 = arith.andi %265, %269 : vector<152x1xi1>
    %271 = arith.extui %270 : vector<152x1xi1> to vector<152x1xi32>
    %272 = arith.sitofp %271 : vector<152x1xi32> to vector<152x1xf32>
    %273 = vector.broadcast %272 : vector<152x1xf32> to vector<152x32xf32>
    %274 = arith.mulf %261, %273 : vector<152x32xf32>
    %275 = arith.addf %235, %274 : vector<152x32xf32>
    %cst_81 = arith.constant 0.000000e+00 : f32
    %276 = vector.broadcast %cst_81 : f32 to vector<152x32xf32>
    %c10 = arith.constant 10 : index
    %c0_82 = arith.constant 0 : index
    %277 = vector.load %arg12[%c10, %c0_82] : memref<200x32xf32, #tpu.memory_space<vmem>>, vector<152x32xf32>
    %278 = vector.extract_strided_slice %110 {offsets = [4, 0], sizes = [1, 32], strides = [1, 1]} : vector<25x32xf32> to vector<1x32xf32>
    %279 = vector.broadcast %278 : vector<1x32xf32> to vector<152x32xf32>
    %280 = arith.mulf %277, %279 : vector<152x32xf32>
    %281 = arith.addf %276, %280 : vector<152x32xf32>
    %c18 = arith.constant 18 : index
    %c0_83 = arith.constant 0 : index
    %282 = vector.load %arg12[%c18, %c0_83] : memref<200x32xf32, #tpu.memory_space<vmem>>, vector<152x32xf32>
    %283 = vector.extract_strided_slice %110 {offsets = [9, 0], sizes = [1, 32], strides = [1, 1]} : vector<25x32xf32> to vector<1x32xf32>
    %284 = vector.broadcast %283 : vector<1x32xf32> to vector<152x32xf32>
    %285 = arith.mulf %282, %284 : vector<152x32xf32>
    %286 = arith.addf %281, %285 : vector<152x32xf32>
    %c26 = arith.constant 26 : index
    %c0_84 = arith.constant 0 : index
    %287 = vector.load %arg12[%c26, %c0_84] : memref<200x32xf32, #tpu.memory_space<vmem>>, vector<152x32xf32>
    %288 = vector.extract_strided_slice %110 {offsets = [14, 0], sizes = [1, 32], strides = [1, 1]} : vector<25x32xf32> to vector<1x32xf32>
    %289 = vector.broadcast %288 : vector<1x32xf32> to vector<152x32xf32>
    %290 = arith.mulf %287, %289 : vector<152x32xf32>
    %291 = arith.addf %286, %290 : vector<152x32xf32>
    %c34 = arith.constant 34 : index
    %c0_85 = arith.constant 0 : index
    %292 = vector.load %arg12[%c34, %c0_85] : memref<200x32xf32, #tpu.memory_space<vmem>>, vector<152x32xf32>
    %293 = vector.extract_strided_slice %110 {offsets = [19, 0], sizes = [1, 32], strides = [1, 1]} : vector<25x32xf32> to vector<1x32xf32>
    %294 = vector.broadcast %293 : vector<1x32xf32> to vector<152x32xf32>
    %295 = arith.mulf %292, %294 : vector<152x32xf32>
    %296 = arith.addf %291, %295 : vector<152x32xf32>
    %c42 = arith.constant 42 : index
    %c0_86 = arith.constant 0 : index
    %297 = vector.load %arg12[%c42, %c0_86] : memref<200x32xf32, #tpu.memory_space<vmem>>, vector<152x32xf32>
    %298 = vector.extract_strided_slice %110 {offsets = [24, 0], sizes = [1, 32], strides = [1, 1]} : vector<25x32xf32> to vector<1x32xf32>
    %299 = vector.broadcast %298 : vector<1x32xf32> to vector<152x32xf32>
    %300 = arith.mulf %297, %299 : vector<152x32xf32>
    %301 = arith.addf %296, %300 : vector<152x32xf32>
    %c2_i32 = arith.constant 2 : i32
    %302 = vector.broadcast %c2_i32 : i32 to vector<152x1xi32>
    %303 = arith.addi %127, %302 : vector<152x1xi32>
    %c0_i32_87 = arith.constant 0 : i32
    %304 = vector.broadcast %c0_i32_87 : i32 to vector<152x1xi32>
    %305 = arith.cmpi sge, %303, %304 : vector<152x1xi32>
    %c2_i32_88 = arith.constant 2 : i32
    %306 = vector.broadcast %c2_i32_88 : i32 to vector<152x1xi32>
    %307 = arith.addi %127, %306 : vector<152x1xi32>
    %c8_i32_89 = arith.constant 8 : i32
    %308 = vector.broadcast %c8_i32_89 : i32 to vector<152x1xi32>
    %309 = arith.cmpi slt, %307, %308 : vector<152x1xi32>
    %310 = arith.andi %305, %309 : vector<152x1xi1>
    %311 = arith.extui %310 : vector<152x1xi1> to vector<152x1xi32>
    %312 = arith.sitofp %311 : vector<152x1xi32> to vector<152x1xf32>
    %313 = vector.broadcast %312 : vector<152x1xf32> to vector<152x32xf32>
    %314 = arith.mulf %301, %313 : vector<152x32xf32>
    %315 = arith.addf %275, %314 : vector<152x32xf32>
    %316 = vector.extract_strided_slice %315 {offsets = [0, 0], sizes = [64, 32], strides = [1, 1]} : vector<152x32xf32> to vector<64x32xf32>
    %317 = vector.extract_strided_slice %315 {offsets = [88, 0], sizes = [64, 32], strides = [1, 1]} : vector<152x32xf32> to vector<64x32xf32>
    %318 = tpu.concatenate %316, %317 in 0 : vector<64x32xf32>, vector<64x32xf32> -> vector<128x32xf32>
    %319 = arith.addf %101, %318 : vector<128x32xf32>
    %c0_90 = arith.constant 0 : index
    %c0_91 = arith.constant 0 : index
    %320 = vector.load %arg10[%c0_90, %c0_91] : memref<1x32xf32, #tpu.memory_space<vmem>>, vector<1x32xf32>
    %321 = vector.broadcast %320 : vector<1x32xf32> to vector<128x32xf32>
    %322 = arith.addf %319, %321 : vector<128x32xf32>
    %323 = arith.truncf %322 : vector<128x32xf32> to vector<128x32xbf16>
    %c0_92 = arith.constant 0 : index
    %c0_93 = arith.constant 0 : index
    %324 = vector.load %arg4[%c0_92, %c0_93] : memref<32x32xbf16, #tpu.memory_space<vmem>>, vector<32x32xbf16>
    %cst_94 = arith.constant dense<0.000000e+00> : vector<128x32xf32>
    %325 = tpu.matmul %323, %324, %cst_94 {dimension_numbers = #tpu.dot_dimension_numbers<[1], [0], [0], [1], [0, 0, 1, 1], [], []>} : vector<128x32xbf16>, vector<32x32xbf16>, vector<128x32xf32> -> vector<128x32xf32>
    %c0_95 = arith.constant 0 : index
    %c0_96 = arith.constant 0 : index
    %326 = vector.load %arg5[%c0_95, %c0_96] : memref<1x32xf32, #tpu.memory_space<vmem>>, vector<1x32xf32>
    %327 = vector.broadcast %326 : vector<1x32xf32> to vector<128x32xf32>
    %328 = arith.addf %325, %327 : vector<128x32xf32>
    %c0_97 = arith.constant 0 : index
    %c0_98 = arith.constant 0 : index
    %329 = vector.load %arg11[%c0_97, %c0_98] : memref<128x32xf32, #tpu.memory_space<vmem>>, vector<128x32xf32>
    tpu.vector_store %arg11[%c0_97, %c0_98], %328 {strides = array<i32>} : memref<128x32xf32, #tpu.memory_space<vmem>>, vector<128x32xf32>,
    return
  }
  func.func @transform_0(%arg0: i32) -> (i32, i32) {
    %c0_i32 = arith.constant 0 : i32
    %c0_i32_0 = arith.constant 0 : i32
    return %arg0, %c0_i32 : i32, i32
  }
  func.func @transform_1(%arg0: i32) -> (i32, i32) {
    %c0_i32 = arith.constant 0 : i32
    %c0_i32_0 = arith.constant 0 : i32
    %c0_i32_1 = arith.constant 0 : i32
    return %c0_i32, %c0_i32_0 : i32, i32
  }
  func.func @transform_2(%arg0: i32) -> (i32, i32) {
    %c0_i32 = arith.constant 0 : i32
    %c0_i32_0 = arith.constant 0 : i32
    %c0_i32_1 = arith.constant 0 : i32
    return %c0_i32, %c0_i32_0 : i32, i32
  }
  func.func @transform_3(%arg0: i32) -> (i32, i32) {
    %c0_i32 = arith.constant 0 : i32
    %c0_i32_0 = arith.constant 0 : i32
    %c0_i32_1 = arith.constant 0 : i32
    return %c0_i32, %c0_i32_0 : i32, i32
  }
  func.func @transform_4(%arg0: i32) -> (i32, i32) {
    %c0_i32 = arith.constant 0 : i32
    %c0_i32_0 = arith.constant 0 : i32
    %c0_i32_1 = arith.constant 0 : i32
    return %c0_i32, %c0_i32_0 : i32, i32
  }
  func.func @transform_5(%arg0: i32) -> (i32, i32) {
    %c0_i32 = arith.constant 0 : i32
    %c0_i32_0 = arith.constant 0 : i32
    %c0_i32_1 = arith.constant 0 : i32
    return %c0_i32, %c0_i32_0 : i32, i32
  }
  func.func @transform_6(%arg0: i32) -> (i32, i32) {
    %c0_i32 = arith.constant 0 : i32
    %c0_i32_0 = arith.constant 0 : i32
    %c0_i32_1 = arith.constant 0 : i32
    return %c0_i32, %c0_i32_0 : i32, i32
  }
  func.func @transform_7(%arg0: i32) -> (i32, i32) {
    %c0_i32 = arith.constant 0 : i32
    %c0_i32_0 = arith.constant 0 : i32
    %c0_i32_1 = arith.constant 0 : i32
    return %c0_i32, %c0_i32_0 : i32, i32
  }
  func.func @transform_8(%arg0: i32) -> (i32, i32) {
    %c0_i32 = arith.constant 0 : i32
    %c0_i32_0 = arith.constant 0 : i32
    %c0_i32_1 = arith.constant 0 : i32
    return %c0_i32, %c0_i32_0 : i32, i32
  }
  func.func @transform_9(%arg0: i32) -> (i32, i32) {
    %c0_i32 = arith.constant 0 : i32
    %c0_i32_0 = arith.constant 0 : i32
    %c0_i32_1 = arith.constant 0 : i32
    return %c0_i32, %c0_i32_0 : i32, i32
  }
  func.func @transform_10(%arg0: i32) -> (i32, i32) {
    %c0_i32 = arith.constant 0 : i32
    %c0_i32_0 = arith.constant 0 : i32
    return %arg0, %c0_i32 : i32, i32
  }
}

</mosaic_0001>

<bundles_post_ra>
// kernel: tpu_custom_call.1
= control target key start
LH: loop header
LB: loop body
LE: loop exit
PB: predicated region body
PF: predicated region fallthrough
CT: control target
= control target key end

     0   :  { %vm115_vm0 = vcmask 261120   ;;  %s4469_s24 = smov 32   ;;  %s4471_s18 = smov 64   ;;  %s7411_s1 = inlined_call_operand.vmem [shape: bf16[32,96], index: 1, kind: input, shape index: {}]   ;;  %s7412_s0 = inlined_call_operand.vmem [shape: bf16[128,32], index: 0, kind: input, shape index: {}]   ;;  %s7413_s6 = inlined_call_operand.vmem [shape: f32[1,32], index: 6, kind: input, shape index: {}]   ;;  %s7414_s2 = inlined_call_operand.vmem [shape: f32[1,96], index: 2, kind: input, shape index: {}]   ;;  %s7415_s5 = inlined_call_operand.vmem [shape: f32[1,32], index: 5, kind: input, shape index: {}]   ;;  %s7416_s7 = inlined_call_operand.vmem [shape: bf16[32,32], index: 7, kind: input, shape index: {}]   ;;  %s7417_s8 = inlined_call_operand.vmem [shape: f32[25,32], index: 8, kind: input, shape index: {}]   ;;  %s7418_s3 = inlined_call_operand.vmem [shape: bf16[32,32], index: 3, kind: input, shape index: {}]   ;;  %s7419_s9 = inlined_call_operand.vmem [shape: f32[1,32], index: 9, kind: input, shape index: {}]   ;;  %s7420_s4 = inlined_call_operand.vmem [shape: f32[1,32], index: 4, kind: input, shape index: {}]   ;;  %s7421_s10 = inlined_call_operand.vmem [shape: f32[128,32], index: 10, kind: output, shape index: {}]  }
   0x1   :  { %v4156_v0 = vld [vmem:[%s7411_s1 + $0x8] sm:$0xff]   ;;  %v4157_v1 = vld [vmem:[%s7411_s1] sm:$0xff]   ;;  %v4160_v4 = vld [vmem:[%s7412_s0 + $0x10] sm:$0xff]  }
   0x2   :  { %4043 = vmatprep.subr.bf16.mxu0 %v4156_v0  ;;  %v4158_v2 = vld [vmem:[%s7412_s0] sm:$0xff]   ;;  %v4159_v3 = vld [vmem:[%s7412_s0 + $0x8] sm:$0xff]   ;;  %v4161_v6 = vld [vmem:[%s7412_s0 + $0x18] sm:$0xff]  }
   0x3   :  { %4044 = vmatpush3.bf16.msra.mxu0 %v4156_v0  ;;  %4047 = vmatprep.mubr.msk.bf16.mxu0 %vm115_vm0, %v4158_v2  ;;  %v4548_v5 = vld [vmem:[%s7413_s6] ss:$0 sm:$0xff]  ;;  %v4163_v8 = vld [vmem:[%s7412_s0 + $0x28] sm:$0xff]   ;;  %v4164_v9 = vld [vmem:[%s7412_s0 + $0x30] sm:$0xff]  }
   0x4   :  { %4045 = vmatprep.subr.bf16.mxu0 %v4157_v1  ;;  %293 = vrot.lane.b32.xlu0 %v4548_v5, %s4469_s24  ;;  %v4162_v7 = vld [vmem:[%s7412_s0 + $0x20] sm:$0xff]   ;;  %v4165_v10 = vld [vmem:[%s7412_s0 + $0x38] sm:$0xff]   ;;  %s4470_s0 = smov 96  }
   0x5   :  { %v4575_v11 = vld [vmem:[%s7414_s2] ss:$0 sm:$0xff] }
   0x7   :  { %4046 = vmatpush3.bf16.msra.mxu0 %v4157_v1 }
   0xa   :  { %4048 = vmatmul.mubr.msk.bf16.vlgmr.msra.gmra.mxu0 %vm115_vm0, %v4159_v3 }
   0xb   :  { %4051 = vmatprep.mubr.msk.bf16.mxu0 %vm115_vm0, %v4160_v4 }
  0x12   :  { %4052 = vmatmul.mubr.msk.bf16.gmra.mxu0 %vm115_vm0, %v4161_v6 }
  0x13   :  { %4055 = vmatprep.mubr.msk.bf16.mxu0 %vm115_vm0, %v4162_v7 }
  0x1a   :  { %4056 = vmatmul.mubr.msk.bf16.gmra.mxu0 %vm115_vm0, %v4163_v8 }
  0x1b   :  { %4059 = vmatprep.mubr.msk.bf16.mxu0 %vm115_vm0, %v4164_v9 }
  0x22   :  { %4060 = vmatmul.mubr.msk.bf16.gmra.mxu0 %vm115_vm0, %v4165_v10 }
  0x76   :  { %v4588_v20 = vpop.permute.xlu0 %293 }
  0xca   :  { %v4049_v12 = vpop.f32.mrf.mxu0 }
  0xcb   :  { %v4578_v13 = vadd.f32 %v4049_v12, %v4575_v11 }
  0xcc   :  { %v174_v14 = vpop.f32.mrf.mxu0 }
  0xcd   :  { %7654 = vst [vmem:[#allocation3_spill] sm:$0xff] %v4578_v13  ;;  %v241_v15 = vmax.f32 %v4578_v13, 0.0  ;;  %v4582_v16 = vadd.f32 %v4575_v11, %v174_v14 }
  0xce   :  { %v4050_v17 = vpop.f32.mrf.mxu0 }
  0xcf   :  { %7655 = vst [vmem:[#allocation4_spill] sm:$0xff] %v4582_v16  ;;  %v239_v18 = vmax.f32 %v4582_v16, 0.0  ;;  %v4586_v19 = vadd.f32 %v4050_v17, %v4575_v11  ;;  %v4590_v21 = vadd.f32 1e-06, %v241_v15 }
  0xd0   :  { %v177_v22 = vpop.f32.mrf.mxu0 }
  0xd1   :  { %7656 = vst [vmem:[#allocation5_spill] sm:$0xff] %v4586_v19  ;;  %7657 = vst [vmem:[#allocation6_spill] sm:$0xff] %v4590_v21  ;;  %v4592_v23 = vadd.f32 1e-06, %v239_v18  ;;  %v242_v24 = vmax.f32 %v4586_v19, 0.0  ;;  %v4596_v25 = vadd.f32 %v4575_v11, %v177_v22  ;;  %v298_v27 = vmul.f32 %v4588_v20, %v4590_v21 }
  0xd2   :  { %v4053_v26 = vpop.f32.mrf.mxu0 }
  0xd3   :  { %7658 = vst [vmem:[#allocation7_spill] sm:$0xff] %v4596_v25  ;;  %v4600_v28 = vadd.f32 1e-06, %v242_v24  ;;  %v240_v29 = vmax.f32 %v4596_v25, 0.0  ;;  %v4604_v30 = vadd.f32 %v4053_v26, %v4575_v11  ;;  %v378_v32 = vmul.f32 %v298_v27, %v298_v27 }
  0xd4   :  { %v190_v31 = vpop.f32.mrf.mxu0  ;;  %4170 = vlog2.f32 %v298_v27  ;;  %v296_v33 = vmul.f32 %v4588_v20, %v4592_v23 }
  0xd5   :  { %7659 = vst [vmem:[#allocation8_spill] sm:$0xff] %v4604_v30  ;;  %v4608_v34 = vadd.f32 1e-06, %v240_v29  ;;  %v245_v35 = vmax.f32 %v4604_v30, 0.0  ;;  %v4612_v36 = vadd.f32 %v4575_v11, %v190_v31  ;;  %412 = vrot.lane.b32.xlu1 %v378_v32, %s4470_s0  ;;  %v299_v38 = vmul.f32 %v4588_v20, %v4600_v28 }
  0xd6   :  { %v4054_v37 = vpop.f32.mrf.mxu0  ;;  %v376_v44 = vmul.f32 %v296_v33, %v296_v33  ;;  %4172 = vlog2.f32 %v296_v33 }
  0xd7   :  { %7660 = vst [vmem:[#allocation9_spill] sm:$0xff] %v4612_v36  ;;  %v4617_v39 = vadd.f32 1e-06, %v245_v35  ;;  %v243_v40 = vmax.f32 %v4612_v36, 0.0  ;;  %v4621_v41 = vadd.f32 %v4054_v37, %v4575_v11  ;;  %v379_v43 = vmul.f32 %v299_v38, %v299_v38 }
  0xd8   :  { %v193_v42 = vpop.f32.mrf.mxu0  ;;  %v297_v45 = vmul.f32 %v4588_v20, %v4608_v34  ;;  %4174 = vlog2.f32 %v299_v38 }
  0xd9   :  { %7661 = vst [vmem:[#allocation10_spill] sm:$0xff] %v4617_v39  ;;  %7662 = vst [vmem:[#allocation11_spill] sm:$0xff] %v4621_v41  ;;  %v4625_v46 = vadd.f32 1e-06, %v243_v40  ;;  %v246_v47 = vmax.f32 %v4621_v41, 0.0  ;;  %v4629_v48 = vadd.f32 %v4575_v11, %v193_v42  ;;  %414 = vrot.lane.b32.xlu0 %v379_v43, %s4470_s0  ;;  %408 = vrot.lane.b32.xlu1 %v376_v44, %s4470_s0 }
  0xda   :  { %v4057_v49 = vpop.f32.mrf.mxu0  ;;  %v302_v50 = vmul.f32 %v4588_v20, %v4617_v39  ;;  %v377_v55 = vmul.f32 %v297_v45, %v297_v45  ;;  %4176 = vlog2.f32 %v297_v45 }
  0xdb   :  { %7663 = vst [vmem:[#allocation12_spill] sm:$0xff] %v4625_v46  ;;  %7664 = vst [vmem:[#allocation13_spill] sm:$0xff] %v4629_v48  ;;  %v4635_v51 = vadd.f32 1e-06, %v246_v47  ;;  %v244_v52 = vmax.f32 %v4629_v48, 0.0  ;;  %v4639_v53 = vadd.f32 %v4057_v49, %v4575_v11  ;;  %v300_v57 = vmul.f32 %v4588_v20, %v4625_v46 }
  0xdc   :  { %v206_v54 = vpop.f32.mrf.mxu0  ;;  %v382_v56 = vmul.f32 %v302_v50, %v302_v50  ;;  %4178 = vlog2.f32 %v302_v50 }
  0xdd   :  { %7665 = vst [vmem:[#allocation14_spill] sm:$0xff] %v4639_v53  ;;  %v4643_v58 = vadd.f32 1e-06, %v244_v52  ;;  %v249_v59 = vmax.f32 %v4639_v53, 0.0  ;;  %v4647_v60 = vadd.f32 %v4575_v11, %v206_v54  ;;  %410 = vrot.lane.b32.xlu0 %v377_v55, %s4470_s0  ;;  %v303_v62 = vmul.f32 %v4588_v20, %v4635_v51 }
  0xde   :  { %420 = vrot.lane.b32.xlu1 %v382_v56, %s4470_s0  ;;  %v4058_v61 = vpop.f32.mrf.mxu0  ;;  %v380_v4 = vmul.f32 %v300_v57, %v300_v57  ;;  %4180 = vlog2.f32 %v300_v57 }
  0xdf   :  { %7666 = vst [vmem:[#allocation15_spill] sm:$0xff] %v4647_v60  ;;  %v247_v63 = vmax.f32 %v4647_v60, 0.0  ;;  %v4655_v0 = vadd.f32 %v4058_v61, %v4575_v11  ;;  %v4657_v1 = vadd.f32 1e-06, %v249_v59  ;;  %v383_v3 = vmul.f32 %v303_v62, %v303_v62 }
  0xe0   :  { %v209_v2 = vpop.f32.mrf.mxu0  ;;  %v301_v6 = vmul.f32 %v4588_v20, %v4643_v58  ;;  %4182 = vlog2.f32 %v303_v62 }
  0xe1   :  { %7667 = vst [vmem:[#allocation16_spill] sm:$0xff] %v4655_v0  ;;  %7668 = vst [vmem:[#allocation17_spill] sm:$0xff] %v4657_v1  ;;  %v4171_v7 = vpop.eup %4170  ;;  %422 = vrot.lane.b32.xlu0 %v383_v3, %s4470_s0  ;;  %v4663_v8 = vadd.f32 1e-06, %v247_v63  ;;  %v250_v9 = vmax.f32 %v4655_v0, 0.0  ;;  %v4667_v10 = vadd.f32 %v4575_v11, %v209_v2  ;;  %v306_v17 = vmul.f32 %v4588_v20, %v4657_v1 }
  0xe2   :  { %416 = vrot.lane.b32.xlu1 %v380_v4, %s4470_s0  ;;  %v4061_v12 = vpop.f32.mrf.mxu0  ;;  %v381_v14 = vmul.f32 %v301_v6, %v301_v6  ;;  %v595_v15 = vmul.f32 0.6931472, %v4171_v7  ;;  %4184 = vlog2.f32 %v301_v6 }
  0xe3   :  { %7669 = vst [vmem:[#allocation18_spill] sm:$0xff] %v4663_v8  ;;  %7670 = vst [vmem:[#allocation19_spill] sm:$0xff] %v4667_v10  ;;  %v4173_v18 = vpop.eup %4172  ;;  %v4673_v22 = vadd.f32 1e-06, %v250_v9  ;;  %v248_v24 = vmax.f32 %v4667_v10, 0.0  ;;  %v386_v29 = vmul.f32 %v306_v17, %v306_v17  ;;  %v304_v31 = vmul.f32 %v4588_v20, %v4663_v8 }
  0xe4   :  { %v222_v26 = vpop.f32.mrf.mxu0  ;;  %v591_v27 = vmul.f32 0.6931472, %v4173_v18  ;;  %v4681_v33 = vadd.f32 %v4061_v12, %v4575_v11  ;;  %4186 = vlog2.f32 %v306_v17 }
  0xe5   :  { %418 = vrot.lane.b32.xlu0 %v381_v14, %s4470_s0  ;;  %v4175_v32 = vpop.eup %4174  ;;  %v4683_v37 = vadd.f32 1e-06, %v248_v24  ;;  %v384_v42 = vmul.f32 %v304_v31, %v304_v31  ;;  %v307_v43 = vmul.f32 %v4588_v20, %v4673_v22  ;;  %v4691_v45 = vadd.f32 %v4575_v11, %v222_v26 }
  0xe6   :  { %642 = vrot.lane.b32.xlu1 %v595_v15, %s4470_s0  ;;  %7671 = vst [vmem:[#allocation20_spill] sm:$0xff] %v4681_v33  ;;  %v4062_v38 = vpop.f32.mrf.mxu0  ;;  %v597_v40 = vmul.f32 0.6931472, %v4175_v32  ;;  %v253_v44 = vmax.f32 %v4681_v33, 0.0  ;;  %4188 = vlog2.f32 %v304_v31 }
  0xe7   :  { %v4177_v35 = vpop.eup %4176  ;;  %7672 = vst [vmem:[#allocation21_spill] sm:$0xff] %v4691_v45  ;;  %v4694_v47 = vadd.f32 %v4062_v38, %v4575_v11  ;;  %v387_v50 = vmul.f32 %v307_v43, %v307_v43  ;;  %v305_v54 = vmul.f32 %v4588_v20, %v4683_v37  ;;  %v251_v59 = vmax.f32 %v4691_v45, 0.0 }
  0xe8   :  { %v593_v52 = vmul.f32 0.6931472, %v4177_v35  ;;  %v225_v55 = vpop.f32.mrf.mxu0  ;;  %v4700_v57 = vadd.f32 1e-06, %v253_v44  ;;  %4190 = vlog2.f32 %v307_v43 }
  0xe9   :  { %638 = vrot.lane.b32.xlu0 %v591_v27, %s4470_s0  ;;  %7673 = vst [vmem:[#allocation22_spill] sm:$0xff] %v4694_v47  ;;  %v4179_v49 = vpop.eup %4178  ;;  %v254_v61 = vmax.f32 %v4694_v47, 0.0  ;;  %v4705_v63 = vadd.f32 %v4575_v11, %v225_v55  ;;  %v385_v2 = vmul.f32 %v305_v54, %v305_v54  ;;  %v4709_v4 = vadd.f32 1e-06, %v251_v59 }
  0xea   :  { %428 = vrot.lane.b32.xlu1 %v386_v29, %s4470_s0  ;;  %7674 = vst [vmem:[#allocation23_spill] sm:$0xff] %v4700_v57  ;;  %v603_v3 = vmul.f32 0.6931472, %v4179_v49  ;;  %v310_v7 = vmul.f32 %v4588_v20, %v4700_v57  ;;  %4192 = vlog2.f32 %v305_v54 }
  0xeb   :  { %v4181_v56 = vpop.eup %4180  ;;  %7675 = vst [vmem:[#allocation24_spill] sm:$0xff] %v4705_v63  ;;  %7676 = vst [vmem:[#allocation25_spill] sm:$0xff] %v4709_v4  ;;  %v4711_v6 = vadd.f32 1e-06, %v254_v61  ;;  %v252_v12 = vmax.f32 %v4705_v63, 0.0  ;;  %v308_v17 = vmul.f32 %v4588_v20, %v4709_v4 }
  0xec   :  { %v599_v14 = vmul.f32 0.6931472, %v4181_v56  ;;  %v390_v15 = vmul.f32 %v310_v7, %v310_v7  ;;  %4194 = vlog2.f32 %v310_v7 }
  0xed   :  { %644 = vrot.lane.b32.xlu0 %v597_v40, %s4470_s0  ;;  %v4183_v62 = vpop.eup %4182  ;;  %v4720_v18 = vadd.f32 1e-06, %v252_v12  ;;  %v311_v26 = vmul.f32 %v4588_v20, %v4711_v6  ;;  %4196 = vlog2.f32 %v308_v17  ;;  %v388_v29 = vmul.f32 %v308_v17, %v308_v17 }
  0xee   :  { %424 = vrot.lane.b32.xlu1 %v384_v42, %s4470_s0  ;;  %v605_v11 = vmul.f32 0.6931472, %v4183_v62 }
  0xef   :  { %v4185_v9 = vpop.eup %4184  ;;  %v391_v27 = vmul.f32 %v311_v26, %v311_v26  ;;  %v309_v31 = vmul.f32 %v4588_v20, %v4720_v18  ;;  %4198 = vlog2.f32 %v311_v26 }
  0xf0   :  { %v601_v24 = vmul.f32 0.6931472, %v4185_v9 }
  0xf1   :  { %430 = vrot.lane.b32.xlu0 %v387_v50, %s4470_s0  ;;  %v4187_v32 = vpop.eup %4186  ;;  %v389_v38 = vmul.f32 %v309_v31, %v309_v31  ;;  %4200 = vlog2.f32 %v309_v31 }
  0xf2   :  { %640 = vrot.lane.b32.xlu1 %v593_v52, %s4470_s0  ;;  %v611_v40 = vmul.f32 0.6931472, %v4187_v32 }
  0xf3   :  { %v4189_v35 = vpop.eup %4188 }
  0xf4   :  { %v607_v49 = vmul.f32 0.6931472, %v4189_v35 }
  0xf5   :  { %426 = vrot.lane.b32.xlu0 %v385_v2, %s4470_s0  ;;  %v4191_v42 = vpop.eup %4190 }
  0xf6   :  { %650 = vrot.lane.b32.xlu1 %v603_v3, %s4470_s0  ;;  %v613_v44 = vmul.f32 0.6931472, %v4191_v42 }
  0xf7   :  { %v4193_v43 = vpop.eup %4192 }
  0xf8   :  { %v609_v52 = vmul.f32 0.6931472, %v4193_v43 }
  0xf9   :  { %652 = vrot.lane.b32.xlu0 %v605_v11, %s4470_s0  ;;  %v4195_v50 = vpop.eup %4194 }
  0xfa   :  { %646 = vrot.lane.b32.xlu1 %v599_v14, %s4470_s0  ;;  %v4197_v20 = vpop.eup %4196  ;;  %v619_v54 = vmul.f32 0.6931472, %v4195_v50 }
  0xfb   :  { %v615_v59 = vmul.f32 0.6931472, %v4197_v20 }
  0xfc   :  { %v4199_v55 = vpop.eup %4198 }
  0xfd   :  { %648 = vrot.lane.b32.xlu0 %v601_v24, %s4470_s0  ;;  %v621_v56 = vmul.f32 0.6931472, %v4199_v55 }
  0xfe   :  { %436 = vrot.lane.b32.xlu1 %v390_v15, %s4470_s0  ;;  %v4201_v61 = vpop.eup %4200 }
  0xff   :  { %v617_v62 = vmul.f32 0.6931472, %v4201_v61 }
 0x101   :  { %438 = vrot.lane.b32.xlu0 %v391_v27, %s4470_s0 }
 0x102   :  { %432 = vrot.lane.b32.xlu1 %v388_v29, %s4470_s0 }
 0x105   :  { %434 = vrot.lane.b32.xlu0 %v389_v38, %s4470_s0 }
 0x106   :  { %658 = vrot.lane.b32.xlu1 %v611_v40, %s4470_s0  ;;  %v4750_v40 = vld [vmem:[%s7415_s5] ss:$0 sm:$0xff] }
 0x109   :  { %660 = vrot.lane.b32.xlu0 %v613_v44, %s4470_s0 }
 0x10a   :  { %654 = vrot.lane.b32.xlu1 %v607_v49, %s4470_s0 }
 0x10d   :  { %656 = vrot.lane.b32.xlu0 %v609_v52, %s4470_s0 }
 0x10e   :  { %666 = vrot.lane.b32.xlu1 %v619_v54, %s4470_s0 }
 0x111   :  { %668 = vrot.lane.b32.xlu0 %v621_v56, %s4470_s0 }
 0x112   :  { %662 = vrot.lane.b32.xlu1 %v615_v59, %s4470_s0 }
 0x115   :  { %664 = vrot.lane.b32.xlu0 %v617_v62, %s4470_s0 }
 0x147   :  { %v413_v2 = vpop.permute.xlu1 %412 }
 0x148   :  { %v462_v3 = vsel %vm115_vm0, %v413_v2, 0.0 }
 0x149   :  { %463 = vadd.xlane.f32.xlu0 %v462_v3 }
 0x14b   :  { %v415_v7 = vpop.permute.xlu0 %414  ;;  %v409_v9 = vpop.permute.xlu1 %408 }
 0x14c   :  { %v456_v12 = vsel %vm115_vm0, %v409_v9, 0.0  ;;  %v465_v17 = vsel %vm115_vm0, %v415_v7, 0.0 }
 0x14d   :  { %457 = vadd.xlane.f32.xlu1 %v456_v12 }
 0x14f   :  { %v411_v11 = vpop.permute.xlu0 %410 }
 0x150   :  { %v421_v14 = vpop.permute.xlu1 %420  ;;  %v459_v15 = vsel %vm115_vm0, %v411_v11, 0.0 }
 0x151   :  { %460 = vadd.xlane.f32.xlu0 %v459_v15  ;;  %466 = vadd.xlane.f32.xlu1 %v465_v17  ;;  %v474_v29 = vsel %vm115_vm0, %v421_v14, 0.0 }
 0x153   :  { %v423_v24 = vpop.permute.xlu0 %422 }
 0x154   :  { %v417_v26 = vpop.permute.xlu1 %416  ;;  %v477_v27 = vsel %vm115_vm0, %v423_v24, 0.0 }
 0x155   :  { %478 = vadd.xlane.f32.xlu1 %v477_v27  ;;  %475 = vadd.xlane.f32.xlu0 %v474_v29  ;;  %v468_v38 = vsel %vm115_vm0, %v417_v26, 0.0 }
 0x157   :  { %v419_v31 = vpop.permute.xlu0 %418 }
 0x158   :  { %v643_v32 = vpop.permute.xlu1 %642  ;;  %v471_v35 = vsel %vm115_vm0, %v419_v31, 0.0 }
 0x159   :  { %472 = vadd.xlane.f32.xlu1 %v471_v35  ;;  %469 = vadd.xlane.f32.xlu0 %v468_v38  ;;  %v688_v42 = vmul.f32 %v4750_v40, %v643_v32 }
 0x15b   :  { %v639_v43 = vpop.permute.xlu0 %638  ;;  %v706_v50 = vmul.f32 1.442695, %v688_v42 }
 0x15c   :  { %v429_v44 = vpop.permute.xlu1 %428  ;;  %v686_v20 = vmul.f32 %v4750_v40, %v639_v43 }
 0x15d   :  { %v486_v49 = vsel %vm115_vm0, %v429_v44, 0.0  ;;  %4202 = vpow2.f32 %v706_v50 }
 0x15e   :  { %487 = vadd.xlane.f32.xlu0 %v486_v49  ;;  %v702_v59 = vmul.f32 1.442695, %v686_v20 }
 0x15f   :  { %v645_v52 = vpop.permute.xlu0 %644 }
 0x160   :  { %v425_v54 = vpop.permute.xlu1 %424  ;;  %v689_v55 = vmul.f32 %v4750_v40, %v645_v52  ;;  %4204 = vpow2.f32 %v702_v59 }
 0x161   :  { %v480_v56 = vsel %vm115_vm0, %v425_v54, 0.0 }
 0x162   :  { %481 = vadd.xlane.f32.xlu0 %v480_v56  ;;  %v708_v2 = vmul.f32 1.442695, %v689_v55 }
 0x163   :  { %v431_v61 = vpop.permute.xlu0 %430 }
 0x164   :  { %v641_v62 = vpop.permute.xlu1 %640  ;;  %v489_v7 = vsel %vm115_vm0, %v431_v61, 0.0  ;;  %4206 = vpow2.f32 %v708_v2 }
 0x165   :  { %v687_v3 = vmul.f32 %v4750_v40, %v641_v62  ;;  %490 = vadd.xlane.f32.xlu1 %v489_v7 }
 0x167   :  { %v704_v9 = vmul.f32 1.442695, %v687_v3  ;;  %v427_v12 = vpop.permute.xlu0 %426 }
 0x168   :  { %v651_v11 = vpop.permute.xlu1 %650  ;;  %v483_v15 = vsel %vm115_vm0, %v427_v12, 0.0 }
 0x169   :  { %v692_v14 = vmul.f32 %v4750_v40, %v651_v11  ;;  %484 = vadd.xlane.f32.xlu1 %v483_v15  ;;  %4208 = vpow2.f32 %v704_v9 }
 0x16a   :  { %v4765_v42 = vpop.eup %4202 }
 0x16b   :  { %v714_v17 = vmul.f32 1.442695, %v692_v14  ;;  %v653_v24 = vpop.permute.xlu0 %652  ;;  %v800_v50 = vmul.f32 %v4765_v42, %v4765_v42 }
 0x16c   :  { %v647_v26 = vpop.permute.xlu1 %646  ;;  %v693_v27 = vmul.f32 %v4750_v40, %v653_v24 }
 0x16d   :  { %4210 = vpow2.f32 %v714_v17  ;;  %v690_v29 = vmul.f32 %v4750_v40, %v647_v26  ;;  %v4770_v20 = vpop.eup %4204  ;;  %v820_v61 = vsel %vm115_vm0, %v800_v50, 0.0 }
 0x16e   :  { %v716_v32 = vmul.f32 1.442695, %v693_v27  ;;  %v798_v62 = vmul.f32 %v4770_v20, %v4770_v20 }
 0x16f   :  { %v710_v31 = vmul.f32 1.442695, %v690_v29  ;;  %v649_v35 = vpop.permute.xlu0 %648 }
 0x170   :  { %v4763_v38 = vpop.permute.xlu1 %436  ;;  %v691_v43 = vmul.f32 %v4750_v40, %v649_v35  ;;  %v814_v17 = vsel %vm115_vm0, %v798_v62, 0.0 }
 0x171   :  { %4212 = vpow2.f32 %v710_v31  ;;  %v4773_v55 = vpop.eup %4206 }
 0x172   :  { %4214 = vpow2.f32 %v716_v32  ;;  %v712_v52 = vmul.f32 1.442695, %v691_v43  ;;  %v801_v9 = vmul.f32 %v4773_v55, %v4773_v55 }
 0x173   :  { %v439_v44 = vpop.permute.xlu0 %438 }
 0x174   :  { %v433_v49 = vpop.permute.xlu1 %432  ;;  %4216 = vpow2.f32 %v712_v52  ;;  %v823_v31 = vsel %vm115_vm0, %v801_v9, 0.0  ;;  %v501_v9 = vsel %vm115_vm0, %v439_v44, 0.0  ;;  %v498_v44 = vsel %vm115_vm0, %v4763_v38, 0.0 }
 0x175   :  { %v492_v54 = vsel %vm115_vm0, %v433_v49, 0.0 }
 0x176   :  { %493 = vadd.xlane.f32.xlu0 %v492_v54  ;;  %v4778_v2 = vpop.eup %4208 }
 0x177   :  { %v435_v56 = vpop.permute.xlu0 %434  ;;  %v799_v24 = vmul.f32 %v4778_v2, %v4778_v2 }
 0x178   :  { %v659_v59 = vpop.permute.xlu1 %658  ;;  %v495_v7 = vsel %vm115_vm0, %v435_v56, 0.0 }
 0x179   :  { %v696_v3 = vmul.f32 %v4750_v40, %v659_v59  ;;  %496 = vadd.xlane.f32.xlu1 %v495_v7  ;;  %v817_v52 = vsel %vm115_vm0, %v799_v24, 0.0 }
 0x17a   :  { %v4784_v12 = vpop.eup %4210  ;;  %821 = vadd.xlane.f32.xlu0 %v820_v61 }
 0x17b   :  { %v722_v11 = vmul.f32 1.442695, %v696_v3  ;;  %v661_v14 = vpop.permute.xlu0 %660  ;;  %v804_v26 = vmul.f32 %v4784_v12, %v4784_v12 }
 0x17c   :  { %v655_v15 = vpop.permute.xlu1 %654  ;;  %v697_v27 = vmul.f32 %v4750_v40, %v661_v14 }
 0x17d   :  { %4218 = vpow2.f32 %v722_v11  ;;  %v694_v29 = vmul.f32 %v4750_v40, %v655_v15  ;;  %824 = vadd.xlane.f32.xlu1 %v823_v31  ;;  %v832_v54 = vsel %vm115_vm0, %v804_v26, 0.0 }
 0x17e   :  { %815 = vadd.xlane.f32.xlu0 %v814_v17  ;;  %v4794_v32 = vpop.eup %4212  ;;  %v724_v35 = vmul.f32 1.442695, %v697_v27 }
 0x17f   :  { %v718_v43 = vmul.f32 1.442695, %v694_v29  ;;  %v657_v49 = vpop.permute.xlu0 %656  ;;  %v4798_v56 = vpop.eup %4214  ;;  %v802_v62 = vmul.f32 %v4794_v32, %v4794_v32 }
 0x180   :  { %v667_v50 = vpop.permute.xlu1 %666  ;;  %4220 = vpow2.f32 %v724_v35  ;;  %v695_v59 = vmul.f32 %v4750_v40, %v657_v49  ;;  %v805_v11 = vmul.f32 %v4798_v56, %v4798_v56 }
 0x181   :  { %v700_v61 = vmul.f32 %v4750_v40, %v667_v50  ;;  %4222 = vpow2.f32 %v718_v43  ;;  %818 = vadd.xlane.f32.xlu1 %v817_v52  ;;  %v826_v17 = vsel %vm115_vm0, %v802_v62, 0.0  ;;  %v4809_v24 = vpop.eup %4216 }
 0x182   :  { %833 = vadd.xlane.f32.xlu0 %v832_v54  ;;  %v720_v3 = vmul.f32 1.442695, %v695_v59  ;;  %v835_v27 = vsel %vm115_vm0, %v805_v11, 0.0  ;;  %v803_v29 = vmul.f32 %v4809_v24, %v4809_v24 }
 0x183   :  { %v730_v14 = vmul.f32 1.442695, %v700_v61 }
 0x184   :  { %v663_v7 = vpop.permute.xlu1 %662  ;;  %4224 = vpow2.f32 %v720_v3  ;;  %v829_v43 = vsel %vm115_vm0, %v803_v29, 0.0  ;;  %v1232_v29 = vmul.f32 0.125, %v4586_v19  ;;  %v4933_v19 = vmul.f32 %v4548_v5, %v4635_v51 }
 0x185   :  { %v698_v15 = vmul.f32 %v4750_v40, %v663_v7  ;;  %502 = vadd.xlane.f32.xlu1 %v501_v9  ;;  %4226 = vpow2.f32 %v730_v14 }
 0x186   :  { %827 = vadd.xlane.f32.xlu0 %v826_v17 }
 0x187   :  { %v726_v26 = vmul.f32 1.442695, %v698_v15 }
 0x189   :  { %4228 = vpow2.f32 %v726_v26  ;;  %836 = vadd.xlane.f32.xlu1 %v835_v27  ;;  %v1234_v27 = vmul.f32 0.125, %v4629_v48  ;;  %v4929_v48 = vmul.f32 %v4548_v5, %v4643_v58 }
 0x18a   :  { %v4816_v31 = vpop.eup %4218  ;;  %499 = vadd.xlane.f32.xlu0 %v498_v44  ;;  %v1233_v44 = vmul.f32 0.125, %v4612_v36 }
 0x18b   :  { %v808_v35 = vmul.f32 %v4816_v31, %v4816_v31 }
 0x18d   :  { %v844_v49 = vsel %vm115_vm0, %v808_v35, 0.0  ;;  %v4822_v50 = vpop.eup %4220  ;;  %830 = vadd.xlane.f32.xlu1 %v829_v43  ;;  %v1239_v35 = vpack.c.bf16 %v1234_v27, %v1233_v44  ;;  %v1231_v43 = vmul.f32 0.125, %v4578_v13  ;;  %v1472_v27 = vmul.f32 0.125, %v4691_v45 }
 0x18e   :  { %845 = vadd.xlane.f32.xlu0 %v844_v49  ;;  %v4824_v38 = vpop.eup %4222  ;;  %v809_v52 = vmul.f32 %v4822_v50, %v4822_v50  ;;  %v1474_v49 = vmul.f32 0.125, %v4681_v33  ;;  %v1473_v44 = vmul.f32 0.125, %v4705_v63 }
 0x18f   :  { %v806_v54 = vmul.f32 %v4824_v38, %v4824_v38 }
 0x190   :  { %v847_v59 = vsel %vm115_vm0, %v809_v52, 0.0  ;;  %v1475_v52 = vmul.f32 0.125, %v4694_v47 }
 0x191   :  { %v4831_v61 = vpop.eup %4224  ;;  %848 = vadd.xlane.f32.xlu1 %v847_v59  ;;  %v838_v62 = vsel %vm115_vm0, %v806_v54, 0.0  ;;  %v1238_v54 = vpack.c.bf16 %v1232_v29, %v1231_v43 }
 0x192   :  { %839 = vadd.xlane.f32.xlu0 %v838_v62  ;;  %v807_v3 = vmul.f32 %v4831_v61, %v4831_v61  ;;  %v4837_v9 = vpop.eup %4226  ;;  %v1479_v59 = vpack.c.bf16 %v1475_v52, %v1474_v49  ;;  %v1236_v62 = vmul.f32 0.125, %v4621_v41  ;;  %v1468_v52 = vmul.f32 0.125, %v4647_v60 }
 0x193   :  { %7677 = vst [vmem:[#allocation26_spill] sm:$0xff] %v4837_v9  ;;  %v812_v17 = vmul.f32 %v4837_v9, %v4837_v9 }
 0x194   :  { %v841_v7 = vsel %vm115_vm0, %v807_v3, 0.0  ;;  %v1235_v3 = vmul.f32 0.125, %v4604_v30 }
 0x195   :  { %842 = vadd.xlane.f32.xlu1 %v841_v7  ;;  %v856_v26 = vsel %vm115_vm0, %v812_v17, 0.0  ;;  %v669_v7 = vpop.permute.xlu0 %668  ;;  %v1229_v17 = vmul.f32 0.125, %v4582_v16 }
 0x196   :  { %v4839_v11 = vpop.eup %4228 }
 0x197   :  { %v810_v14 = vmul.f32 %v4839_v11, %v4839_v11 }
 0x199   :  { %v850_v15 = vsel %vm115_vm0, %v810_v14, 0.0  ;;  %v1230_v14 = vmul.f32 0.125, %v4596_v25  ;;  %v665_v29 = vpop.permute.xlu0 %664 }
 0x19a   :  { %851 = vadd.xlane.f32.xlu0 %v850_v15  ;;  %v1240_v15 = vpack.c.bf16 %v1236_v62, %v1235_v3  ;;  %v699_v49 = vmul.f32 %v4750_v40, %v665_v29  ;;  %v1470_v29 = vmul.f32 0.125, %v4639_v53 }
 0x19c   :  { %v728_v62 = vmul.f32 1.442695, %v699_v49 }
 0x19e   :  { %857 = vadd.xlane.f32.xlu0 %v856_v26  ;;  %v701_v26 = vmul.f32 %v4750_v40, %v669_v7 }
 0x1a0   :  { %v732_v43 = vmul.f32 1.442695, %v701_v26 }
 0x1a2   :  { %4230 = vpow2.f32 %v732_v43 }
 0x1a3   :  { %4232 = vpow2.f32 %v728_v62 }
 0x1a6   :  { %1265 = vrot.lane.b32.xlu1 %v1239_v35, %s4471_s18  ;;  %v1237_v35 = vpack.c.bf16 %v1230_v14, %v1229_v17 }
 0x1aa   :  { %1263 = vrot.lane.b32.xlu1 %v1238_v54, %s4471_s18  ;;  %v1469_v54 = vmul.f32 0.125, %v4667_v10 }
 0x1ac   :  { %v1476_v3 = vpack.c.bf16 %v1469_v54, %v1468_v52 }
 0x1ae   :  { %1506 = vrot.lane.b32.xlu1 %v1479_v59, %s4471_s18  ;;  %v1478_v59 = vpack.c.bf16 %v1473_v44, %v1472_v27 }
 0x1af   :  { %v4870_v7 = vpop.eup %4230 }
 0x1b0   :  { %7678 = vst [vmem:[#allocation27_spill] sm:$0xff] %v4870_v7  ;;  %v813_v14 = vmul.f32 %v4870_v7, %v4870_v7 }
 0x1b2   :  { %v859_v17 = vsel %vm115_vm0, %v813_v14, 0.0  ;;  %v4899_v14 = vmul.f32 %v4548_v5, %v4608_v34 }
 0x1b4   :  { %1267 = vrot.lane.b32.xlu0 %v1240_v15, %s4471_s18  ;;  %v4874_v15 = vpop.eup %4232  ;;  %4234 = vlog2.f32 %v4899_v14 }
 0x1b5   :  { %7679 = vst [vmem:[#allocation28_spill] sm:$0xff] %v4874_v15  ;;  %v811_v26 = vmul.f32 %v4874_v15, %v4874_v15 }
 0x1b7   :  { %v853_v27 = vsel %vm115_vm0, %v811_v26, 0.0 }
 0x1b8   :  { %1261 = vrot.lane.b32.xlu0 %v1237_v35, %s4471_s18  ;;  %v1471_v35 = vmul.f32 0.125, %v4655_v0 }
 0x1ba   :  { %v1477_v52 = vpack.c.bf16 %v1471_v35, %v1470_v29  ;;  %v4910_v29 = vmul.f32 %v4548_v5, %v4600_v28 }
 0x1bc   :  { %1504 = vrot.lane.b32.xlu0 %v1478_v59, %s4471_s18  ;;  %4236 = vlog2.f32 %v4910_v29 }
 0x1c0   :  { %1500 = vrot.lane.b32.xlu0 %v1476_v3, %s4471_s18 }
 0x1c1   :  { %v4235_v28 = vpop.eup %4234 }
 0x1c2   :  { %v507_v41 = vmul.f32 0.6931472, %v4235_v28 }
 0x1c9   :  { %v4237_v16 = vpop.eup %4236 }
 0x1ca   :  { %v4940_v5 = vmul.f32 0.6931472, %v4237_v16 }
 0x1d2   :  { %860 = vadd.xlane.f32.xlu1 %v859_v17  ;;  %v4880_v44 = vpop.xlane.xlu0 %463 }
 0x1d3   :  { %vm1038_vm1 = vcmp.eq.f32.partialorder %v4880_v44, inf  ;;  %vm1040_vm2 = vcmp.eq.f32.partialorder %v4880_v44, 0.0 }
 0x1d6   :  { %854 = vadd.xlane.f32.xlu1 %v853_v27  ;;  %v4884_v43 = vpop.xlane.xlu1 %457 }
 0x1d7   :  { %4238 = vrsqrt.f32 %v4884_v43  ;;  %vm1024_vm3 = vcmp.eq.f32.partialorder %v4884_v43, inf  ;;  %v1027_v30 = vand.u32 2147483648, %v4884_v43  ;;  %vm1026_vm5 = vcmp.eq.f32.partialorder %v4884_v43, 0.0 }
 0x1d8   :  { %4240 = vrsqrt.f32 %v4880_v44 }
 0x1da   :  { %v4886_v49 = vpop.xlane.xlu0 %460  ;;  %v4889_v54 = vpop.xlane.xlu1 %466 }
 0x1db   :  { %4242 = vrsqrt.f32 %v4889_v54  ;;  %vm1031_vm4 = vcmp.eq.f32.partialorder %v4886_v49, inf  ;;  %vm1045_vm6 = vcmp.eq.f32.partialorder %v4889_v54, inf  ;;  %vm1047_vm7 = vcmp.eq.f32.partialorder %v4889_v54, 0.0 }
 0x1dc   :  { %4244 = vrsqrt.f32 %v4886_v49  ;;  %v1048_v4 = vand.u32 2147483648, %v4889_v54  ;;  %vm1033_vm8 = vcmp.eq.f32.partialorder %v4886_v49, 0.0 }
 0x1de   :  { %v4891_v59 = vpop.xlane.xlu0 %475  ;;  %v4893_v62 = vpop.xlane.xlu1 %478 }
 0x1df   :  { %vm1066_vm9 = vcmp.eq.f32.partialorder %v4891_v59, inf  ;;  %vm1073_vm10 = vcmp.eq.f32.partialorder %v4893_v62, inf  ;;  %vm1068_vm13 = vcmp.eq.f32.partialorder %v4891_v59, 0.0  ;;  %vm1075_vm14 = vcmp.eq.f32.partialorder %v4893_v62, 0.0 }
 0x1e2   :  { %v4895_v3 = vpop.xlane.xlu0 %469  ;;  %v4901_v17 = vpop.xlane.xlu1 %472 }
 0x1e3   :  { %4246 = vrsqrt.f32 %v4895_v3  ;;  %vm1052_vm11 = vcmp.eq.f32.partialorder %v4895_v3, inf  ;;  %vm1054_vm12 = vcmp.eq.f32.partialorder %v4895_v3, 0.0  ;;  %vm1059_vm15 = vcmp.eq.f32.partialorder %v4901_v17, inf }
 0x1e4   :  { %4248 = vrsqrt.f32 %v4891_v59  ;;  %v4239_v28 = vpop.eup %4238 }
 0x1e5   :  { %v4241_v58 = vpop.eup %4240  ;;  %v1023_v51 = vmul.f32 %v4239_v28, %v4884_v43 }
 0x1e6   :  { %v1037_v16 = vmul.f32 %v4241_v58, %v4880_v44 }
 0x1e7   :  { %1502 = vrot.lane.b32.xlu1 %v1477_v52, %s4471_s18  ;;  %v4903_v26 = vpop.xlane.xlu0 %487  ;;  %v1025_v57 = vsel %vm1024_vm3, %v4884_v43, %v1023_v51  ;;  %v1055_v51 = vand.u32 2147483648, %v4895_v3 }
 0x1e8   :  { %v1039_v1 = vsel %vm1038_vm1, %v4880_v44, %v1037_v16  ;;  %vm1061_vm1 = vcmp.eq.f32.partialorder %v4901_v17, 0.0 }
 0x1eb   :  { %v4912_v35 = vpop.xlane.xlu0 %481 }
 0x1ec   :  { %vm1080_vm3 = vcmp.eq.f32.partialorder %v4912_v35, inf }
 0x1ee   :  { %v4906_v27 = vpop.xlane.xlu1 %490 }
 0x1f2   :  { %v4916_v34 = vpop.xlane.xlu1 %484 }
 0x1ff   :  { %v4918_v52 = vpop.xlane.xlu0 %493 }
 0x202   :  { %v4923_v63 = vpop.xlane.xlu1 %496 }
 0x203   :  { %v822_v47 = vpop.xlane.xlu0 %821 }
 0x204   :  { %4250 = vrsqrt.f32 %v822_v47  ;;  %v543_v47 = vmul.f32 %v4750_v40, %v507_v41 }
 0x206   :  { %v825_v10 = vpop.xlane.xlu1 %824  ;;  %v4947_v53 = vmul.f32 1.442695, %v543_v47  ;;  %v1034_v47 = vand.u32 2147483648, %v4886_v49 }
 0x207   :  { %v816_v0 = vpop.xlane.xlu0 %815 }
 0x208   :  { %4252 = vrsqrt.f32 %v816_v0  ;;  %v4243_v0 = vpop.eup %4242 }
 0x209   :  { %4254 = vrsqrt.f32 %v825_v10  ;;  %v4245_v60 = vpop.eup %4244  ;;  %v1044_v28 = vmul.f32 %v4243_v0, %v4889_v54 }
 0x20a   :  { %4256 = vrsqrt.f32 %v4893_v62  ;;  %v819_v45 = vpop.xlane.xlu1 %818  ;;  %v4247_v36 = vpop.eup %4246 }
 0x20b   :  { %v834_v33 = vpop.xlane.xlu0 %833  ;;  %4258 = vlog2.f32 %v4929_v48  ;;  %v4249_v13 = vpop.eup %4248  ;;  %v1046_v8 = vsel %vm1045_vm6, %v4889_v54, %v1044_v28  ;;  %v1051_v15 = vmul.f32 %v4247_v36, %v4895_v3  ;;  %vm1101_vm6 = vcmp.eq.f32.partialorder %v4906_v27, inf }
 0x20c   :  { %4260 = vlog2.f32 %v4933_v19  ;;  %v1065_v21 = vmul.f32 %v4249_v13, %v4891_v59  ;;  %v1097_v13 = vand.u32 2147483648, %v4903_v26 }
 0x20d   :  { %4262 = vrsqrt.f32 %v819_v45  ;;  %v1041_v45 = vand.u32 2147483648, %v4880_v44 }
 0x20e   :  { %4264 = vrsqrt.f32 %v4901_v17  ;;  %v4945_v41 = vpop.xlane.xlu1 %502 }
 0x20f   :  { %4266 = vrsqrt.f32 %v4903_v26  ;;  %v828_v10 = vpop.xlane.xlu0 %827 }
 0x210   :  { %4268 = vrsqrt.f32 %v828_v10  ;;  %v1030_v10 = vmul.f32 %v4245_v60, %v4886_v49 }
 0x211   :  { %4270 = vrsqrt.f32 %v4912_v35  ;;  %v4251_v25 = vpop.eup %4250 }
 0x212   :  { %4272 = vrsqrt.f32 %v4906_v27  ;;  %v837_v0 = vpop.xlane.xlu1 %836  ;;  %v1032_v36 = vsel %vm1031_vm4, %v4886_v49, %v1030_v10  ;;  %v1053_v10 = vsel %vm1052_vm11, %v4895_v3, %v1051_v15  ;;  %vm1096_vm4 = vcmp.eq.f32.partialorder %v4903_v26, 0.0 }
 0x213   :  { %4274 = vrsqrt.f32 %v4916_v34  ;;  %v4963_v58 = vpop.xlane.xlu0 %499  ;;  %vm1110_vm11 = vcmp.eq.f32.partialorder %v4918_v52, 0.0 }
 0x214   :  { %4276 = vrsqrt.f32 %v834_v33  ;;  %v1028_v33 = vsel %vm1026_vm5, %v1027_v30, %v1025_v57  ;;  %v1042_v30 = vsel %vm1040_vm2, %v1041_v45, %v1039_v1  ;;  %v1049_v57 = vsel %vm1047_vm7, %v1048_v4, %v1046_v8 }
 0x215   :  { %v4253_v60 = vpop.eup %4252  ;;  %4278 = vrsqrt.f32 %v837_v0  ;;  %v1035_v1 = vsel %vm1033_vm8, %v1034_v47, %v1032_v36  ;;  %vm1094_vm2 = vcmp.eq.f32.partialorder %v4903_v26, inf  ;;  %vm1082_vm5 = vcmp.eq.f32.partialorder %v4912_v35, 0.0 }
 0x216   :  { %v4255_v39 = vpop.eup %4254  ;;  %v831_v28 = vpop.xlane.xlu1 %830  ;;  %v1150_v0 = vmul.f32 %v4253_v60, %v1028_v33  ;;  %v1152_v60 = vmul.f32 %v4251_v25, %v1042_v30  ;;  %vm1103_vm7 = vcmp.eq.f32.partialorder %v4906_v27, 0.0  ;;  %vm1087_vm8 = vcmp.eq.f32.partialorder %v4916_v34, inf }
 0x217   :  { %v4257_v7 = vpop.eup %4256  ;;  %v846_v16 = vpop.xlane.xlu0 %845  ;;  %4280 = vrsqrt.f32 %v831_v28  ;;  %v1153_v33 = vmul.f32 %v4255_v39, %v1049_v57  ;;  %v1062_v39 = vand.u32 2147483648, %v4901_v17  ;;  %v1067_v28 = vsel %vm1066_vm9, %v4891_v59, %v1065_v21 }
 0x218   :  { %v4986_v46 = vpop.eup %4258  ;;  %v1072_v44 = vmul.f32 %v4257_v7, %v4893_v62  ;;  %4282 = vrsqrt.f32 %v4918_v52  ;;  %v1166_v15 = vmul.f32 %v4770_v20, %v1150_v0  ;;  %v1056_v7 = vsel %vm1054_vm12, %v1055_v51, %v1053_v10 }
 0x219   :  { %v4994_v43 = vpop.eup %4260  ;;  %4284 = vrsqrt.f32 %v846_v16  ;;  %v1169_v20 = vmul.f32 %v4773_v55, %v1153_v33  ;;  %v1083_v21 = vand.u32 2147483648, %v4912_v35  ;;  %vm1089_vm9 = vcmp.eq.f32.partialorder %v4916_v34, 0.0 }
 0x21a   :  { %v4263_v9 = vpop.eup %4262  ;;  %v849_v4 = vpop.xlane.xlu1 %848  ;;  %v1074_v3 = vsel %vm1073_vm10, %v4893_v62, %v1072_v44  ;;  %v1217_v30 = vmul.f32 0.125, %v1166_v15  ;;  %vm1108_vm10 = vcmp.eq.f32.partialorder %v4918_v52, inf  ;;  %vm1122_vm12 = vcmp.eq.f32.partialorder %v4963_v58, inf }
 0x21b   :  { %v4265_v8 = vpop.eup %4264  ;;  %v1151_v54 = vmul.f32 %v4263_v9, %v1035_v1  ;;  %v840_v45 = vpop.xlane.xlu0 %839  ;;  %4286 = vrsqrt.f32 %v849_v4  ;;  %v1168_v9 = vmul.f32 %v4765_v42, %v1152_v60  ;;  %v1186_v42 = vsel %vm115_vm0, %v1166_v15, 0.0 }
 0x21c   :  { %v4267_v25 = vpop.eup %4266  ;;  %4288 = vrsqrt.f32 %v840_v45  ;;  %v1058_v51 = vmul.f32 %v4265_v8, %v4901_v17  ;;  %v1220_v8 = vmul.f32 0.125, %v1169_v20 }
 0x21d   :  { %v4269_v49 = vpop.eup %4268  ;;  %v1167_v47 = vmul.f32 %v4778_v2, %v1151_v54  ;;  %v1189_v1 = vsel %vm115_vm0, %v1168_v9, 0.0 }
 0x21e   :  { %v4271_v16 = vpop.eup %4270  ;;  %v1154_v36 = vmul.f32 %v4269_v49, %v1056_v7  ;;  %v843_v2 = vpop.xlane.xlu1 %842  ;;  %v1060_v15 = vsel %vm1059_vm15, %v4901_v17, %v1058_v51  ;;  %v7680_v7 = vand.u32 2147483648, %v4891_v59  ;;  %v1191_v51 = vsel %vm115_vm0, %v1169_v20, 0.0 }
 0x21f   :  { %v4273_v0 = vpop.eup %4272  ;;  %v1218_v55 = vmul.f32 0.125, %v1167_v47  ;;  %v1187_v57 = vsel %vm115_vm0, %v1167_v47, 0.0  ;;  %4290 = vrsqrt.f32 %v843_v2  ;;  %v7681_v47 = vand.u32 2147483648, %v4893_v62 }
 0x220   :  { %v4275_v10 = vpop.eup %4274  ;;  %v1188_v60 = vadd.f32 %v1187_v57, %v1186_v42  ;;  %v1170_v4 = vmul.f32 %v4794_v32, %v1154_v36  ;;  %v1070_v49 = vsel %vm1068_vm13, %v7680_v7, %v1067_v28  ;;  %v1093_v32 = vmul.f32 %v4267_v25, %v4903_v26 }
 0x221   :  { %v4277_v33 = vpop.eup %4276  ;;  %v1225_v44 = vpack.c.bf16 %v1218_v55, %v1217_v30  ;;  %v1077_v2 = vsel %vm1075_vm14, %v7681_v47, %v1074_v3  ;;  %v1079_v36 = vmul.f32 %v4271_v16, %v4912_v35  ;;  %v1219_v30 = vmul.f32 0.125, %v1168_v9 }
 0x222   :  { %v4279_v54 = vpop.eup %4278  ;;  %v1190_v45 = vadd.f32 %v1189_v1, %v1188_v60  ;;  %v5043_v42 = vpop.permute.xlu1 %1265  ;;  %v1100_v55 = vmul.f32 %v4273_v0, %v4906_v27  ;;  %v1086_v59 = vmul.f32 %v4275_v10, %v4916_v34  ;;  %v1156_v60 = vmul.f32 %v4277_v33, %v1070_v49 }
 0x223   :  { %1241 = vxpose.xlu1.c.b16.start [1/4] (short) (narrow) %v1225_v44, 32  ;;  %v852_v28 = vpop.xlane.xlu0 %851  ;;  %v1226_v62 = vpack.c.bf16 %v1220_v8, %v1219_v30  ;;  %v1193_v3 = vsel %vm115_vm0, %v1170_v4, 0.0  ;;  %v1157_v25 = vmul.f32 %v4279_v54, %v1077_v2  ;;  %v1063_v9 = vsel %vm1061_vm1, %v1062_v39, %v1060_v15 }
 0x224   :  { %v1192_v57 = vadd.f32 %v1191_v51, %v1190_v45  ;;  %4292 = vrsqrt.f32 %v852_v28  ;;  %v4281_v1 = vpop.eup %4280  ;;  %v1095_v0 = vsel %vm1094_vm2, %v4903_v26, %v1093_v32  ;;  %v1104_v10 = vand.u32 2147483648, %v4906_v27 }
 0x225   :  { %v4283_v16 = vpop.eup %4282  ;;  %v1155_v44 = vmul.f32 %v4281_v1, %v1063_v9  ;;  %v1081_v8 = vsel %vm1080_vm3, %v4912_v35, %v1079_v36  ;;  %v1102_v17 = vsel %vm1101_vm6, %v4906_v27, %v1100_v55  ;;  %v1090_v39 = vand.u32 2147483648, %v4916_v34 }
 0x226   :  { %v1194_v20 = vadd.f32 %v1193_v3, %v1192_v57  ;;  %v5057_v33 = vpop.permute.xlu1 %1263  ;;  %v4285_v54 = vpop.eup %4284  ;;  %v1172_v49 = vmul.f32 %v4784_v12, %v1156_v60  ;;  %v1173_v47 = vmul.f32 %v4798_v56, %v1157_v25  ;;  %v1088_v2 = vsel %vm1087_vm8, %v4916_v34, %v1086_v59 }
 0x227   :  { %1242 = vxpose.xlu1.c.b16.cont [2/4] (short) (narrow) %v1226_v62, 32  ;;  %v5065_v15 = vpop.xlane.xlu0 %857  ;;  %v1171_v7 = vmul.f32 %v4809_v24, %v1155_v44  ;;  %v1107_v36 = vmul.f32 %v4283_v16, %v4918_v52  ;;  %v1084_v51 = vsel %vm1082_vm5, %v1083_v21, %v1081_v8  ;;  %v1098_v30 = vsel %vm1096_vm4, %v1097_v13, %v1095_v0 }
 0x228   :  { %v4287_v45 = vpop.eup %4286  ;;  %v1221_v55 = vmul.f32 0.125, %v1170_v4  ;;  %v1091_v60 = vsel %vm1089_vm9, %v1090_v39, %v1088_v2  ;;  %v1105_v35 = vsel %vm1103_vm7, %v1104_v10, %v1102_v17  ;;  %v1160_v21 = vmul.f32 %v4285_v54, %v1098_v30  ;;  %v5104_v39 = vld [vmem:[%s7413_s6] ss:$0 sm:$0xff] }
 0x229   :  { %v4289_v32 = vpop.eup %4288  ;;  %v1222_v12 = vmul.f32 0.125, %v1171_v7  ;;  %v1195_v56 = vsel %vm115_vm0, %v1171_v7, 0.0  ;;  %v1197_v13 = vsel %vm115_vm0, %v1172_v49, 0.0  ;;  %v1224_v4 = vmul.f32 0.125, %v1173_v47 }
 0x22a   :  { %v1507_v24 = vpop.permute.xlu1 %1506  ;;  %v1158_v28 = vmul.f32 %v4289_v32, %v1084_v51  ;;  %v1196_v57 = vadd.f32 %v1195_v56, %v1194_v20  ;;  %v1161_v3 = vmul.f32 %v4287_v45, %v1105_v35  ;;  %v1109_v25 = vsel %vm1108_vm10, %v4918_v52, %v1107_v36 }
 0x22b   :  { %v1268_v59 = vpop.permute.xlu0 %1267  ;;  %4087 = vmatprep.subr.bf16.mxu0 %v1507_v24  ;;  %v1227_v26 = vpack.c.bf16 %v1222_v12, %v1221_v55  ;;  %v1111_v27 = vand.u32 2147483648, %v4918_v52  ;;  %v1199_v20 = vsel %vm115_vm0, %v1173_v47, 0.0  ;;  %v1223_v16 = vmul.f32 0.125, %v1172_v49 }
 0x22c   :  { %v4291_v62 = vpop.eup %4290  ;;  %4063 = vmatprep.subr.bf16.mxu1 %v1268_v59  ;;  %4088 = vmatpush3.bf16.msra.mxu0 %v1507_v24  ;;  %v1198_v1 = vadd.f32 %v1197_v13, %v1196_v57  ;;  %v1174_v9 = vmul.f32 %v4824_v38, %v1158_v28  ;;  %v545_v0 = vmul.f32 %v4750_v40, %v4940_v5  ;;  %4294 = vpow2.f32 %v4947_v53 }
 0x22d   :  { %4064 = vmatpush3.bf16.msra.mxu1 %v1268_v59  ;;  %v1159_v34 = vmul.f32 %v4291_v62, %v1091_v60  ;;  %1243 = vxpose.xlu1.c.b16.cont [3/4] (short) (narrow) %v1227_v26, 32  ;;  %v1176_v38 = vmul.f32 %v4816_v31, %v1160_v21  ;;  %v1228_v54 = vpack.c.bf16 %v1224_v4, %v1223_v16  ;;  %v515_v56 = vmul.f32 0.6931472, %v4986_v46 }
 0x22e   :  { %4065 = vmatprep.subr.bf16.mxu1 %v5043_v42  ;;  %v5096_v44 = vadd.f32 %v1199_v20, %v1198_v1  ;;  %v1177_v17 = vmul.f32 %v4822_v50, %v1161_v3  ;;  %v5108_v5 = vmul.f32 %v5104_v39, %v4683_v37  ;;  %v1112_v52 = vsel %vm1110_vm11, %v1111_v27, %v1109_v25 }
 0x22f   :  { %v1262_v10 = vpop.permute.xlu0 %1261  ;;  %v1175_v8 = vmul.f32 %v4831_v61, %v1159_v34  ;;  %v1426_v61 = vsel %vm115_vm0, %v1174_v9, 0.0  ;;  %v1456_v7 = vmul.f32 0.125, %v1174_v9  ;;  %v564_v47 = vmul.f32 1.442695, %v545_v0 }
 0x230   :  { %v1429_v36 = vsel %vm115_vm0, %v1176_v38, 0.0  ;;  %v5118_v30 = vmul.f32 %v5104_v39, %v4673_v22  ;;  %v1431_v53 = vsel %vm115_vm0, %v1177_v17, 0.0  ;;  %4296 = vlog2.f32 %v5108_v5 }
 0x231   :  { %v4293_v45 = vpop.eup %4292  ;;  %4066 = vmatpush3.bf16.msra.mxu1 %v5043_v42  ;;  %v1457_v31 = vmul.f32 0.125, %v1175_v8  ;;  %v1427_v49 = vsel %vm115_vm0, %v1175_v8, 0.0  ;;  %1244 = vxpose.xlu1.c.b16.end [4/4] (short) (narrow) %v1228_v54, 32  ;;  %v1459_v42 = vmul.f32 0.125, %v1177_v17  ;;  %v1458_v55 = vmul.f32 0.125, %v1176_v38 }
 0x232   :  { %4067 = vmatprep.subr.bf16.mxu1 %v5057_v33  ;;  %v1428_v50 = vadd.f32 %v1427_v49, %v1426_v61  ;;  %v1162_v2 = vmul.f32 %v4293_v45, %v1112_v52  ;;  %4298 = vpow2.f32 %v564_v47  ;;  %v547_v59 = vmul.f32 %v4750_v40, %v515_v56 }
 0x233   :  { %v1505_v37 = vpop.permute.xlu0 %1504  ;;  %v1464_v32 = vpack.c.bf16 %v1457_v31, %v1456_v7  ;;  %v1465_v28 = vpack.c.bf16 %v1459_v42, %v1458_v55  ;;  %4300 = vlog2.f32 %v5118_v30  ;;  %v519_v57 = vmul.f32 0.6931472, %v4994_v43  ;;  %v7682_v42 = vld [vmem:[#allocation6_spill] sm:$0xff] }
 0x234   :  { %4089 = vmatprep.subr.bf16.mxu0 %v1505_v37  ;;  %v1430_v51 = vadd.f32 %v1429_v36, %v1428_v50  ;;  %v5121_v24 = vmul.f32 %v4839_v11, %v1162_v2  ;;  %v315_v46 = vmul.f32 %v4910_v29, %v4910_v29  ;;  %v568_v35 = vmul.f32 1.442695, %v547_v59 }
 0x235   :  { %4068 = vmatpush3.bf16.msra.mxu1 %v5057_v33  ;;  %4090 = vmatpush3.bf16.msra.mxu0 %v1505_v37  ;;  %v313_v33 = vmul.f32 %v4899_v14, %v4899_v14  ;;  %v549_v21 = vmul.f32 %v4750_v40, %v519_v57  ;;  %v5144_v26 = vmul.f32 %v5104_v39, %v4720_v18  ;;  %vm1124_vm13 = vcmp.eq.f32.partialorder %v4963_v58, 0.0 }
 0x236   :  { %1480 = vxpose.xlu0.c.b16.start [1/4] (short) (narrow) %v1464_v32, 32  ;;  %4069 = vmatprep.subr.bf16.mxu1 %v1262_v10  ;;  %v1432_v12 = vadd.f32 %v1431_v53, %v1430_v51  ;;  %v1433_v22 = vsel %vm115_vm0, %v5121_v24, 0.0  ;;  %v337_v13 = vsel %vm115_vm0, %v315_v46, 0.0  ;;  %4302 = vpow2.f32 %v568_v35 }
 0x237   :  { %v331_v60 = vsel %vm115_vm0, %v313_v33, 0.0  ;;  %v572_v4 = vmul.f32 1.442695, %v549_v21  ;;  %4304 = vlog2.f32 %v5144_v26  ;;  %v5154_v1 = vmul.f32 %v5104_v39, %v4711_v6 }
 0x238   :  { %v5130_v11 = vadd.f32 %v1433_v22, %v1432_v12  ;;  %v317_v16 = vmul.f32 %v4929_v48, %v4929_v48  ;;  %v319_v8 = vmul.f32 %v4933_v19, %v4933_v19  ;;  %v5184_v49 = vmul.f32 %v5104_v39, %v4592_v23 }
 0x239   :  { %4070 = vmatpush3.bf16.msra.mxu1 %v1262_v10  ;;  %v5140_v62 = vpop.eup %4294  ;;  %4306 = vpow2.f32 %v572_v4  ;;  %v321_v47 = vmul.f32 %v5108_v5, %v5108_v5  ;;  %v323_v23 = vmul.f32 %v5118_v30, %v5118_v30  ;;  %v5201_v5 = vmul.f32 %v5104_v39, %v7682_v42 }
 0x23a   :  { %1481 = vxpose.xlu0.c.b16.cont [2/4] (short) (narrow) %v1465_v28, 32  ;;  %v735_v43 = vmul.f32 %v5140_v62, %v5140_v62  ;;  %4308 = vlog2.f32 %v5154_v1  ;;  %v343_v10 = vsel %vm115_vm0, %v317_v16, 0.0  ;;  %v349_v48 = vsel %vm115_vm0, %v319_v8, 0.0  ;;  %v7683_v16 = vld [vmem:[#allocation12_spill] sm:$0xff] }
 0x23b   :  { %4310 = vrsqrt.f32 %v4963_v58  ;;  %v355_v55 = vsel %vm115_vm0, %v321_v47, 0.0  ;;  %v361_v28 = vsel %vm115_vm0, %v323_v23, 0.0  ;;  %v1125_v21 = vand.u32 2147483648, %v4963_v58 }
 0x23c   :  { %v753_v18 = vsel %vm115_vm0, %v735_v43, 0.0  ;;  %vm1129_vm14 = vcmp.eq.f32.partialorder %v4945_v41, inf  ;;  %vm1131_vm15 = vcmp.eq.f32.partialorder %v4945_v41, 0.0  ;;  %vm1115_vm1 = vcmp.eq.f32.partialorder %v4923_v63, inf }
 0x23d   :  { %v4297_v14 = vpop.eup %4296  ;;  %vm1117_vm2 = vcmp.eq.f32.partialorder %v4923_v63, 0.0  ;;  %vm1273_vm3 = vcmask 523264  }
 0x23e   :  { %332 = vadd.xlane.f32.xlu1 %v331_v60  ;;  %v523_v25 = vmul.f32 0.6931472, %v4297_v14 }
 0x23f   :  { %v5149_v3 = vpop.eup %4298 }
 0x240   :  { %v4301_v29 = vpop.eup %4300  ;;  %v737_v34 = vmul.f32 %v5149_v3, %v5149_v3  ;;  %v551_v27 = vmul.f32 %v4750_v40, %v523_v25 }
 0x241   :  { %v527_v9 = vmul.f32 0.6931472, %v4301_v29 }
 0x242   :  { %338 = vadd.xlane.f32.xlu1 %v337_v13  ;;  %v759_v20 = vsel %vm115_vm0, %v737_v34, 0.0  ;;  %v576_v0 = vmul.f32 1.442695, %v551_v27  ;;  %v1501_v13 = vpop.permute.xlu0 %1500  ;;  %v325_v27 = vmul.f32 %v5144_v26, %v5144_v26  ;;  %v327_v26 = vmul.f32 %v5154_v1, %v5154_v1  ;;  %v7687_v1 = vld [vmem:[#allocation28_spill] sm:$0xff] }
 0x243   :  { %v553_v6 = vmul.f32 %v4750_v40, %v527_v9  ;;  %v5169_v38 = vpop.eup %4302 }
 0x244   :  { %4312 = vpow2.f32 %v576_v0  ;;  %v4305_v17 = vpop.eup %4304  ;;  %v739_v40 = vmul.f32 %v5169_v38, %v5169_v38 }
 0x245   :  { %v580_v54 = vmul.f32 1.442695, %v553_v6  ;;  %4314 = vrsqrt.f32 %v4945_v41  ;;  %v531_v7 = vmul.f32 0.6931472, %v4305_v17  ;;  %v5231_v6 = vmul.f32 %v5104_v39, %v7683_v16  ;;  %v7684_v17 = vld [vmem:[#allocation26_spill] sm:$0xff] }
 0x246   :  { %754 = vadd.xlane.f32.xlu1 %v753_v18  ;;  %v5175_v52 = vpop.eup %4306  ;;  %v765_v45 = vsel %vm115_vm0, %v739_v40, 0.0  ;;  %v7685_v40 = vld [vmem:[#allocation27_spill] sm:$0xff]  ;;  %v312_v16 = vmul.f32 %v5184_v49, %v5184_v49 }
 0x247   :  { %4316 = vpow2.f32 %v580_v54  ;;  %v4309_v19 = vpop.eup %4308  ;;  %v741_v61 = vmul.f32 %v5175_v52, %v5175_v52 }
 0x248   :  { %4318 = vrsqrt.f32 %v4923_v63  ;;  %v535_v31 = vmul.f32 0.6931472, %v4309_v19  ;;  %v4311_v37 = vpop.eup %4310 }
 0x249   :  { %4320 = vrsqrt.f32 %v5065_v15  ;;  %v771_v50 = vsel %vm115_vm0, %v741_v61, 0.0  ;;  %v5192_v15 = vld [vmem:[%s7415_s5] ss:$0 sm:$0xff]  ;;  %v1121_v53 = vmul.f32 %v4311_v37, %v4963_v58  ;;  %v367_v61 = vsel %vm115_vm0, %v325_v27, 0.0  ;;  %v7689_v27 = vld [vmem:[#allocation17_spill] sm:$0xff] }
 0x24a   :  { %760 = vadd.xlane.f32.xlu1 %v759_v20  ;;  %v555_v2 = vmul.f32 %v5192_v15, %v531_v7  ;;  %v557_v36 = vmul.f32 %v5192_v15, %v535_v31 }
 0x24b   :  { %v1123_v60 = vsel %vm1122_vm12, %v4963_v58, %v1121_v53  ;;  %v1132_v58 = vand.u32 2147483648, %v4945_v41  ;;  %v373_v53 = vsel %vm115_vm0, %v327_v26, 0.0 }
 0x24c   :  { %v584_v12 = vmul.f32 1.442695, %v555_v2  ;;  %v588_v33 = vmul.f32 1.442695, %v557_v36  ;;  %v1126_v4 = vsel %vm1124_vm13, %v1125_v21, %v1123_v60 }
 0x24e   :  { %344 = vadd.xlane.f32.xlu1 %v343_v10 }
 0x251   :  { %v5203_v51 = vpop.eup %4312 }
 0x252   :  { %350 = vadd.xlane.f32.xlu1 %v349_v48  ;;  %v4315_v56 = vpop.eup %4314  ;;  %v743_v46 = vmul.f32 %v5203_v51, %v5203_v51  ;;  %v1118_v48 = vand.u32 2147483648, %v4923_v63 }
 0x253   :  { %v1128_v57 = vmul.f32 %v4315_v56, %v4945_v41 }
 0x254   :  { %v5207_v30 = vpop.eup %4316  ;;  %v777_v18 = vsel %vm115_vm0, %v743_v46, 0.0 }
 0x255   :  { %v4319_v59 = vpop.eup %4318  ;;  %v745_v43 = vmul.f32 %v5207_v30, %v5207_v30  ;;  %v1130_v25 = vsel %vm1129_vm14, %v4945_v41, %v1128_v57 }
 0x256   :  { %766 = vadd.xlane.f32.xlu1 %v765_v45  ;;  %v4321_v35 = vpop.eup %4320  ;;  %v1114_v29 = vmul.f32 %v4319_v59, %v4923_v63  ;;  %v1133_v20 = vsel %vm1131_vm15, %v1132_v58, %v1130_v25 }
 0x257   :  { %v1164_v34 = vmul.f32 %v4321_v35, %v1126_v4  ;;  %v783_v8 = vsel %vm115_vm0, %v745_v43, 0.0 }
 0x258   :  { %v1116_v10 = vsel %vm1115_vm1, %v4923_v63, %v1114_v29  ;;  %v7688_v29 = vld [vmem:[#allocation18_spill] sm:$0xff] }
 0x259   :  { %v1180_v41 = vmul.f32 %v7684_v17, %v1164_v34  ;;  %v1119_v7 = vsel %vm1117_vm2, %v1118_v48, %v1116_v10 }
 0x25a   :  { %772 = vadd.xlane.f32.xlu1 %v771_v50  ;;  %v7686_v50 = vld [vmem:[#allocation10_spill] sm:$0xff] }
 0x25b   :  { %v861_v32 = vpop.xlane.xlu1 %860  ;;  %v5244_v47 = vmul.f32 %v5104_v39, %v7686_v50  ;;  %v1437_v46 = vsel %vm115_vm0, %v1180_v41, 0.0 }
 0x25c   :  { %4322 = vrsqrt.f32 %v861_v32  ;;  %v1462_v32 = vmul.f32 0.125, %v1180_v41 }
 0x25d   :  { %4324 = vlog2.f32 %v5184_v49  ;;  %v7690_v49 = vld [vmem:[#allocation25_spill] sm:$0xff] }
 0x25e   :  { %356 = vadd.xlane.f32.xlu1 %v355_v55 }
 0x25f   :  { %v855_v22 = vpop.xlane.xlu1 %854 }
 0x260   :  { %4326 = vrsqrt.f32 %v855_v22 }
 0x261   :  { %4328 = vlog2.f32 %v5201_v5 }
 0x262   :  { %4330 = vpow2.f32 %v584_v12  ;;  %362 = vadd.xlane.f32.xlu1 %v361_v28  ;;  %v1460_v28 = vmul.f32 0.125, %v5121_v24 }
 0x263   :  { %v1503_v14 = vpop.permute.xlu1 %1502  ;;  %4332 = vpow2.f32 %v588_v33 }
 0x264   :  { %4091 = vmatprep.subr.bf16.mxu0 %v1503_v14  ;;  %4334 = vlog2.f32 %v5231_v6 }
 0x265   :  { %4092 = vmatpush3.bf16.msra.mxu0 %v1503_v14  ;;  %4336 = vlog2.f32 %v5244_v47 }
 0x266   :  { %4093 = vmatprep.subr.bf16.mxu0 %v1501_v13  ;;  %778 = vadd.xlane.f32.xlu1 %v777_v18 }
 0x269   :  { %v4323_v9 = vpop.eup %4322  ;;  %4094 = vmatpush3.bf16.msra.mxu0 %v1501_v13 }
 0x26a   :  { %v4325_v0 = vpop.eup %4324  ;;  %v1165_v54 = vmul.f32 %v4323_v9, %v1133_v20  ;;  %784 = vadd.xlane.f32.xlu1 %v783_v8  ;;  %v5276_v20 = vmul.f32 %v5104_v39, %v7689_v27  ;;  %v314_v8 = vmul.f32 %v5201_v5, %v5201_v5 }
 0x26b   :  { %v505_v31 = vmul.f32 0.6931472, %v4325_v0 }
 0x26c   :  { %v1181_v19 = vmul.f32 %v7685_v40, %v1165_v54  ;;  %v328_v54 = vsel %vm115_vm0, %v312_v16, 0.0  ;;  %v5291_v40 = vmul.f32 %v5104_v39, %v7690_v49  ;;  %v7698_v16 = vld [vmem:[#allocation21_spill] sm:$0xff] }
 0x26d   :  { %v4327_v45 = vpop.eup %4326  ;;  %v542_v55 = vmul.f32 %v5192_v15, %v505_v31  ;;  %v7691_v31 = vld [vmem:[#allocation7_spill] sm:$0xff] }
 0x26e   :  { %v4329_v2 = vpop.eup %4328  ;;  %v1163_v37 = vmul.f32 %v4327_v45, %v1119_v7  ;;  %v1463_v23 = vmul.f32 0.125, %v1181_v19  ;;  %368 = vadd.xlane.f32.xlu1 %v367_v61  ;;  %v1439_v24 = vsel %vm115_vm0, %v1181_v19, 0.0  ;;  %v334_v45 = vsel %vm115_vm0, %v314_v8, 0.0 }
 0x26f   :  { %v5247_v63 = vpop.eup %4330  ;;  %v509_v12 = vmul.f32 0.6931472, %v4329_v2  ;;  %v558_v43 = vmul.f32 1.442695, %v542_v55  ;;  %v7692_v2 = vld [vmem:[#allocation23_spill] sm:$0xff] }
 0x270   :  { %v1179_v36 = vmul.f32 %v7687_v1, %v1163_v37  ;;  %v1467_v42 = vpack.c.bf16 %v1463_v23, %v1462_v32  ;;  %v5253_v56 = vpop.eup %4332  ;;  %v747_v22 = vmul.f32 %v5247_v63, %v5247_v63  ;;  %v5304_v37 = vmul.f32 %v5104_v39, %v7692_v2  ;;  %v5371_v2 = vld [vmem:[%s7416_s7 + $0x8] sm:$0xff]  }
 0x271   :  { %v544_v21 = vmul.f32 %v5192_v15, %v509_v12  ;;  %v749_v13 = vmul.f32 %v5253_v56, %v5253_v56  ;;  %4338 = vpow2.f32 %v558_v43  ;;  %v4335_v34 = vpop.eup %4334  ;;  %4111 = vmatprep.subr.bf16.mxu0 %v5371_v2 }
 0x272   :  { %v1461_v33 = vmul.f32 0.125, %v1179_v36  ;;  %v1435_v59 = vsel %vm115_vm0, %v1179_v36, 0.0  ;;  %374 = vadd.xlane.f32.xlu1 %v373_v53  ;;  %v789_v14 = vsel %vm115_vm0, %v747_v22, 0.0  ;;  %v4337_v58 = vpop.eup %4336  ;;  %v513_v9 = vmul.f32 0.6931472, %v4335_v34  ;;  %v7694_v22 = vld [vmem:[#allocation9_spill] sm:$0xff] }
 0x273   :  { %v1436_v57 = vadd.f32 %v1435_v59, %v5130_v11  ;;  %v5270_v11 = vmul.f32 %v5104_v39, %v7688_v29  ;;  %v795_v25 = vsel %vm115_vm0, %v749_v13, 0.0  ;;  %v562_v18 = vmul.f32 1.442695, %v544_v21 }
 0x274   :  { %v1466_v60 = vpack.c.bf16 %v1461_v33, %v1460_v28  ;;  %v546_v0 = vmul.f32 %v5192_v15, %v513_v9  ;;  %v517_v10 = vmul.f32 0.6931472, %v4337_v58  ;;  %v316_v53 = vmul.f32 %v5231_v6, %v5231_v6 }
 0x275   :  { %v1438_v35 = vadd.f32 %v1437_v46, %v1436_v57  ;;  %4340 = vlog2.f32 %v5270_v11  ;;  %v318_v33 = vmul.f32 %v5244_v47, %v5244_v47  ;;  %v7696_v47 = vld [vmem:[#allocation15_spill] sm:$0xff]  ;;  %v320_v58 = vmul.f32 %v5270_v11, %v5270_v11  ;;  %v7699_v11 = vld [vmem:[#allocation20_spill] sm:$0xff] }
 0x276   :  { %1482 = vxpose.xlu0.c.b16.cont [3/4] (short) (narrow) %v1466_v60, 32  ;;  %790 = vadd.xlane.f32.xlu1 %v789_v14  ;;  %4342 = vpow2.f32 %v562_v18  ;;  %v566_v17 = vmul.f32 1.442695, %v546_v0  ;;  %v548_v41 = vmul.f32 %v5192_v15, %v517_v10  ;;  %v340_v28 = vsel %vm115_vm0, %v316_v53, 0.0  ;;  %v7695_v60 = vld [vmem:[#allocation8_spill] sm:$0xff]  ;;  %v7697_v18 = vld [vmem:[#allocation14_spill] sm:$0xff] }
 0x277   :  { %v5266_v4 = vadd.f32 %v1439_v24, %v1438_v35  ;;  %4344 = vlog2.f32 %v5276_v20  ;;  %v346_v35 = vsel %vm115_vm0, %v318_v33, 0.0  ;;  %v352_v0 = vsel %vm115_vm0, %v320_v58, 0.0  ;;  %v7701_v58 = vld [vmem:[#allocation5_spill] sm:$0xff] }
 0x278   :  { %4346 = vpow2.f32 %v566_v17  ;;  %v570_v61 = vmul.f32 1.442695, %v548_v41  ;;  %v322_v10 = vmul.f32 %v5276_v20, %v5276_v20 }
 0x279   :  { %4348 = vlog2.f32 %v5291_v40 }
 0x27a   :  { %1483 = vxpose.xlu0.c.b16.end [4/4] (short) (narrow) %v1467_v42, 32  ;;  %796 = vadd.xlane.f32.xlu1 %v795_v25  ;;  %4350 = vpow2.f32 %v570_v61  ;;  %v7693_v42 = vld [vmem:[#allocation3_spill] sm:$0xff]  ;;  %v358_v41 = vsel %vm115_vm0, %v322_v10, 0.0 }
 0x27b   :  { %4352 = vlog2.f32 %v5304_v37 }
 0x27e   :  { %v5286_v48 = vpop.eup %4338 }
 0x27f   :  { %v734_v5 = vmul.f32 %v5286_v48, %v5286_v48 }
 0x281   :  { %v750_v32 = vsel %vm115_vm0, %v734_v5, 0.0  ;;  %v324_v5 = vmul.f32 %v5291_v40, %v5291_v40 }
 0x282   :  { %v4341_v19 = vpop.eup %4340 }
 0x283   :  { %v5296_v7 = vpop.eup %4342  ;;  %v521_v1 = vmul.f32 0.6931472, %v4341_v19  ;;  %v364_v61 = vsel %vm115_vm0, %v324_v5, 0.0  ;;  %v7703_v5 = vld [vmem:[#allocation11_spill] sm:$0xff] }
 0x284   :  { %v736_v23 = vmul.f32 %v5296_v7, %v5296_v7  ;;  %v4345_v36 = vpop.eup %4344 }
 0x285   :  { %v550_v39 = vmul.f32 %v5192_v15, %v521_v1  ;;  %v525_v12 = vmul.f32 0.6931472, %v4345_v36  ;;  %v5322_v6 = vpop.eup %4346  ;;  %v7448_v1 = vmov 0.0  }
 0x286   :  { %v756_v55 = vsel %vm115_vm0, %v736_v23, 0.0  ;;  %v4349_v46 = vpop.eup %4348  ;;  %v738_v21 = vmul.f32 %v5322_v6, %v5322_v6  ;;  %1815 = vst.msk [vmem:[#allocation2 + $0x10] sm:$0xff] %vm115_vm0, %v7448_v1  ;;  %1813 = vst.msk [vmem:[#allocation2] sm:$0xff] %vm115_vm0, %v7448_v1 }
 0x287   :  { %329 = vadd.xlane.f32.xlu0 %v328_v54  ;;  %v1249_v26 = vpop.trf.xlu1  ;;  %v574_v59 = vmul.f32 1.442695, %v550_v39  ;;  %v552_v57 = vmul.f32 %v5192_v15, %v525_v12  ;;  %v5329_v13 = vpop.eup %4350  ;;  %v529_v29 = vmul.f32 0.6931472, %v4349_v46  ;;  %1814 = vst.msk [vmem:[#allocation2 + $0x8] sm:$0xff] %vm115_vm0, %v7448_v1  ;;  %1816 = vst.msk [vmem:[#allocation2 + $0x58] sm:$0xff] %vm115_vm0, %v7448_v1 }
 0x288   :  { %4071 = vmatprep.mubr.msk.bf16.mxu1 %vm1273_vm3, %v1249_v26  ;;  %v762_v24 = vsel %vm115_vm0, %v738_v21, 0.0  ;;  %v740_v43 = vmul.f32 %v5329_v13, %v5329_v13  ;;  %v4353_v25 = vpop.eup %4352  ;;  %1817 = vst.msk [vmem:[#allocation2 + $0x60] sm:$0xff] %vm115_vm0, %v7448_v1  ;;  %1818 = vst.msk [vmem:[#allocation2 + $0x68] sm:$0xff] %vm115_vm0, %v7448_v1 }
 0x289   :  { %4354 = vpow2.f32 %v574_v59  ;;  %v578_v14 = vmul.f32 1.442695, %v552_v57  ;;  %v554_v9 = vmul.f32 %v5192_v15, %v529_v29  ;;  %v533_v27 = vmul.f32 0.6931472, %v4353_v25  ;;  %1819 = vst.msk [vmem:[#allocation2 + $0xb0] sm:$0xff] %vm115_vm0, %v7448_v1  ;;  %1820 = vst.msk [vmem:[#allocation2 + $0xb8] sm:$0xff] %vm115_vm0, %v7448_v1 }
 0x28a   :  { %v768_v34 = vsel %vm115_vm0, %v740_v43, 0.0  ;;  %1821 = vst.msk [vmem:[#allocation2 + $0xc0] sm:$0xff] %vm115_vm0, %v7448_v1  ;;  %v5407_v59 = vld [vmem:[%s7416_s7] sm:$0xff]  }
 0x28b   :  { %335 = vadd.xlane.f32.xlu0 %v334_v45  ;;  %1832 = vrot.lane.b32.xlu1 %v7691_v31, %s4471_s18  ;;  %v1250_v50 = vpop.trf.xlu1  ;;  %4356 = vpow2.f32 %v578_v14  ;;  %v582_v8 = vmul.f32 1.442695, %v554_v9  ;;  %v556_v54 = vmul.f32 %v5192_v15, %v533_v27  ;;  %v326_v31 = vmul.f32 %v5304_v37, %v5304_v37 }
 0x28c   :  { %4072 = vmatmul.mubr.msk.bf16.vlgmr.msra.gmra.mxu1 %vm1273_vm3, %v1250_v50 }
 0x28d   :  { %4358 = vpow2.f32 %v582_v8  ;;  %v586_v49 = vmul.f32 1.442695, %v556_v54 }
 0x28f   :  { %751 = vadd.xlane.f32.xlu0 %v750_v32  ;;  %1834 = vrot.lane.b32.xlu1 %v7693_v42, %s4471_s18  ;;  %4360 = vpow2.f32 %v586_v49  ;;  %v370_v32 = vsel %vm115_vm0, %v326_v31, 0.0 }
 0x293   :  { %757 = vadd.xlane.f32.xlu0 %v756_v55  ;;  %1838 = vrot.lane.b32.xlu1 %v7694_v22, %s4471_s18  ;;  %v1201_v55 = vrot.slane %v5096_v44, 4 }
 0x295   :  { %v1202_v12 = vadd.f32 %v1201_v55, %v5096_v44 }
 0x296   :  { %v5348_v17 = vpop.eup %4354 }
 0x297   :  { %341 = vadd.xlane.f32.xlu0 %v340_v28  ;;  %1842 = vrot.lane.b32.xlu1 %v7695_v60, %s4471_s18  ;;  %v742_v26 = vmul.f32 %v5348_v17, %v5348_v17  ;;  %v1203_v33 = vrot.slane %v1202_v12, 2 }
 0x298   :  { %v5355_v19 = vpop.eup %4356 }
 0x299   :  { %v774_v20 = vsel %vm115_vm0, %v742_v26, 0.0  ;;  %v744_v15 = vmul.f32 %v5355_v19, %v5355_v19  ;;  %v1204_v46 = vadd.f32 %v1203_v33, %v1202_v12 }
 0x29a   :  { %v5366_v50 = vpop.eup %4358 }
 0x29b   :  { %347 = vadd.xlane.f32.xlu0 %v346_v35  ;;  %1870 = vrot.lane.b32.xlu1 %v7696_v47, %s4471_s18  ;;  %v780_v45 = vsel %vm115_vm0, %v744_v15, 0.0  ;;  %v746_v40 = vmul.f32 %v5366_v50, %v5366_v50  ;;  %v1205_v14 = vrot.slane %v1204_v46, 1  ;;  %v7700_v47 = vld [vmem:[#allocation4_spill] sm:$0xff] }
 0x29c   :  { %v5377_v23 = vpop.eup %4360 }
 0x29d   :  { %v786_v37 = vsel %vm115_vm0, %v746_v40, 0.0  ;;  %v748_v36 = vmul.f32 %v5377_v23, %v5377_v23 }
 0x29f   :  { %763 = vadd.xlane.f32.xlu0 %v762_v24  ;;  %1874 = vrot.lane.b32.xlu1 %v7697_v18, %s4471_s18  ;;  %v792_v42 = vsel %vm115_vm0, %v748_v36, 0.0  ;;  %v7704_v36 = vld [vmem:[#allocation19_spill] sm:$0xff] }
 0x2a3   :  { %769 = vadd.xlane.f32.xlu0 %v768_v34  ;;  %1878 = vrot.lane.b32.xlu1 %v7698_v16, %s4471_s18  ;;  %v1206_v34 = vadd.f32 %v1205_v14, %v1204_v46  ;;  %v7706_v14 = vld [vmem:[#allocation24_spill] sm:$0xff] }
 0x2a5   :  { %v5417_v54 = vmul.f32 0.015625, %v1206_v34  ;;  %v7707_v34 = vld [vmem:[#allocation22_spill] sm:$0xff] }
 0x2a7   :  { %353 = vadd.xlane.f32.xlu0 %v352_v0  ;;  %1882 = vrot.lane.b32.xlu1 %v7699_v11, %s4471_s18  ;;  %v7702_v11 = vld [vmem:[#allocation13_spill] sm:$0xff] }
 0x2ab   :  { %359 = vadd.xlane.f32.xlu0 %v358_v41 }
 0x2af   :  { %775 = vadd.xlane.f32.xlu0 %v774_v20 }
 0x2b3   :  { %781 = vadd.xlane.f32.xlu0 %v780_v45 }
 0x2b7   :  { %365 = vadd.xlane.f32.xlu0 %v364_v61 }
 0x2bb   :  { %371 = vadd.xlane.f32.xlu0 %v370_v32 }
 0x2bf   :  { %787 = vadd.xlane.f32.xlu0 %v786_v37  ;;  %v1441_v37 = vrot.slane %v5266_v4, 4 }
 0x2c1   :  { %v1442_v12 = vadd.f32 %v1441_v37, %v5266_v4 }
 0x2c3   :  { %793 = vadd.xlane.f32.xlu0 %v792_v42 }
 0x2c7   :  { %v333_v53 = vpop.xlane.xlu1 %332 }
 0x2c8   :  { %4362 = vrsqrt.f32 %v333_v53  ;;  %vm871_vm4 = vcmp.eq.f32.partialorder %v333_v53, inf  ;;  %v874_v25 = vand.u32 2147483648, %v333_v53  ;;  %vm873_vm5 = vcmp.eq.f32.partialorder %v333_v53, 0.0 }
 0x2cb   :  { %v339_v39 = vpop.xlane.xlu1 %338 }
 0x2cc   :  { %4364 = vrsqrt.f32 %v339_v39  ;;  %vm885_vm6 = vcmp.eq.f32.partialorder %v339_v39, inf  ;;  %v888_v10 = vand.u32 2147483648, %v339_v39  ;;  %vm887_vm7 = vcmp.eq.f32.partialorder %v339_v39, 0.0 }
 0x2cf   :  { %v755_v22 = vpop.xlane.xlu1 %754 }
 0x2d0   :  { %v1488_v28 = vpop.trf.xlu0  ;;  %4366 = vrsqrt.f32 %v755_v22  ;;  %v7705_v22 = vld [vmem:[#allocation16_spill] sm:$0xff] }
 0x2d1   :  { %4095 = vmatprep.mubr.msk.bf16.mxu0 %vm1273_vm3, %v1488_v28 }
 0x2d3   :  { %v761_v57 = vpop.xlane.xlu1 %760 }
 0x2d4   :  { %v1489_v60 = vpop.trf.xlu0  ;;  %4368 = vrsqrt.f32 %v761_v57 }
 0x2d5   :  { %4096 = vmatmul.mubr.msk.bf16.vlgmr.msra.gmra.mxu0 %vm1273_vm3, %v1489_v60  ;;  %v4363_v35 = vpop.eup %4362 }
 0x2d6   :  { %4112 = vmatpush3.bf16.msra.mxu0 %v5371_v2  ;;  %v870_v44 = vmul.f32 %v4363_v35, %v333_v53 }
 0x2d7   :  { %4113 = vmatprep.subr.bf16.mxu0 %v5407_v59  ;;  %v345_v21 = vpop.xlane.xlu1 %344 }
 0x2d8   :  { %4370 = vrsqrt.f32 %v345_v21  ;;  %v872_v43 = vsel %vm871_vm4, %v333_v53, %v870_v44  ;;  %vm899_vm8 = vcmp.eq.f32.partialorder %v345_v21, inf  ;;  %vm901_vm9 = vcmp.eq.f32.partialorder %v345_v21, 0.0 }
 0x2d9   :  { %1830 = vrot.lane.b32.xlu0 %v7700_v47, %s4471_s18  ;;  %v4365_v24 = vpop.eup %4364  ;;  %v875_v27 = vsel %vm873_vm5, %v874_v25, %v872_v43  ;;  %v1443_v44 = vrot.slane %v1442_v12, 2 }
 0x2da   :  { %4114 = vmatpush3.bf16.msra.mxu0 %v5407_v59  ;;  %v884_v29 = vmul.f32 %v4365_v24, %v339_v39 }
 0x2db   :  { %v351_v18 = vpop.xlane.xlu1 %350  ;;  %v1444_v25 = vadd.f32 %v1443_v44, %v1442_v12 }
 0x2dc   :  { %4372 = vrsqrt.f32 %v351_v18  ;;  %v886_v16 = vsel %vm885_vm6, %v339_v39, %v884_v29  ;;  %v902_v39 = vand.u32 2147483648, %v345_v21  ;;  %vm913_vm10 = vcmp.eq.f32.partialorder %v351_v18, inf }
 0x2dd   :  { %1836 = vrot.lane.b32.xlu0 %v7701_v58, %s4471_s18  ;;  %v4367_v9 = vpop.eup %4366  ;;  %v889_v49 = vsel %vm887_vm7, %v888_v10, %v886_v16  ;;  %v916_v46 = vand.u32 2147483648, %v351_v18  ;;  %vm915_vm11 = vcmp.eq.f32.partialorder %v351_v18, 0.0  ;;  %v1445_v16 = vrot.slane %v1444_v25, 1 }
 0x2de   :  { %v991_v0 = vmul.f32 %v4367_v9, %v875_v27 }
 0x2df   :  { %v767_v8 = vpop.xlane.xlu1 %766 }
 0x2e0   :  { %4374 = vrsqrt.f32 %v767_v8  ;;  %v5422_v41 = vmul.f32 %v5140_v62, %v991_v0 }
 0x2e1   :  { %1840 = vrot.lane.b32.xlu0 %v7702_v11, %s4471_s18  ;;  %v4369_v26 = vpop.eup %4368 }
 0x2e2   :  { %v993_v20 = vmul.f32 %v4369_v26, %v889_v49  ;;  %v5426_v15 = vmul.f32 %v5417_v54, %v5422_v41  ;;  %v1446_v49 = vadd.f32 %v1445_v16, %v1444_v25 }
 0x2e3   :  { %v773_v45 = vpop.xlane.xlu1 %772 }
 0x2e4   :  { %4376 = vrsqrt.f32 %v773_v45  ;;  %v5431_v61 = vmul.f32 %v5149_v3, %v993_v20  ;;  %v5461_v37 = vmul.f32 0.015625, %v1446_v49 }
 0x2e5   :  { %1844 = vrot.lane.b32.xlu0 %v7703_v5, %s4471_s18  ;;  %v4371_v31 = vpop.eup %4370 }
 0x2e6   :  { %v898_v32 = vmul.f32 %v4371_v31, %v345_v21  ;;  %v5435_v62 = vmul.f32 %v5417_v54, %v5431_v61 }
 0x2e7   :  { %v357_v40 = vpop.xlane.xlu1 %356 }
 0x2e8   :  { %4378 = vrsqrt.f32 %v357_v40  ;;  %v900_v53 = vsel %vm899_vm8, %v345_v21, %v898_v32  ;;  %vm927_vm12 = vcmp.eq.f32.partialorder %v357_v40, inf  ;;  %v930_v11 = vand.u32 2147483648, %v357_v40 }
 0x2e9   :  { %1872 = vrot.lane.b32.xlu0 %v7704_v36, %s4471_s18  ;;  %v4373_v42 = vpop.eup %4372  ;;  %v903_v33 = vsel %vm901_vm9, %v902_v39, %v900_v53  ;;  %vm929_vm13 = vcmp.eq.f32.partialorder %v357_v40, 0.0 }
 0x2ea   :  { %v912_v55 = vmul.f32 %v4373_v42, %v351_v18 }
 0x2eb   :  { %v363_v3 = vpop.xlane.xlu1 %362 }
 0x2ec   :  { %4380 = vrsqrt.f32 %v363_v3  ;;  %v914_v57 = vsel %vm913_vm10, %v351_v18, %v912_v55  ;;  %vm941_vm14 = vcmp.eq.f32.partialorder %v363_v3, inf  ;;  %v944_v31 = vand.u32 2147483648, %v363_v3 }
 0x2ed   :  { %1876 = vrot.lane.b32.xlu0 %v7705_v22, %s4471_s18  ;;  %v4375_v28 = vpop.eup %4374  ;;  %v917_v47 = vsel %vm915_vm11, %v916_v46, %v914_v57  ;;  %vm943_vm15 = vcmp.eq.f32.partialorder %v363_v3, 0.0 }
 0x2ee   :  { %v995_v60 = vmul.f32 %v4375_v28, %v903_v33 }
 0x2ef   :  { %v779_v35 = vpop.xlane.xlu1 %778 }
 0x2f0   :  { %4382 = vrsqrt.f32 %v779_v35  ;;  %v5446_v4 = vmul.f32 %v5169_v38, %v995_v60 }
 0x2f1   :  { %1880 = vrot.lane.b32.xlu0 %v7706_v14, %s4471_s18  ;;  %v4377_v21 = vpop.eup %4376 }
 0x2f2   :  { %v5450_v24 = vmul.f32 %v5417_v54, %v5446_v4  ;;  %v997_v43 = vmul.f32 %v4377_v21, %v917_v47 }
 0x2f3   :  { %v785_v29 = vpop.xlane.xlu1 %784 }
 0x2f4   :  { %4384 = vrsqrt.f32 %v785_v29  ;;  %v5455_v18 = vmul.f32 %v5175_v52, %v997_v43 }
 0x2f5   :  { %1884 = vrot.lane.b32.xlu0 %v7707_v34, %s4471_s18  ;;  %v4379_v58 = vpop.eup %4378 }
 0x2f6   :  { %v926_v9 = vmul.f32 %v4379_v58, %v357_v40  ;;  %v5459_v38 = vmul.f32 %v5417_v54, %v5455_v18 }
 0x2f7   :  { %v369_v27 = vpop.xlane.xlu1 %368 }
 0x2f8   :  { %4386 = vrsqrt.f32 %v369_v27  ;;  %v928_v10 = vsel %vm927_vm12, %v357_v40, %v926_v9  ;;  %vm955_vm1 = vcmp.eq.f32.partialorder %v369_v27, inf  ;;  %v958_v57 = vand.u32 2147483648, %v369_v27 }
 0x2f9   :  { %v4381_v0 = vpop.eup %4380  ;;  %v931_v20 = vsel %vm929_vm13, %v930_v11, %v928_v10  ;;  %vm957_vm2 = vcmp.eq.f32.partialorder %v369_v27, 0.0 }
 0x2fa   :  { %v940_v8 = vmul.f32 %v4381_v0, %v363_v3 }
 0x2fb   :  { %v375_v26 = vpop.xlane.xlu1 %374 }
 0x2fc   :  { %4388 = vrsqrt.f32 %v375_v26  ;;  %v942_v45 = vsel %vm941_vm14, %v363_v3, %v940_v8  ;;  %vm969_vm3 = vcmp.eq.f32.partialorder %v375_v26, inf  ;;  %v972_v21 = vand.u32 2147483648, %v375_v26 }
 0x2fd   :  { %v4383_v52 = vpop.eup %4382  ;;  %v945_v53 = vsel %vm943_vm15, %v944_v31, %v942_v45  ;;  %vm971_vm4 = vcmp.eq.f32.partialorder %v375_v26, 0.0 }
 0x2fe   :  { %v999_v5 = vmul.f32 %v4383_v52, %v931_v20 }
 0x2ff   :  { %v791_v32 = vpop.xlane.xlu1 %790 }
 0x300   :  { %4390 = vrsqrt.f32 %v791_v32  ;;  %v5464_v36 = vmul.f32 %v5203_v51, %v999_v5 }
 0x301   :  { %v4385_v42 = vpop.eup %4384 }
 0x302   :  { %v5468_v40 = vmul.f32 %v5461_v37, %v5464_v36  ;;  %v5470_v55 = vmul.f32 %v4385_v42, %v945_v53 }
 0x303   :  { %v797_v39 = vpop.xlane.xlu1 %796 }
 0x304   :  { %4392 = vrsqrt.f32 %v797_v39 }
 0x305   :  { %v4387_v12 = vpop.eup %4386 }
 0x306   :  { %v954_v22 = vmul.f32 %v4387_v12, %v369_v27 }
 0x307   :  { %v1833_v28 = vpop.permute.xlu1 %1832 }
 0x308   :  { %1855 = vst.msk [vmem:[#allocation2 + $0x20] sm:$0xff] %vm115_vm0, %v1833_v28  ;;  %v956_v33 = vsel %vm955_vm1, %v369_v27, %v954_v22 }
 0x309   :  { %v4389_v3 = vpop.eup %4388  ;;  %v959_v35 = vsel %vm957_vm2, %v958_v57, %v956_v33 }
 0x30a   :  { %v968_v51 = vmul.f32 %v4389_v3, %v375_v26 }
 0x30b   :  { %v1835_v60 = vpop.permute.xlu1 %1834 }
 0x30c   :  { %1856 = vst.msk [vmem:[#allocation2 + $0x28] sm:$0xff] %vm115_vm0, %v1835_v60  ;;  %v970_v44 = vsel %vm969_vm3, %v375_v26, %v968_v51 }
 0x30d   :  { %v4391_v46 = vpop.eup %4390  ;;  %v973_v25 = vsel %vm971_vm4, %v972_v21, %v970_v44 }
 0x30e   :  { %v5474_v14 = vmul.f32 %v4391_v46, %v959_v35 }
 0x30f   :  { %v1839_v47 = vpop.permute.xlu1 %1838 }
 0x310   :  { %v330_v43 = vpop.xlane.xlu0 %329  ;;  %1858 = vst.msk [vmem:[#allocation2 + $0x38] sm:$0xff] %vm115_vm0, %v1839_v47 }
 0x311   :  { %4394 = vrsqrt.f32 %v330_v43  ;;  %v4393_v29 = vpop.eup %4392  ;;  %vm864_vm5 = vcmp.eq.f32.partialorder %v330_v43, inf  ;;  %v867_v5 = vand.u32 2147483648, %v330_v43  ;;  %vm866_vm6 = vcmp.eq.f32.partialorder %v330_v43, 0.0 }
 0x312   :  { %v5477_v34 = vmul.f32 %v4393_v29, %v973_v25 }
 0x313   :  { %v1843_v58 = vpop.permute.xlu1 %1842 }
 0x314   :  { %v336_v9 = vpop.xlane.xlu0 %335  ;;  %1860 = vst.msk [vmem:[#allocation2 + $0x48] sm:$0xff] %vm115_vm0, %v1843_v58  ;;  %v1906_v58 = vlaneseq }
 0x315   :  { %4396 = vrsqrt.f32 %v336_v9  ;;  %vm878_vm7 = vcmp.eq.f32.partialorder %v336_v9, inf  ;;  %v881_v22 = vand.u32 2147483648, %v336_v9  ;;  %vm880_vm8 = vcmp.eq.f32.partialorder %v336_v9, 0.0 }
 0x317   :  { %v1871_v27 = vpop.permute.xlu1 %1870 }
 0x318   :  { %v752_v16 = vpop.xlane.xlu0 %751  ;;  %1894 = vst.msk [vmem:[#allocation2 + $0x70] sm:$0xff] %vm115_vm0, %v1871_v27 }
 0x319   :  { %4398 = vrsqrt.f32 %v752_v16 }
 0x31b   :  { %v1875_v0 = vpop.permute.xlu1 %1874 }
 0x31c   :  { %v758_v10 = vpop.xlane.xlu0 %757  ;;  %1896 = vst.msk [vmem:[#allocation2 + $0x80] sm:$0xff] %vm115_vm0, %v1875_v0 }
 0x31d   :  { %4400 = vrsqrt.f32 %v758_v10  ;;  %v5503_v10 = vshrl.u32 %v1906_v58, 7 }
 0x31e   :  { %v4395_v8 = vpop.eup %4394 }
 0x31f   :  { %v863_v11 = vmul.f32 %v4395_v8, %v330_v43  ;;  %v1879_v26 = vpop.permute.xlu1 %1878  ;;  %7708 = vst [vmem:[#allocation6_spill] sm:$0xff] %v5503_v10 }
 0x320   :  { %v342_v49 = vpop.xlane.xlu0 %341  ;;  %1898 = vst.msk [vmem:[#allocation2 + $0x90] sm:$0xff] %vm115_vm0, %v1879_v26 }
 0x321   :  { %4402 = vrsqrt.f32 %v342_v49  ;;  %v865_v20 = vsel %vm864_vm5, %v330_v43, %v863_v11  ;;  %vm892_vm9 = vcmp.eq.f32.partialorder %v342_v49, inf  ;;  %vm894_vm10 = vcmp.eq.f32.partialorder %v342_v49, 0.0 }
 0x322   :  { %v4397_v52 = vpop.eup %4396  ;;  %v868_v53 = vsel %vm866_vm6, %v867_v5, %v865_v20 }
 0x323   :  { %v877_v45 = vmul.f32 %v4397_v52, %v336_v9  ;;  %v1883_v31 = vpop.permute.xlu1 %1882 }
 0x324   :  { %v348_v32 = vpop.xlane.xlu0 %347  ;;  %1900 = vst.msk [vmem:[#allocation2 + $0xa0] sm:$0xff] %vm115_vm0, %v1883_v31 }
 0x325   :  { %4404 = vrsqrt.f32 %v348_v32  ;;  %v879_v39 = vsel %vm878_vm7, %v336_v9, %v877_v45  ;;  %vm906_vm11 = vcmp.eq.f32.partialorder %v348_v32, inf  ;;  %v909_v26 = vand.u32 2147483648, %v348_v32 }
 0x326   :  { %v4399_v42 = vpop.eup %4398  ;;  %v882_v51 = vsel %vm880_vm8, %v881_v22, %v879_v39  ;;  %vm908_vm12 = vcmp.eq.f32.partialorder %v348_v32, 0.0  ;;  %v2133_v39 = vsub.s32 0, %v5503_v10 }
 0x327   :  { %v990_v12 = vmul.f32 %v4399_v42, %v868_v53  ;;  %v1902_v42 = vld [vmem:[%s7417_s8] sm:$0xff] }
 0x328   :  { %v764_v28 = vpop.xlane.xlu0 %763 }
 0x329   :  { %4406 = vrsqrt.f32 %v764_v28  ;;  %v1006_v3 = vmul.f32 %v5286_v48, %v990_v12  ;;  %v2464_v12 = vsub.s32 1, %v5503_v10 }
 0x32a   :  { %v4401_v33 = vpop.eup %4400 }
 0x32b   :  { %v992_v57 = vmul.f32 %v4401_v33, %v882_v51  ;;  %v1345_v60 = vpack.c.bf16 %v5422_v41, %v1006_v3  ;;  %v1209_v46 = vmul.f32 %v5417_v54, %v1006_v3  ;;  %v1903_v3 = vld [vmem:[%s7417_s8 + $0x8] sm:$0xff]  ;;  %v5530_v33 = vld [vmem:[%s7417_s8 + $0x10] sm:$0xff]  ;;  %v2171_v51 = vsub.s32 5, %v5503_v10 }
 0x32c   :  { %v770_v35 = vpop.xlane.xlu0 %769 }
 0x32d   :  { %4408 = vrsqrt.f32 %v770_v35  ;;  %4079 = vmatprep.mubr.msk.bf16.mxu1 %vm115_vm0, %v1345_v60  ;;  %v1652_v44 = vpack.c.bf16 %v5426_v15, %v1209_v46  ;;  %v5490_v21 = vmul.f32 %v5296_v7, %v992_v57  ;;  %v895_v7 = vand.u32 2147483648, %v342_v49 }
 0x32e   :  { %v4403_v47 = vpop.eup %4402  ;;  %v2540_v35 = vsub.s32 3, %v5503_v10 }
 0x32f   :  { %v891_v43 = vmul.f32 %v4403_v47, %v342_v49  ;;  %4115 = vmatprep.mubr.msk.bf16.mxu0 %vm115_vm0, %v1652_v44  ;;  %v1211_v48 = vmul.f32 %v5417_v54, %v5490_v21  ;;  %v5543_v47 = vrot.slane %v1902_v42, %v2133_v39 }
 0x330   :  { %v5495_v29 = vpop.xlane.xlu0 %353 }
 0x331   :  { %4410 = vrsqrt.f32 %v5495_v29  ;;  %v1653_v25 = vpack.c.bf16 %v5435_v62, %v1211_v48  ;;  %v893_v15 = vsel %vm892_vm9, %v342_v49, %v891_v43  ;;  %v2209_v49 = vsub.s32 2, %v5503_v10  ;;  %7710 = vst [vmem:[#allocation26_spill] sm:$0xff] %v5543_v47 }
 0x332   :  { %v4405_v41 = vpop.eup %4404  ;;  %v896_v0 = vsel %vm894_vm10, %v895_v7, %v893_v15  ;;  %vm920_vm13 = vcmp.eq.f32.partialorder %v5495_v29, inf  ;;  %vm922_vm14 = vcmp.eq.f32.partialorder %v5495_v29, 0.0 }
 0x333   :  { %v905_v9 = vmul.f32 %v4405_v41, %v348_v32  ;;  %4116 = vmatmul.mubr.msk.bf16.vlgmr.msra.gmra.mxu0 %vm115_vm0, %v1653_v25  ;;  %v5533_v60 = vrot.slane %v1902_v42, %v2209_v49  ;;  %v5551_v41 = vrot.slane %v5530_v33, %v2464_v12  ;;  %v5554_v25 = vrot.slane %v1902_v42, %v2171_v51 }
 0x334   :  { %v5500_v27 = vpop.xlane.xlu0 %359 }
 0x335   :  { %4412 = vrsqrt.f32 %v5500_v27  ;;  %v907_v8 = vsel %vm906_vm11, %v348_v32, %v905_v9  ;;  %v5516_v32 = vsub.s32 7, %v5503_v10  ;;  %7709 = vst [vmem:[#allocation12_spill] sm:$0xff] %v5533_v60  ;;  %7713 = vst [vmem:[#allocation28_spill] sm:$0xff] %v5551_v41  ;;  %vm934_vm15 = vcmp.eq.f32.partialorder %v5500_v27, inf }
 0x336   :  { %v4407_v16 = vpop.eup %4406  ;;  %v910_v45 = vsel %vm908_vm12, %v909_v26, %v907_v8  ;;  %7714 = vst [vmem:[#allocation18_spill] sm:$0xff] %v5554_v25  ;;  %v5572_v26 = vrot.slane %v1903_v3, %v2540_v35  ;;  %vm936_vm1 = vcmp.eq.f32.partialorder %v5500_v27, 0.0 }
 0x337   :  { %v994_v11 = vmul.f32 %v4407_v16, %v896_v0  ;;  %v5546_v43 = vrot.slane %v1902_v42, %v5516_v32  ;;  %v5559_v58 = vrot.slane %v1903_v3, %v5516_v32  ;;  %v5566_v16 = vrot.slane %v1902_v42, %v2464_v12 }
 0x338   :  { %v776_v62 = vpop.xlane.xlu0 %775 }
 0x339   :  { %4414 = vrsqrt.f32 %v776_v62  ;;  %v5506_v52 = vmul.f32 %v5322_v6, %v994_v11  ;;  %v2284_v6 = vsub.s32 4, %v5503_v10  ;;  %7711 = vst [vmem:[#allocation27_spill] sm:$0xff] %v5546_v43  ;;  %7716 = vst [vmem:[#allocation25_spill] sm:$0xff] %v5559_v58  ;;  %v923_v62 = vand.u32 2147483648, %v5495_v29  ;;  %v5608_v58 = vld [vmem:[#allocation2 + $0x60] sm:$0xff] }
 0x33a   :  { %v4409_v20 = vpop.eup %4408  ;;  %7718 = vst [vmem:[#allocation23_spill] sm:$0xff] %v5566_v16  ;;  %7731 = vst [vmem:[#allocation16_spill] sm:$0xff] %v5608_v58 }
 0x33b   :  { %v1213_v5 = vmul.f32 %v5417_v54, %v5506_v52  ;;  %v996_v31 = vmul.f32 %v4409_v20, %v910_v45  ;;  %v5548_v48 = vrot.slane %v1903_v3, %v2284_v6  ;;  %v5564_v7 = vrot.slane %v5530_v33, %v2284_v6 }
 0x33c   :  { %v782_v53 = vpop.xlane.xlu0 %781  ;;  %v5582_v45 = vrot.slane %v5530_v33, %v2171_v51 }
 0x33d   :  { %4416 = vrsqrt.f32 %v782_v53  ;;  %v1654_v22 = vpack.c.bf16 %v5450_v24, %v1213_v5  ;;  %v5522_v28 = vmul.f32 %v5329_v13, %v996_v31  ;;  %v2502_v24 = vsub.s32 6, %v5503_v10  ;;  %7712 = vst [vmem:[#allocation10_spill] sm:$0xff] %v5548_v48  ;;  %7717 = vst [vmem:[#allocation7_spill] sm:$0xff] %v5564_v7  ;;  %v2996_v7 = vld [vmem:[#allocation2 + $0x9] sm:$0xff] }
 0x33e   :  { %v4411_v57 = vpop.eup %4410  ;;  %7721 = vst [vmem:[#allocation8_spill] sm:$0xff] %v5582_v45  ;;  %v5589_v31 = vrot.slane %v1902_v42, %v2540_v35  ;;  %v5591_v53 = vrot.slane %v1903_v3, %v2133_v39 }
 0x33f   :  { %v919_v46 = vmul.f32 %v4411_v57, %v5495_v29  ;;  %4119 = vmatprep.mubr.msk.bf16.mxu0 %vm115_vm0, %v1654_v22  ;;  %v1215_v13 = vmul.f32 %v5417_v54, %v5522_v28  ;;  %v5556_v54 = vrot.slane %v1903_v3, %v2209_v49  ;;  %v5570_v11 = vrot.slane %v1902_v42, %v2502_v24  ;;  %v5593_v22 = vld [vmem:[#allocation2 + $0x5e] sm:$0xff] }
 0x340   :  { %v5541_v44 = vpop.xlane.xlu0 %365  ;;  %v5585_v5 = vrot.slane %v5530_v33, %v2502_v24  ;;  %7723 = vst [vmem:[#allocation14_spill] sm:$0xff] %v5589_v31  ;;  %7724 = vst [vmem:[#allocation21_spill] sm:$0xff] %v5591_v53 }
 0x341   :  { %4418 = vrsqrt.f32 %v5541_v44  ;;  %7715 = vst [vmem:[#allocation17_spill] sm:$0xff] %v5556_v54  ;;  %v1655_v9 = vpack.c.bf16 %v5459_v38, %v1215_v13  ;;  %v921_v0 = vsel %vm920_vm13, %v5495_v29, %v919_v46  ;;  %7719 = vst [vmem:[#allocation3_spill] sm:$0xff] %v5570_v11  ;;  %v5579_v38 = vrot.slane %v5530_v33, %v2133_v39 }
 0x342   :  { %v4413_v15 = vpop.eup %4412  ;;  %7722 = vst [vmem:[#allocation15_spill] sm:$0xff] %v5585_v5  ;;  %7725 = vst [vmem:[#allocation20_spill] sm:$0xff] %v5593_v22  ;;  %v924_v46 = vsel %vm922_vm14, %v923_v62, %v921_v0  ;;  %v5596_v13 = vrot.slane %v1903_v3, %v2171_v51  ;;  %v5606_v39 = vrot.slane %v1903_v3, %v2464_v12  ;;  %v5610_v5 = vld [vmem:[#allocation2 + $0x61] sm:$0xff]  ;;  %v937_v51 = vand.u32 2147483648, %v5500_v27 }
 0x343   :  { %v933_v8 = vmul.f32 %v4413_v15, %v5500_v27  ;;  %4120 = vmatmul.mubr.msk.bf16.gmra.mxu0 %vm115_vm0, %v1655_v9  ;;  %7720 = vst [vmem:[#allocation9_spill] sm:$0xff] %v5579_v38  ;;  %v5599_v15 = vrot.slane %v5530_v33, %v2209_v49  ;;  %v5601_v9 = vld [vmem:[#allocation2 + $0x5f] sm:$0xff]  ;;  %v5604_v38 = vrot.slane %v1902_v42, %v2284_v6  ;;  %7732 = vst [vmem:[#allocation24_spill] sm:$0xff] %v5610_v5  ;;  %v5624_v12 = vld [vmem:[#allocation2 + $0x67] sm:$0xff] }
 0x344   :  { %v5576_v20 = vpop.xlane.xlu0 %371  ;;  %7726 = vst [vmem:[#allocation4_spill] sm:$0xff] %v5596_v13  ;;  %7728 = vst [vmem:[#allocation13_spill] sm:$0xff] %v5601_v9  ;;  %v5612_v0 = vld [vmem:[#allocation2 + $0x66] sm:$0xff]  ;;  %v5615_v49 = vrot.slane %v1903_v3, %v2502_v24  ;;  %v5618_v13 = vrot.slane %v5530_v33, %v2540_v35  ;;  %v2143_v42 = vmul.f32 %v5543_v47, %v5593_v22  ;;  %vm948_vm2 = vcmp.eq.f32.partialorder %v5541_v44, inf }
 0x345   :  { %4420 = vrsqrt.f32 %v5576_v20  ;;  %7727 = vst [vmem:[#allocation5_spill] sm:$0xff] %v5599_v15  ;;  %v935_v29 = vsel %vm934_vm15, %v5500_v27, %v933_v8  ;;  %7729 = vst [vmem:[#allocation11_spill] sm:$0xff] %v5604_v38  ;;  %v5622_v6 = vld [vmem:[#allocation2 + $0x62] sm:$0xff]  ;;  %v2474_v3 = vmul.f32 %v5566_v16, %v5601_v9  ;;  %v5640_v27 = vmul.f32 %v5589_v31, %v5610_v5  ;;  %v5659_v15 = vld [vmem:[#allocation2 + $0x10] sm:$0xff] }
 0x346   :  { %v4415_v57 = vpop.eup %4414  ;;  %7730 = vst [vmem:[#allocation19_spill] sm:$0xff] %v5606_v39  ;;  %7733 = vst [vmem:[#allocation22_spill] sm:$0xff] %v5612_v0  ;;  %v5634_v24 = vld [vmem:[#allocation2 + $0x68] sm:$0xff]  ;;  %v938_v22 = vsel %vm936_vm1, %v937_v51, %v935_v29  ;;  %v5648_v9 = vmul.f32 %v5207_v30, %v5470_v55  ;;  %v2512_v30 = vmul.f32 %v5570_v11, %v5624_v12  ;;  %vm950_vm3 = vcmp.eq.f32.partialorder %v5541_v44, 0.0 }
 0x347   :  { %v998_v1 = vmul.f32 %v4415_v57, %v924_v46  ;;  %7734 = vst [vmem:[#allocation29_spill] sm:$0xff] %v5615_v49  ;;  %7735 = vst [vmem:[#allocation30_spill] sm:$0xff] %v5618_v13  ;;  %v2115_v57 = vld [vmem:[#allocation2 + $0x6] sm:$0xff]  ;;  %v5630_v46 = vld [vmem:[#allocation2 + $0xe] sm:$0xff]  ;;  %v2805_v49 = vmul.f32 %v5533_v60, %v5608_v58  ;;  %v5654_v58 = vmul.f32 %v5604_v38, %v5622_v6  ;;  %vm962_vm4 = vcmp.eq.f32.partialorder %v5576_v20, inf }
 0x348   :  { %v788_v62 = vpop.xlane.xlu0 %787  ;;  %7736 = vst [vmem:[#allocation31_spill] sm:$0xff] %v5622_v6  ;;  %7737 = vst [vmem:[#allocation32_spill] sm:$0xff] %v5624_v12  ;;  %v2446_v13 = vld [vmem:[#allocation2 + $0x7] sm:$0xff]  ;;  %v5650_v29 = vld [vmem:[#allocation2 + $0xf] sm:$0xff]  ;;  %v2135_v5 = vmul.f32 %v5543_v47, %v2115_v57  ;;  %v2843_v55 = vmul.f32 %v5546_v43, %v5634_v24  ;;  %v1909_v57 = vadd.s32 16, %v5503_v10  ;;  %vm964_vm6 = vcmp.eq.f32.partialorder %v5576_v20, 0.0 }
 0x349   :  { %4422 = vrsqrt.f32 %v788_v62  ;;  %v5628_v8 = vmul.f32 %v5348_v17, %v998_v1  ;;  %7738 = vst [vmem:[#allocation33_spill] sm:$0xff] %v5634_v24  ;;  %7739 = vst [vmem:[#allocation34_spill] sm:$0xff] %v5640_v27  ;;  %v2181_v17 = vmul.f32 %v5554_v25, %v5612_v0  ;;  %v2777_v51 = vld [vmem:[#allocation2 + $0x8] sm:$0xff]  ;;  %v2173_v0 = vmul.f32 %v5554_v25, %v5630_v46 }
 0x34a   :  { %v4417_v35 = vpop.eup %4416  ;;  %7740 = vst [vmem:[#allocation35_spill] sm:$0xff] %v5648_v9  ;;  %7741 = vst [vmem:[#allocation36_spill] sm:$0xff] %v5654_v58  ;;  %v2466_v25 = vmul.f32 %v5566_v16, %v2446_v13  ;;  %v2504_v45 = vmul.f32 %v5570_v11, %v5650_v29  ;;  %v2797_v12 = vmul.f32 %v5533_v60, %v2777_v51  ;;  %v3327_v39 = vld [vmem:[#allocation2 + $0xa] sm:$0xff]  ;;  %v1927_v51 = vand.u32 7, %v5503_v10 }
 0x34b   :  { %v1448_v1 = vmul.f32 %v5461_v37, %v5628_v8  ;;  %v1000_v62 = vmul.f32 %v4417_v35, %v938_v22  ;;  %v5674_v24 = vadd.f32 %v2181_v17, %v2143_v42  ;;  %v1451_v13 = vmul.f32 %v5461_v37, %v5648_v9 }
 0x34c   :  { %v794_v27 = vpop.xlane.xlu0 %793  ;;  %v4073_v22 = vpop.f32.mrf.mxu1  ;;  %v5685_v11 = vadd.f32 %v2173_v0, %v2135_v5  ;;  %v5687_v42 = vadd.f32 %v2512_v30, %v2474_v3  ;;  %v5696_v9 = vmul.f32 %v5604_v38, %v3327_v39  ;;  %v5701_v0 = vrot.slane %v5530_v33, %v5516_v32 }
 0x34d   :  { %4424 = vrsqrt.f32 %v794_v27  ;;  %v1656_v35 = vpack.c.bf16 %v5468_v40, %v1448_v1  ;;  %v5667_v58 = vmul.f32 %v5355_v19, %v1000_v62  ;;  %7743 = vst [vmem:[#allocation38_spill] sm:$0xff] %v5674_v24  ;;  %v2835_v1 = vmul.f32 %v5546_v43, %v5659_v15 }
 0x34e   :  { %v4419_v6 = vpop.eup %4418  ;;  %v1314_v40 = vpop.f32.mrf.mxu1  ;;  %v5693_v24 = vmul.f32 %v5589_v31, %v2996_v7  ;;  %7745 = vst [vmem:[#allocation40_spill] sm:$0xff] %v5696_v9  ;;  %7746 = vst [vmem:[#allocation41_spill] sm:$0xff] %v5701_v0  ;;  %v2318_v33 = vadd.s32 4294967294, %v1927_v51 }
 0x34f   :  { %7742 = vst [vmem:[#allocation37_spill] sm:$0xff] %v5667_v58  ;;  %v947_v27 = vmul.f32 %v4419_v6, %v5541_v44  ;;  %4123 = vmatprep.mubr.msk.bf16.mxu0 %vm115_vm0, %v1656_v35  ;;  %v1450_v19 = vmul.f32 %v5461_v37, %v5667_v58  ;;  %v5689_v6 = vadd.f32 %v2843_v55, %v2805_v49  ;;  %v1941_v58 = vand.u32 7, %v1909_v57 }
 0x350   :  { %v1831_v62 = vpop.permute.xlu0 %1830  ;;  %v4074_v17 = vpop.f32.mrf.mxu1  ;;  %7744 = vst [vmem:[#allocation39_spill] sm:$0xff] %v5693_v24  ;;  %v1908_v49 = vadd.s32 8, %v5503_v10  ;;  %v5707_v55 = vadd.f32 %v2504_v45, %v2466_v25  ;;  %v5709_v39 = vadd.f32 %v2835_v1, %v2797_v12  ;;  %v951_v57 = vand.u32 2147483648, %v5541_v44 }
 0x351   :  { %1854 = vst.msk [vmem:[#allocation2 + $0x18] sm:$0xff] %vm115_vm0, %v1831_v62  ;;  %v1657_v35 = vpack.c.bf16 %v1451_v13, %v1450_v19  ;;  %v1330_v5 = vpack.c.bf16 %v4074_v17, %v4073_v22  ;;  %v949_v3 = vsel %vm948_vm2, %v5541_v44, %v947_v27  ;;  %v2320_v27 = vadd.s32 4294967294, %v1941_v58 }
 0x352   :  { %v4421_v53 = vpop.eup %4420  ;;  %v1317_v7 = vpop.f32.mrf.mxu1  ;;  %7747 = vst [vmem:[#allocation42_spill] sm:$0xff] %v5709_v39  ;;  %v1910_v13 = vadd.s32 24, %v5503_v10  ;;  %v952_v45 = vsel %vm950_vm3, %v951_v57, %v949_v3  ;;  %v5725_v1 = vmul.f32 %v5247_v63, %v5474_v14  ;;  %v5729_v62 = vmul.f32 %v5543_v47, %v5630_v46 }
 0x353   :  { %v961_v30 = vmul.f32 %v4421_v53, %v5576_v20  ;;  %4124 = vmatmul.mubr.msk.bf16.gmra.mxu0 %vm115_vm0, %v1657_v35  ;;  %v1344_v22 = vmul.bf16 %v5371_v2, %v1330_v5  ;;  %v1329_v19 = vpack.c.bf16 %v1317_v7, %v1314_v40  ;;  %v5715_v53 = vadd.s32 4294967295, %v1927_v51 }
 0x354   :  { %v1837_v32 = vpop.permute.xlu0 %1836  ;;  %v5720_v2 = vand.u32 7, %v1908_v49  ;;  %7748 = vst [vmem:[#allocation43_spill] sm:$0xff] %v5725_v1  ;;  %7749 = vst [vmem:[#allocation44_spill] sm:$0xff] %v5729_v62  ;;  %v965_v17 = vand.u32 2147483648, %v5576_v20  ;;  %vm2334_vm5 = vcmp.ge.s32.totalorder %v2318_v33, 0  ;;  %v3199_v5 = vadd.s32 1, %v1927_v51 }
 0x355   :  { %1857 = vst.msk [vmem:[#allocation2 + $0x30] sm:$0xff] %vm115_vm0, %v1837_v32  ;;  %v1343_v12 = vmul.bf16 %v5407_v59, %v1329_v19  ;;  %4075 = vmatprep.subr.bf16.mxu1 %v1344_v22  ;;  %v963_v40 = vsel %vm962_vm4, %v5576_v20, %v961_v30  ;;  %v2651_v59 = vadd.s32 4294967295, %v1941_v58  ;;  %vm2336_vm7 = vcmp.ge.s32.totalorder %v2320_v27, 0 }
 0x356   :  { %v4423_v25 = vpop.eup %4422  ;;  %4076 = vmatpush3.bf16.msra.mxu1 %v1344_v22  ;;  %v3530_v63 = vadd.s32 2, %v1927_v51  ;;  %v966_v3 = vsel %vm964_vm6, %v965_v17, %v963_v40  ;;  %v3201_v46 = vadd.s32 1, %v1941_v58  ;;  %v3532_v30 = vadd.s32 2, %v1941_v58 }
 0x357   :  { %v1002_v44 = vmul.f32 %v4423_v25, %v952_v45  ;;  %4077 = vmatprep.subr.bf16.mxu1 %v1343_v12  ;;  %v1948_v7 = vand.u32 7, %v1910_v13  ;;  %v1453_v22 = vmul.f32 %v5461_v37, %v5725_v1  ;;  %v5743_v19 = vmul.f32 %v5253_v56, %v5477_v34 }
 0x358   :  { %v1841_v35 = vpop.permute.xlu0 %1840  ;;  %v1346_v51 = vpack.c.bf16 %v5431_v61, %v5490_v21  ;;  %v7752_v32 = vmov 0.0   ;;  %vm2667_vm8 = vcmp.ge.s32.totalorder %v2651_v59, 0  ;;  %vm2665_vm9 = vcmp.ge.s32.totalorder %v5715_v53, 0 }
 0x359   :  { %1859 = vst.msk [vmem:[#allocation2 + $0x40] sm:$0xff] %vm115_vm0, %v1841_v35  ;;  %v5735_v49 = vmul.f32 %v5366_v50, %v1002_v44  ;;  %7751 = vst [vmem:[#allocation46_spill] sm:$0xff] %v5743_v19  ;;  %v5748_v27 = vsel %vm2336_vm7, 1.0, %v7752_v32  ;;  %v1347_v58 = vpack.c.bf16 %v5446_v4, %v5506_v52  ;;  %vm3231_vm10 = vcmp.lt.s32.totalorder %v3199_v5, 8  ;;  %v2780_v35 = vld [vmem:[#allocation2 + $0x20] sm:$0xff] }
 0x35a   :  { %v4425_v14 = vpop.eup %4424  ;;  %4078 = vmatpush3.bf16.msra.mxu1 %v1343_v12  ;;  %vm3233_vm11 = vcmp.lt.s32.totalorder %v3201_v46, 8  ;;  %vm3564_vm12 = vcmp.lt.s32.totalorder %v3532_v30, 8  ;;  %vm3562_vm13 = vcmp.lt.s32.totalorder %v3530_v63, 8  ;;  %v2319_v56 = vadd.s32 4294967294, %v5720_v2  ;;  %v5807_v30 = vld [vmem:[#allocation2 + $0x26] sm:$0xff] }
 0x35b   :  { %7750 = vst [vmem:[#allocation45_spill] sm:$0xff] %v5735_v49  ;;  %v1452_v57 = vmul.f32 %v5461_v37, %v5735_v49  ;;  %v1004_v20 = vmul.f32 %v4425_v14, %v966_v3  ;;  %v1455_v4 = vmul.f32 %v5461_v37, %v5743_v19  ;;  %v2652_v34 = vadd.s32 4294967295, %v1948_v7  ;;  %v7786_v19 = vld [vmem:[#allocation3_spill] sm:$0xff] }
 0x35c   :  { %v1845_v50 = vpop.permute.xlu0 %1844  ;;  %v5767_v52 = vsel %vm2667_vm8, 1.0, %v7752_v32  ;;  %v5771_v45 = vsel %vm2334_vm5, 1.0, %v7752_v32  ;;  %v3202_v12 = vadd.s32 1, %v1948_v7  ;;  %v2650_v40 = vadd.s32 4294967295, %v5720_v2 }
 0x35d   :  { %1861 = vst.msk [vmem:[#allocation2 + $0x50] sm:$0xff] %vm115_vm0, %v1845_v50  ;;  %v1658_v13 = vpack.c.bf16 %v1453_v22, %v1452_v57  ;;  %v5755_v25 = vmul.f32 %v5377_v23, %v1004_v20  ;;  %4080 = vmatmul.mubr.msk.bf16.vlgmr.msra.gmra.mxu1 %vm115_vm0, %v1346_v51  ;;  %v2321_v23 = vadd.s32 4294967294, %v1948_v7  ;;  %7754 = vst [vmem:[#allocation48_spill] sm:$0xff] %v5767_v52  ;;  %v5782_v17 = vsel %vm2665_vm9, 1.0, %v7752_v32  ;;  %v5815_v22 = vld [vmem:[#allocation2 + $0x28] sm:$0xff] }
 0x35e   :  { %4083 = vmatprep.mubr.msk.bf16.mxu1 %vm115_vm0, %v1347_v58  ;;  %7755 = vst [vmem:[#allocation49_spill] sm:$0xff] %v5771_v45  ;;  %7757 = vst [vmem:[#allocation51_spill] sm:$0xff] %v5782_v17  ;;  %v5786_v33 = vsel %vm3231_vm10, 1.0, %v7752_v32  ;;  %v5790_v59 = vsel %vm3564_vm12, 1.0, %v7752_v32  ;;  %v5794_v14 = vsel %vm3562_vm13, 1.0, %v7752_v32  ;;  %vm2335_vm14 = vcmp.ge.s32.totalorder %v2319_v56, 0 }
 0x35f   :  { %7753 = vst [vmem:[#allocation47_spill] sm:$0xff] %v5755_v25  ;;  %4127 = vmatprep.mubr.msk.bf16.mxu0 %vm115_vm0, %v1658_v13  ;;  %v1454_v61 = vmul.f32 %v5461_v37, %v5755_v25  ;;  %v5777_v37 = vsel %vm3233_vm11, 1.0, %v7752_v32  ;;  %7758 = vst [vmem:[#allocation52_spill] sm:$0xff] %v5786_v33  ;;  %v5798_v3 = vmul.f32 %v5566_v16, %v5650_v29  ;;  %vm2337_vm15 = vcmp.ge.s32.totalorder %v2321_v23, 0  ;;  %v2999_v20 = vld [vmem:[#allocation2 + $0x21] sm:$0xff] }
 0x360   :  { %v1873_v21 = vpop.permute.xlu0 %1872  ;;  %7756 = vst [vmem:[#allocation50_spill] sm:$0xff] %v5777_v37  ;;  %7759 = vst [vmem:[#allocation53_spill] sm:$0xff] %v5790_v59  ;;  %vm2668_vm1 = vcmp.ge.s32.totalorder %v2652_v34, 0  ;;  %v3533_v53 = vadd.s32 2, %v1948_v7  ;;  %v5803_v5 = vmul.f32 %v5533_v60, %v5659_v15  ;;  %v1348_v63 = vpack.c.bf16 %v5455_v18, %v5522_v28  ;;  %v5813_v7 = vld [vmem:[#allocation2 + $0x27] sm:$0xff]  ;;  %v7792_v37 = vld [vmem:[#allocation25_spill] sm:$0xff] }
 0x361   :  { %1895 = vst.msk [vmem:[#allocation2 + $0x78] sm:$0xff] %vm115_vm0, %v1873_v21  ;;  %v1659_v44 = vpack.c.bf16 %v1455_v4, %v1454_v61  ;;  %7760 = vst [vmem:[#allocation54_spill] sm:$0xff] %v5794_v14  ;;  %vm3234_vm2 = vcmp.lt.s32.totalorder %v3202_v12, 8  ;;  %vm2666_vm3 = vcmp.ge.s32.totalorder %v2650_v40, 0  ;;  %v3200_v29 = vadd.s32 1, %v5720_v2  ;;  %v3330_v50 = vld [vmem:[#allocation2 + $0x22] sm:$0xff] }
 0x362   :  { %7761 = vst [vmem:[#allocation55_spill] sm:$0xff] %v5798_v3  ;;  %7762 = vst [vmem:[#allocation56_spill] sm:$0xff] %v5803_v5  ;;  %v1571_v57 = vpack.c.bf16 %v5464_v36, %v5628_v8  ;;  %v5818_v15 = vmul.f32 %v5546_v43, %v2780_v35  ;;  %v5821_v18 = vmul.f32 %v5551_v41, %v2780_v35  ;;  %v5825_v28 = vsel %vm2335_vm14, 1.0, %v7752_v32  ;;  %v5858_v21 = vld [vmem:[#allocation2 + $0x38] sm:$0xff]  ;;  %v7775_v14 = vld [vmem:[#allocation8_spill] sm:$0xff] }
 0x363   :  { %4128 = vmatmul.mubr.msk.bf16.gmra.mxu0 %vm115_vm0, %v1659_v44  ;;  %7764 = vst [vmem:[#allocation58_spill] sm:$0xff] %v5825_v28  ;;  %v5830_v36 = vsel %vm2337_vm15, 1.0, %v7752_v32  ;;  %v5834_v8 = vsel %vm2668_vm1, 1.0, %v7752_v32  ;;  %v2800_v51 = vmul.f32 %v5533_v60, %v2780_v35  ;;  %v1913_v58 = vadd.s32 48, %v5503_v10  ;;  %v7770_v40 = vld [vmem:[#allocation21_spill] sm:$0xff]  ;;  %v7777_v28 = vld [vmem:[#allocation15_spill] sm:$0xff] }
 0x364   :  { %v1877_v46 = vpop.permute.xlu0 %1876  ;;  %7763 = vst [vmem:[#allocation57_spill] sm:$0xff] %v5821_v18  ;;  %7765 = vst [vmem:[#allocation59_spill] sm:$0xff] %v5830_v36  ;;  %v5841_v13 = vsel %vm3234_vm2, 1.0, %v7752_v32  ;;  %vm3565_vm4 = vcmp.lt.s32.totalorder %v3533_v53, 8  ;;  %v5845_v56 = vsel %vm2666_vm3, 1.0, %v7752_v32  ;;  %v5848_v61 = vmul.f32 %v5548_v48, %v2780_v35  ;;  %v7771_v35 = vld [vmem:[#allocation19_spill] sm:$0xff] }
 0x365   :  { %1897 = vst.msk [vmem:[#allocation2 + $0x88] sm:$0xff] %vm115_vm0, %v1877_v46  ;;  %4084 = vmatmul.mubr.msk.bf16.gmra.mxu1 %vm115_vm0, %v1348_v63  ;;  %7766 = vst [vmem:[#allocation60_spill] sm:$0xff] %v5834_v8  ;;  %v5852_v23 = vmul.f32 %v5556_v54, %v5807_v30  ;;  %v5856_v34 = vmul.f32 %v5572_v26, %v5813_v7  ;;  %v5862_v12 = vmul.f32 %v5548_v48, %v5815_v22  ;;  %v7773_v63 = vld [vmem:[#allocation7_spill] sm:$0xff]  ;;  %v7781_v8 = vld [vmem:[#allocation30_spill] sm:$0xff] }
 0x366   :  { %4103 = vmatprep.mubr.msk.bf16.mxu1 %vm115_vm0, %v1571_v57  ;;  %7767 = vst [vmem:[#allocation61_spill] sm:$0xff] %v5841_v13  ;;  %7768 = vst [vmem:[#allocation62_spill] sm:$0xff] %v5845_v56  ;;  %v5865_v44 = vmul.f32 %v7770_v40, %v2999_v20  ;;  %v5869_v46 = vmul.f32 %v7771_v35, %v3330_v50  ;;  %v5873_v57 = vmul.f32 %v7773_v63, %v5807_v30  ;;  %v7779_v13 = vld [vmem:[#allocation5_spill] sm:$0xff]  ;;  %v7784_v33 = vld [vmem:[#allocation18_spill] sm:$0xff] }
 0x367   :  { %7769 = vst [vmem:[#allocation63_spill] sm:$0xff] %v5848_v61  ;;  %v5877_v56 = vmul.f32 %v7775_v14, %v5813_v7  ;;  %v5881_v61 = vmul.f32 %v7777_v28, %v5815_v22  ;;  %v5884_v5 = vmul.f32 %v7779_v13, %v2999_v20  ;;  %v1969_v36 = vand.u32 7, %v1913_v58 }
 0x368   :  { %v1881_v4 = vpop.permute.xlu0 %1880  ;;  %7772 = vst [vmem:[#allocation19_spill] sm:$0xff] %v5869_v46  ;;  %7774 = vst [vmem:[#allocation64_spill] sm:$0xff] %v5873_v57  ;;  %v1911_v3 = vadd.s32 32, %v5503_v10  ;;  %v5892_v62 = vmul.f32 %v7777_v28, %v5858_v21  ;;  %v5896_v59 = vmul.f32 %v7784_v33, %v5807_v30  ;;  %v2838_v25 = vmul.f32 %v5546_v43, %v5815_v22  ;;  %v3455_v57 = vld [vmem:[#allocation2 + $0x5a] sm:$0xff] }
 0x369   :  { %1899 = vst.msk [vmem:[#allocation2 + $0x98] sm:$0xff] %vm115_vm0, %v1881_v4  ;;  %7776 = vst [vmem:[#allocation65_spill] sm:$0xff] %v5877_v56  ;;  %v5887_v4 = vmul.f32 %v7781_v8, %v3330_v50  ;;  %v5906_v58 = vmul.f32 %v5551_v41, %v5858_v21  ;;  %v5912_v17 = vmul.f32 %v5604_v38, %v3330_v50  ;;  %v5916_v45 = vsel %vm3565_vm4, 1.0, %v7752_v32  ;;  %v3124_v56 = vld [vmem:[#allocation2 + $0x59] sm:$0xff] }
 0x36a   :  { %7778 = vst [vmem:[#allocation66_spill] sm:$0xff] %v5881_v61  ;;  %7780 = vst [vmem:[#allocation67_spill] sm:$0xff] %v5884_v5  ;;  %v5900_v61 = vmul.f32 %v7786_v19, %v5813_v7  ;;  %v5921_v1 = vmul.f32 %v7792_v37, %v5807_v30  ;;  %vm3232_vm5 = vcmp.lt.s32.totalorder %v3200_v29, 8  ;;  %v3531_v49 = vadd.s32 2, %v5720_v2  ;;  %v7798_v29 = vld [vmem:[#allocation4_spill] sm:$0xff]  ;;  %v7800_v2 = vld [vmem:[#allocation29_spill] sm:$0xff] }
 0x36b   :  { %7782 = vst [vmem:[#allocation68_spill] sm:$0xff] %v5887_v4  ;;  %7783 = vst [vmem:[#allocation69_spill] sm:$0xff] %v5892_v62  ;;  %v5909_v4 = vmul.f32 %v5589_v31, %v2999_v20  ;;  %v5933_v53 = vmul.f32 %v5551_v41, %v5815_v22  ;;  %v5935_v39 = vadd.f32 %v2838_v25, %v2800_v51  ;;  %v2655_v9 = vadd.s32 4294967295, %v1969_v36 }
 0x36c   :  { %7785 = vst [vmem:[#allocation70_spill] sm:$0xff] %v5896_v59  ;;  %7787 = vst [vmem:[#allocation71_spill] sm:$0xff] %v5900_v61  ;;  %v1885_v18 = vpop.permute.xlu0 %1884  ;;  %v2905_v61 = vld [vmem:[#allocation2 + $0x58] sm:$0xff]  ;;  %v5941_v59 = vmul.f32 %v7800_v2, %v3330_v50  ;;  %v5944_v62 = vsel %vm3232_vm5, 1.0, %v7752_v32  ;;  %vm3563_vm6 = vcmp.lt.s32.totalorder %v3531_v49, 8  ;;  %v3205_v50 = vadd.s32 1, %v1969_v36 }
 0x36d   :  { %7788 = vst [vmem:[#allocation72_spill] sm:$0xff] %v5906_v58  ;;  %7789 = vst [vmem:[#allocation73_spill] sm:$0xff] %v5909_v4  ;;  %v5924_v58 = vld [vmem:[#allocation2 + $0x48] sm:$0xff]  ;;  %v1914_v4 = vadd.s32 56, %v5503_v10  ;;  %v3536_v51 = vadd.s32 2, %v1969_v36  ;;  %vm2671_vm8 = vcmp.ge.s32.totalorder %v2655_v9, 0  ;;  %v5973_v49 = vmul.f32 %v5543_v47, %v5807_v30 }
 0x36e   :  { %7790 = vst [vmem:[#allocation74_spill] sm:$0xff] %v5912_v17  ;;  %7791 = vst [vmem:[#allocation75_spill] sm:$0xff] %v5916_v45  ;;  %v7794_v17 = vld [vmem:[#allocation9_spill] sm:$0xff]  ;;  %v1955_v45 = vand.u32 7, %v1911_v3  ;;  %v5952_v25 = vmul.f32 %v5548_v48, %v5924_v58  ;;  %v5955_v3 = vmul.f32 %v7777_v28, %v2905_v61  ;;  %vm3237_vm9 = vcmp.lt.s32.totalorder %v3205_v50, 8 }
 0x36f   :  { %1901 = vst.msk [vmem:[#allocation2 + $0xa8] sm:$0xff] %vm115_vm0, %v1885_v18  ;;  %7793 = vst [vmem:[#allocation76_spill] sm:$0xff] %v5921_v1  ;;  %v5929_v5 = vmul.f32 %v7794_v17, %v5813_v7  ;;  %v2324_v18 = vadd.s32 4294967294, %v1969_v36  ;;  %v5938_v1 = vmul.f32 %v7798_v29, %v2999_v20  ;;  %v5960_v20 = vld [vmem:[%s7417_s8 + $0x18] ss:$0 sm:$0xff]  ;;  %v5977_v36 = vmul.f32 %v5566_v16, %v5813_v7 }
 0x370   :  { %7796 = vst [vmem:[#allocation78_spill] sm:$0xff] %v5933_v53  ;;  %7797 = vst [vmem:[#allocation79_spill] sm:$0xff] %v5935_v39  ;;  %v2653_v53 = vadd.s32 4294967295, %v1955_v45  ;;  %v5969_v39 = vsel %vm3563_vm6, 1.0, %v7752_v32  ;;  %vm3568_vm10 = vcmp.lt.s32.totalorder %v3536_v51, 8  ;;  %v5989_v30 = vsel %vm2671_vm8, 1.0, %v7752_v32 }
 0x371   :  { %7795 = vst [vmem:[#allocation77_spill] sm:$0xff] %v5929_v5  ;;  %7799 = vst [vmem:[#allocation80_spill] sm:$0xff] %v5938_v1  ;;  %v5948_v5 = vmul.f32 %v5533_v60, %v5858_v21  ;;  %vm2340_vm7 = vcmp.ge.s32.totalorder %v2324_v18, 0  ;;  %v3534_v1 = vadd.s32 2, %v1955_v45  ;;  %v5993_v7 = vmul.f32 %v5548_v48, %v5858_v21 }
 0x372   :  { %7801 = vst [vmem:[#allocation81_spill] sm:$0xff] %v5941_v59  ;;  %7802 = vst [vmem:[#allocation82_spill] sm:$0xff] %v5944_v62  ;;  %v1976_v62 = vand.u32 7, %v1914_v4  ;;  %v5963_v59 = vmul.f32 %v5701_v0, %v3124_v56  ;;  %v5981_v4 = vmul.f32 %v5533_v60, %v5815_v22  ;;  %vm2669_vm12 = vcmp.ge.s32.totalorder %v2653_v53, 0 }
 0x373   :  { %7803 = vst [vmem:[#allocation83_spill] sm:$0xff] %v5948_v5  ;;  %7804 = vst [vmem:[#allocation84_spill] sm:$0xff] %v5952_v25  ;;  %v5966_v5 = vmul.f32 %v5960_v20, %v3455_v57  ;;  %v2322_v25 = vadd.s32 4294967294, %v1955_v45  ;;  %vm3566_vm14 = vcmp.lt.s32.totalorder %v3534_v1, 8  ;;  %v5996_v50 = vsel %vm3237_vm9, 1.0, %v7752_v32 }
 0x374   :  { %7805 = vst [vmem:[#allocation85_spill] sm:$0xff] %v5955_v3  ;;  %7806 = vst [vmem:[#allocation86_spill] sm:$0xff] %v5960_v20  ;;  %v3203_v3 = vadd.s32 1, %v1955_v45  ;;  %v2325_v9 = vadd.s32 4294967294, %v1976_v62  ;;  %v1912_v45 = vadd.s32 40, %v5503_v10  ;;  %v2656_v22 = vadd.s32 4294967295, %v1976_v62 }
 0x375   :  { %7807 = vst [vmem:[#allocation87_spill] sm:$0xff] %v5963_v59  ;;  %7808 = vst [vmem:[#allocation88_spill] sm:$0xff] %v5966_v5  ;;  %v5986_v5 = vsel %vm2340_vm7, 1.0, %v7752_v32  ;;  %vm2338_vm11 = vcmp.ge.s32.totalorder %v2322_v25, 0  ;;  %v5999_v51 = vsel %vm3568_vm10, 1.0, %v7752_v32  ;;  %v6003_v18 = vmul.f32 %v7777_v28, %v5924_v58 }
 0x376   :  { %7809 = vst [vmem:[#allocation89_spill] sm:$0xff] %v5969_v39  ;;  %7810 = vst [vmem:[#allocation90_spill] sm:$0xff] %v5973_v49  ;;  %vm3235_vm13 = vcmp.lt.s32.totalorder %v3203_v3, 8  ;;  %v3206_v39 = vadd.s32 1, %v1976_v62  ;;  %v6006_v25 = vsel %vm2338_vm11, 1.0, %v7752_v32  ;;  %vm2341_vm15 = vcmp.ge.s32.totalorder %v2325_v9, 0 }
 0x377   :  { %7811 = vst [vmem:[#allocation91_spill] sm:$0xff] %v5977_v36  ;;  %7812 = vst [vmem:[#allocation92_spill] sm:$0xff] %v5981_v4  ;;  %v1962_v53 = vand.u32 7, %v1912_v45  ;;  %v6009_v1 = vsel %vm2669_vm12, 1.0, %v7752_v32  ;;  %v6012_v3 = vsel %vm3235_vm13, 1.0, %v7752_v32  ;;  %vm2672_vm1 = vcmp.ge.s32.totalorder %v2656_v22, 0 }
 0x378   :  { %7813 = vst [vmem:[#allocation93_spill] sm:$0xff] %v5986_v5  ;;  %7814 = vst [vmem:[#allocation94_spill] sm:$0xff] %v5989_v30  ;;  %v6030_v9 = vmul.f32 %v5551_v41, %v2905_v61  ;;  %v6033_v45 = vsel %vm2341_vm15, 1.0, %v7752_v32  ;;  %vm3238_vm2 = vcmp.lt.s32.totalorder %v3206_v39, 8  ;;  %v6045_v61 = vmul.f32 %v7779_v13, %v3124_v56  ;;  %v6054_v39 = vld [vmem:[#allocation2 + $0x6e] sm:$0xff] }
 0x379   :  { %7815 = vst [vmem:[#allocation95_spill] sm:$0xff] %v5993_v7  ;;  %7816 = vst [vmem:[#allocation96_spill] sm:$0xff] %v5996_v50  ;;  %v3537_v7 = vadd.s32 2, %v1976_v62  ;;  %v6015_v50 = vsel %vm3566_vm14, 1.0, %v7752_v32  ;;  %v6027_v62 = vmul.f32 %v5546_v43, %v5924_v58  ;;  %v2654_v22 = vadd.s32 4294967295, %v1962_v53  ;;  %v6063_v56 = vld [vmem:[#allocation2 + $0x6f] sm:$0xff] }
 0x37a   :  { %7817 = vst [vmem:[#allocation97_spill] sm:$0xff] %v5999_v51  ;;  %7818 = vst [vmem:[#allocation98_spill] sm:$0xff] %v6003_v18  ;;  %v7823_v51 = vld [vmem:[#allocation20_spill] sm:$0xff]  ;;  %v7825_v18 = vld [vmem:[#allocation13_spill] sm:$0xff]  ;;  %v1918_v36 = vadd.s32 112, %v5503_v10 }
 0x37b   :  { %7819 = vst [vmem:[#allocation99_spill] sm:$0xff] %v6006_v25  ;;  %7820 = vst [vmem:[#allocation100_spill] sm:$0xff] %v6009_v1  ;;  %v6019_v4 = vmul.f32 %v7773_v63, %v7823_v51  ;;  %v6023_v59 = vmul.f32 %v7775_v14, %v7825_v18  ;;  %v1917_v51 = vadd.s32 104, %v5503_v10  ;;  %vm3569_vm3 = vcmp.lt.s32.totalorder %v3537_v7, 8 }
 0x37c   :  { %7821 = vst [vmem:[#allocation101_spill] sm:$0xff] %v6012_v3  ;;  %7822 = vst [vmem:[#allocation102_spill] sm:$0xff] %v6015_v50  ;;  %v7830_v50 = vld [vmem:[#allocation16_spill] sm:$0xff]  ;;  %v2323_v18 = vadd.s32 4294967294, %v1962_v53  ;;  %v3535_v25 = vadd.s32 2, %v1962_v53  ;;  %vm2670_vm5 = vcmp.ge.s32.totalorder %v2654_v22, 0 }
 0x37d   :  { %7824 = vst [vmem:[#allocation20_spill] sm:$0xff] %v6019_v4  ;;  %7826 = vst [vmem:[#allocation13_spill] sm:$0xff] %v6023_v59  ;;  %v6037_v3 = vmul.f32 %v7777_v28, %v7830_v50  ;;  %v1915_v59 = vadd.s32 88, %v5503_v10  ;;  %v6052_v50 = vmul.f32 %v7781_v8, %v3455_v57  ;;  %v7838_v4 = vld [vmem:[#allocation31_spill] sm:$0xff]  ;;  %v6071_v57 = vsel %vm3569_vm3, 1.0, %v7752_v32  ;;  %v6107_v22 = vld [vmem:[#allocation2 + $0x16] sm:$0xff] }
 0x37e   :  { %7827 = vst [vmem:[#allocation103_spill] sm:$0xff] %v6027_v62  ;;  %7828 = vst [vmem:[#allocation104_spill] sm:$0xff] %v6030_v9  ;;  %v6042_v62 = vsel %vm2672_vm1, 1.0, %v7752_v32  ;;  %v7834_v9 = vld [vmem:[#allocation24_spill] sm:$0xff]  ;;  %v6061_v1 = vmul.f32 %v5960_v20, %v7838_v4  ;;  %v6079_v4 = vmul.f32 %v5551_v41, %v5924_v58  ;;  %vm2339_vm4 = vcmp.ge.s32.totalorder %v2323_v18, 0  ;;  %v7854_v20 = vld [vmem:[#allocation38_spill] sm:$0xff] }
 0x37f   :  { %7829 = vst [vmem:[#allocation105_spill] sm:$0xff] %v6033_v45  ;;  %7831 = vst [vmem:[#allocation16_spill] sm:$0xff] %v6037_v3  ;;  %v6049_v45 = vmul.f32 %v5701_v0, %v7834_v9  ;;  %v6057_v3 = vsel %vm3238_vm2, 1.0, %v7752_v32  ;;  %v6067_v9 = vld [vmem:[#allocation2 + $0x80] sm:$0xff]  ;;  %v1983_v7 = vand.u32 7, %v1915_v59  ;;  %vm3567_vm7 = vcmp.lt.s32.totalorder %v3535_v25, 8 }
 0x380   :  { %7832 = vst [vmem:[#allocation106_spill] sm:$0xff] %v6042_v62  ;;  %7833 = vst [vmem:[#allocation107_spill] sm:$0xff] %v6045_v61  ;;  %v3204_v62 = vadd.s32 1, %v1962_v53  ;;  %v6065_v61 = vld [vmem:[#allocation2 + $0x70] sm:$0xff]  ;;  %v6097_v58 = vmul.f32 %v5548_v48, %v6067_v9  ;;  %v2550_v18 = vmul.f32 %v5572_v26, %v6063_v56  ;;  %v2137_v52 = vmul.f32 %v5543_v47, %v6107_v22 }
 0x381   :  { %7835 = vst [vmem:[#allocation24_spill] sm:$0xff] %v6049_v45  ;;  %7836 = vst [vmem:[#allocation108_spill] sm:$0xff] %v6052_v50  ;;  %v6075_v50 = vmul.f32 %v5546_v43, %v5858_v21  ;;  %v6081_v53 = vld [vmem:[#allocation2 + $0x90] sm:$0xff]  ;;  %v6093_v21 = vmul.f32 %v5533_v60, %v6065_v61  ;;  %v6119_v45 = vld [vmem:[#allocation2 + $0x1f] sm:$0xff]  ;;  %v2326_v30 = vadd.s32 4294967294, %v1983_v7  ;;  %v2657_v5 = vadd.s32 4294967295, %v1983_v7 }
 0x382   :  { %7837 = vst [vmem:[#allocation109_spill] sm:$0xff] %v6057_v3  ;;  %7839 = vst [vmem:[#allocation31_spill] sm:$0xff] %v6061_v1  ;;  %v1997_v1 = vand.u32 7, %v1917_v51  ;;  %v6085_v3 = vmul.f32 %v5543_v47, %v6054_v39  ;;  %v2219_v51 = vmul.f32 %v5556_v54, %v6054_v39  ;;  %vm3236_vm6 = vcmp.lt.s32.totalorder %v3204_v62, 8 }
 0x383   :  { %7840 = vst [vmem:[#allocation110_spill] sm:$0xff] %v6065_v61  ;;  %7841 = vst [vmem:[#allocation111_spill] sm:$0xff] %v6071_v57  ;;  %v6089_v57 = vmul.f32 %v5566_v16, %v6063_v56  ;;  %v6103_v59 = vmul.f32 %v7777_v28, %v6081_v53  ;;  %v6124_v49 = vsel %vm3236_vm6, 1.0, %v7752_v32  ;;  %v6138_v46 = vadd.f32 %v2550_v18, %v5687_v42 }
 0x384   :  { %7842 = vst [vmem:[#allocation112_spill] sm:$0xff] %v6075_v50  ;;  %7843 = vst [vmem:[#allocation113_spill] sm:$0xff] %v6079_v4  ;;  %v6109_v4 = vld [vmem:[#allocation2 + $0x1e] sm:$0xff]  ;;  %v2659_v50 = vadd.s32 4294967295, %v1997_v1  ;;  %v6131_v8 = vadd.f32 %v2219_v51, %v7854_v20  ;;  %v2881_v62 = vmul.f32 %v5548_v48, %v6065_v61  ;;  %v2506_v20 = vmul.f32 %v7786_v19, %v6119_v45  ;;  %v6160_v48 = vld [vmem:[#allocation2 + $0x2e] sm:$0xff] }
 0x385   :  { %7844 = vst [vmem:[#allocation114_spill] sm:$0xff] %v6085_v3  ;;  %7845 = vst [vmem:[#allocation115_spill] sm:$0xff] %v6089_v57  ;;  %v2328_v57 = vadd.s32 4294967294, %v1997_v1  ;;  %v6117_v3 = vld [vmem:[#allocation2 + $0x17] sm:$0xff]  ;;  %v2175_v24 = vmul.f32 %v7784_v33, %v6109_v4  ;;  %vm2342_vm11 = vcmp.ge.s32.totalorder %v2326_v30, 0  ;;  %vm2673_vm12 = vcmp.ge.s32.totalorder %v2657_v5, 0 }
 0x386   :  { %7846 = vst [vmem:[#allocation116_spill] sm:$0xff] %v6093_v21  ;;  %7847 = vst [vmem:[#allocation117_spill] sm:$0xff] %v6097_v58  ;;  %v6112_v21 = vsel %vm2339_vm4, 1.0, %v7752_v32  ;;  %v6115_v58 = vsel %vm2670_vm5, 1.0, %v7752_v32  ;;  %v2468_v25 = vmul.f32 %v5566_v16, %v6117_v3  ;;  %vm2675_vm9 = vcmp.ge.s32.totalorder %v2659_v50, 0 }
 0x387   :  { %7848 = vst [vmem:[#allocation118_spill] sm:$0xff] %v6103_v59  ;;  %7849 = vst [vmem:[#allocation119_spill] sm:$0xff] %v6112_v21  ;;  %v3209_v59 = vadd.s32 1, %v1997_v1  ;;  %v6128_v21 = vsel %vm3567_vm7, 1.0, %v7752_v32  ;;  %vm2344_vm8 = vcmp.ge.s32.totalorder %v2328_v57, 0  ;;  %v6146_v51 = vand.u32 7, %v1918_v36 }
 0x388   :  { %7850 = vst [vmem:[#allocation120_spill] sm:$0xff] %v6115_v58  ;;  %7851 = vst [vmem:[#allocation121_spill] sm:$0xff] %v6117_v3  ;;  %v3540_v58 = vadd.s32 2, %v1997_v1  ;;  %v3336_v1 = vld [vmem:[#allocation2 + $0x6a] sm:$0xff]  ;;  %v3207_v18 = vadd.s32 1, %v1983_v7  ;;  %v6152_v61 = vsel %vm2344_vm8, 1.0, %v7752_v32  ;;  %v6158_v50 = vadd.f32 %v2881_v62, %v5689_v6 }
 0x389   :  { %7852 = vst [vmem:[#allocation122_spill] sm:$0xff] %v6124_v49  ;;  %7853 = vst [vmem:[#allocation123_spill] sm:$0xff] %v6128_v21  ;;  %v3005_v49 = vld [vmem:[#allocation2 + $0x69] sm:$0xff]  ;;  %vm3241_vm10 = vcmp.lt.s32.totalorder %v3209_v59, 8  ;;  %v3538_v21 = vadd.s32 2, %v1983_v7  ;;  %v6155_v57 = vsel %vm2675_vm9, 1.0, %v7752_v32  ;;  %v2522_v36 = vadd.f32 %v2506_v20, %v2468_v25 }
 0x38a   :  { %7855 = vst [vmem:[#allocation38_spill] sm:$0xff] %v6131_v8  ;;  %7856 = vst [vmem:[#allocation124_spill] sm:$0xff] %v6138_v46  ;;  %vm3572_vm13 = vcmp.lt.s32.totalorder %v3540_v58, 8  ;;  %v3062_v42 = vmul.f32 %v7770_v40, %v3005_v49  ;;  %v2191_v46 = vadd.f32 %v2175_v24, %v2137_v52  ;;  %v6149_v8 = vld [vmem:[#allocation2 + $0x18] sm:$0xff]  ;;  %v6164_v49 = vsel %vm3241_vm10, 1.0, %v7752_v32  ;;  %v6171_v7 = vld [vmem:[#allocation2 + $0x2f] sm:$0xff] }
 0x38b   :  { %7857 = vst [vmem:[#allocation125_spill] sm:$0xff] %v6146_v51  ;;  %7858 = vst [vmem:[#allocation126_spill] sm:$0xff] %v6149_v8  ;;  %v6168_v24 = vsel %vm2342_vm11, 1.0, %v7752_v32  ;;  %v3393_v52 = vmul.f32 %v7771_v35, %v3336_v1  ;;  %v6174_v58 = vsel %vm3572_vm13, 1.0, %v7752_v32  ;;  %v6178_v6 = vsel %vm2673_vm12, 1.0, %v7752_v32  ;;  %v7869_v25 = vld [vmem:[#allocation34_spill] sm:$0xff] }
 0x38c   :  { %7859 = vst [vmem:[#allocation127_spill] sm:$0xff] %v6152_v61  ;;  %7860 = vst [vmem:[#allocation128_spill] sm:$0xff] %v6155_v57  ;;  %v6182_v59 = vmul.f32 %v7777_v28, %v6067_v9  ;;  %v2329_v62 = vadd.s32 4294967294, %v6146_v51  ;;  %v2799_v30 = vmul.f32 %v5533_v60, %v6149_v8  ;;  %v6188_v20 = vadd.f32 %v3062_v42, %v7869_v25  ;;  %v6200_v42 = vld [vmem:[#allocation2 + $0x19] sm:$0xff]  ;;  %v6215_v57 = vld [vmem:[#allocation2 + $0x29] sm:$0xff] }
 0x38d   :  { %7861 = vst [vmem:[#allocation129_spill] sm:$0xff] %v6158_v50  ;;  %7862 = vst [vmem:[#allocation130_spill] sm:$0xff] %v6160_v48  ;;  %vm3239_vm14 = vcmp.lt.s32.totalorder %v3207_v18, 8  ;;  %vm3570_vm15 = vcmp.lt.s32.totalorder %v3538_v21, 8  ;;  %v2229_v1 = vadd.f32 %v5852_v23, %v2191_v46  ;;  %v2251_v5 = vmul.f32 %v7792_v37, %v6160_v48  ;;  %v7873_v18 = vld [vmem:[#allocation36_spill] sm:$0xff]  ;;  %v7875_v46 = vld [vmem:[#allocation37_spill] sm:$0xff] }
 0x38e   :  { %7863 = vst [vmem:[#allocation131_spill] sm:$0xff] %v6164_v49  ;;  %7864 = vst [vmem:[#allocation132_spill] sm:$0xff] %v6168_v24  ;;  %v2560_v50 = vadd.f32 %v5856_v34, %v2522_v36  ;;  %v6203_v25 = vadd.f32 %v3393_v52, %v7873_v18  ;;  %v1916_v23 = vadd.s32 96, %v5503_v10  ;;  %v7876_v24 = vld [vmem:[#allocation35_spill] sm:$0xff]  ;;  %vm2345_vm1 = vcmp.ge.s32.totalorder %v2329_v62, 0  ;;  %v6212_v34 = vld [vmem:[#allocation2 + $0x36] sm:$0xff] }
 0x38f   :  { %7865 = vst [vmem:[#allocation133_spill] sm:$0xff] %v6171_v7  ;;  %7866 = vst [vmem:[#allocation134_spill] sm:$0xff] %v6174_v58  ;;  %v7871_v58 = vld [vmem:[#allocation22_spill] sm:$0xff]  ;;  %v2853_v36 = vadd.f32 %v5818_v15, %v2799_v30  ;;  %v6219_v52 = vsel %vm3570_vm15, 1.0, %v7752_v32  ;;  %v6223_v18 = vmul.f32 %v5546_v43, %v6067_v9  ;;  %v2267_v10 = vadd.f32 %v2251_v5, %v2229_v1  ;;  %v7885_v21 = vld [vmem:[#allocation32_spill] sm:$0xff] }
 0x390   :  { %7867 = vst [vmem:[#allocation135_spill] sm:$0xff] %v6178_v6  ;;  %7868 = vst [vmem:[#allocation136_spill] sm:$0xff] %v6182_v59  ;;  %v2144_v49 = vmul.f32 %v5543_v47, %v7871_v58  ;;  %v2182_v59 = vmul.f32 %v7784_v33, %v6054_v39  ;;  %v2582_v6 = vmul.f32 %v7794_v17, %v6171_v7  ;;  %v6209_v58 = vsel %vm3239_vm14, 1.0, %v7752_v32  ;;  %v6239_v9 = vld [vmem:[#allocation2 + $0x1a] sm:$0xff] }
 0x391   :  { %7870 = vst [vmem:[#allocation34_spill] sm:$0xff] %v6188_v20  ;;  %7872 = vst [vmem:[#allocation22_spill] sm:$0xff] %v6200_v42  ;;  %v2660_v39 = vadd.s32 4294967295, %v6146_v51  ;;  %v6227_v20 = vmul.f32 %v5551_v41, %v6081_v53  ;;  %v3018_v15 = vmul.f32 %v5589_v31, %v6200_v42  ;;  %v6245_v53 = vsel %vm2345_vm1, 1.0, %v7752_v32  ;;  %v6268_v31 = vld [vmem:[#allocation2 + $0x39] sm:$0xff] }
 0x392   :  { %7874 = vst [vmem:[#allocation36_spill] sm:$0xff] %v6203_v25  ;;  %7877 = vst [vmem:[#allocation37_spill] sm:$0xff] %v6209_v58  ;;  %v6229_v58 = vld [vmem:[#allocation2 + $0x37] sm:$0xff]  ;;  %v6235_v30 = vadd.f32 %v2182_v59, %v2144_v49  ;;  %v2598_v61 = vadd.f32 %v2582_v6, %v2560_v50  ;;  %v6247_v1 = vand.u32 7, %v1916_v23  ;;  %v2513_v5 = vmul.f32 %v7786_v19, %v6063_v56 }
 0x393   :  { %7878 = vst [vmem:[#allocation35_spill] sm:$0xff] %v6212_v34  ;;  %7879 = vst [vmem:[#allocation137_spill] sm:$0xff] %v6219_v52  ;;  %v6231_v25 = vld [vmem:[#allocation2 + $0x30] sm:$0xff]  ;;  %v2475_v52 = vmul.f32 %v5566_v16, %v7885_v21  ;;  %v2288_v49 = vmul.f32 %v7773_v63, %v6212_v34  ;;  %v3094_v50 = vmul.f32 %v7798_v29, %v6215_v57  ;;  %vm2676_vm2 = vcmp.ge.s32.totalorder %v2660_v39, 0  ;;  %v7891_v19 = vld [vmem:[#allocation33_spill] sm:$0xff] }
 0x394   :  { %7880 = vst [vmem:[#allocation138_spill] sm:$0xff] %v6223_v18  ;;  %7881 = vst [vmem:[#allocation139_spill] sm:$0xff] %v6227_v20  ;;  %v6241_v18 = vld [vmem:[#allocation2 + $0x11] sm:$0xff]  ;;  %v2211_v6 = vmul.f32 %v5556_v54, %v6107_v22  ;;  %v2619_v59 = vmul.f32 %v7775_v14, %v6229_v58  ;;  %v2891_v62 = vadd.f32 %v5862_v12, %v2853_v36 }
 0x395   :  { %7882 = vst [vmem:[#allocation140_spill] sm:$0xff] %v6229_v58  ;;  %7883 = vst [vmem:[#allocation141_spill] sm:$0xff] %v6231_v25  ;;  %v4097_v20 = vpop.f32.mrf.mxu0  ;;  %v2913_v23 = vmul.f32 %v5551_v41, %v6231_v25  ;;  %v6262_v56 = vld [vmem:[#allocation2 + $0x31] sm:$0xff]  ;;  %v3072_v39 = vadd.f32 %v5865_v44, %v3018_v15  ;;  %v3349_v51 = vmul.f32 %v5604_v38, %v6239_v9  ;;  %v6276_v41 = vsel %vm2676_vm2, 1.0, %v7752_v32  ;;  %v7894_v32 = vld [vmem:[#allocation39_spill] sm:$0xff] }
 0x396   :  { %7884 = vst [vmem:[#allocation142_spill] sm:$0xff] %v6235_v30  ;;  %7886 = vst [vmem:[#allocation32_spill] sm:$0xff] %v6241_v18  ;;  %v6264_v21 = vld [vmem:[#allocation2 + $0x2a] sm:$0xff]  ;;  %v3054_v12 = vmul.f32 %v7770_v40, %v6241_v18  ;;  %v2635_v36 = vadd.f32 %v2619_v59, %v2598_v61  ;;  %v6278_v28 = vadd.f32 %v2513_v5, %v2475_v52 }
 0x397   :  { %7887 = vst [vmem:[#allocation143_spill] sm:$0xff] %v6245_v53  ;;  %7888 = vst [vmem:[#allocation144_spill] sm:$0xff] %v6247_v1  ;;  %v2542_v1 = vmul.f32 %v5572_v26, %v6117_v3  ;;  %v1552_v30 = vpop.f32.mrf.mxu0  ;;  %v2304_v53 = vadd.f32 %v2288_v49, %v2267_v10  ;;  %v6282_v3 = vmul.f32 %v5533_v60, %v7891_v19  ;;  %v6297_v60 = vld [vmem:[#allocation2 + $0x12] sm:$0xff] }
 0x398   :  { %7889 = vst [vmem:[#allocation145_spill] sm:$0xff] %v6276_v41  ;;  %7890 = vst [vmem:[#allocation146_spill] sm:$0xff] %v6278_v28  ;;  %v3110_v49 = vadd.f32 %v3094_v50, %v3072_v39  ;;  %v3132_v44 = vmul.f32 %v7779_v13, %v6262_v56  ;;  %v3425_v15 = vmul.f32 %v7800_v2, %v6264_v21 }
 0x399   :  { %7892 = vst [vmem:[#allocation33_spill] sm:$0xff] %v6282_v3  ;;  %v4098_v10 = vpop.f32.mrf.mxu0  ;;  %v2227_v38 = vadd.f32 %v2211_v6, %v5685_v11  ;;  %v2929_v59 = vadd.f32 %v2913_v23, %v2891_v62  ;;  %v3169_v52 = vmul.f32 %v5701_v0, %v6268_v31  ;;  %v2558_v5 = vadd.f32 %v2542_v1, %v5707_v55  ;;  %v7893_v3 = vld [vmem:[#allocation19_spill] sm:$0xff]  ;;  %v7896_v62 = vld [vmem:[#allocation48_spill] sm:$0xff] }
 0x39a   :  { %v1568_v61 = vpack.c.bf16 %v4098_v10, %v4097_v20  ;;  %v2416_v19 = vmul.f32 %v5748_v27, %v2304_v53  ;;  %v3403_v50 = vadd.f32 %v7893_v3, %v3349_v51  ;;  %v2249_v39 = vmul.f32 %v7792_v37, %v6109_v4  ;;  %7895 = vst [vmem:[#allocation19_spill] sm:$0xff] %v6297_v60  ;;  %v4460_v11 = vld [vmem:[%s7416_s7 + $0x8] sm:$0xff]   ;;  %v6303_v1 = vld [vmem:[#allocation2 + $0x32] sm:$0xff]  ;;  %v6307_v51 = vld [vmem:[#allocation2 + $0x3a] sm:$0xff] }
 0x39b   :  { %v1555_v28 = vpop.f32.mrf.mxu0  ;;  %v3070_v41 = vadd.f32 %v3054_v12, %v7894_v32  ;;  %v2747_v55 = vmul.f32 %v7896_v62, %v2635_v36  ;;  %v2580_v27 = vmul.f32 %v7794_v17, %v6119_v45  ;;  %v3148_v3 = vadd.f32 %v3132_v44, %v3110_v49  ;;  %7897 = vst [vmem:[#allocation39_spill] sm:$0xff] %v6307_v51  ;;  %v4461_v12 = vld [vmem:[%s7416_s7] sm:$0xff]  }
 0x39c   :  { %v1570_v20 = vmul.bf16 %v4460_v11, %v1568_v61  ;;  %v1567_v6 = vpack.c.bf16 %v1555_v28, %v1552_v30  ;;  %v3441_v53 = vadd.f32 %v3425_v15, %v3403_v50  ;;  %v2265_v32 = vadd.f32 %v2249_v39, %v2227_v38  ;;  %v7898_v49 = vld [vmem:[#allocation30_spill] sm:$0xff] }
 0x39d   :  { %v3092_v23 = vmul.f32 %v7798_v29, %v6200_v42  ;;  %v2596_v30 = vadd.f32 %v2580_v27, %v2558_v5  ;;  %v3385_v36 = vmul.f32 %v7771_v35, %v6297_v60  ;;  %v2138_v10 = vmul.f32 %v5543_v47, %v6109_v4  ;;  %v7899_v44 = vld [vmem:[#allocation10_spill] sm:$0xff]  ;;  %v7903_v27 = vld [vmem:[#allocation69_spill] sm:$0xff]  ;;  %v7906_v42 = vld [vmem:[#allocation40_spill] sm:$0xff] }
 0x39e   :  { %v1569_v28 = vmul.bf16 %v4461_v12, %v1567_v6  ;;  %4099 = vmatprep.subr.bf16.mxu1 %v1570_v20  ;;  %v3463_v38 = vmul.f32 %v7898_v49, %v6303_v1  ;;  %v2873_v15 = vmul.f32 %v7899_v44, %v6149_v8  ;;  %v2469_v50 = vmul.f32 %v5566_v16, %v6119_v45  ;;  %v7900_v5 = vld [vmem:[#allocation86_spill] sm:$0xff] }
 0x39f   :  { %4100 = vmatpush3.bf16.msra.mxu1 %v1570_v20  ;;  %v3108_v61 = vadd.f32 %v3092_v23, %v3070_v41  ;;  %v2763_v39 = vadd.f32 %v2747_v55, %v2416_v19  ;;  %v3500_v11 = vmul.f32 %v7900_v5, %v6307_v51  ;;  %v2214_v6 = vmul.f32 %v5556_v54, %v6160_v48  ;;  %v7901_v62 = vld [vmem:[#allocation110_spill] sm:$0xff]  ;;  %v7904_v23 = vld [vmem:[#allocation64_spill] sm:$0xff]  ;;  %v7905_v19 = vld [vmem:[#allocation65_spill] sm:$0xff] }
 0x3a0   :  { %4101 = vmatprep.subr.bf16.mxu1 %v1569_v28  ;;  %v6330_v20 = vmul.f32 %v5546_v43, %v7901_v62  ;;  %v2966_v12 = vadd.f32 %v7903_v27, %v2929_v59  ;;  %v3185_v60 = vadd.f32 %v3169_v52, %v3148_v3  ;;  %v3479_v47 = vadd.f32 %v3463_v38, %v3441_v53  ;;  %v7907_v49 = vld [vmem:[#allocation70_spill] sm:$0xff]  ;;  %v7909_v62 = vld [vmem:[#allocation67_spill] sm:$0xff]  ;;  %v7911_v3 = vld [vmem:[#allocation45_spill] sm:$0xff] }
 0x3a1   :  { %v2545_v41 = vmul.f32 %v5572_v26, %v6171_v7  ;;  %v2302_v16 = vadd.f32 %v7904_v23, %v2265_v32  ;;  %v2633_v55 = vadd.f32 %v7905_v19, %v2596_v30  ;;  %v3401_v18 = vadd.f32 %v3385_v36, %v7906_v42  ;;  %v7908_v48 = vld [vmem:[#allocation42_spill] sm:$0xff]  ;;  %v7910_v43 = vld [vmem:[#allocation71_spill] sm:$0xff]  ;;  %v7920_v23 = vld [vmem:[#allocation73_spill] sm:$0xff] }
 0x3a2   :  { %7902 = vst [vmem:[#allocation48_spill] sm:$0xff] %v6330_v20  ;;  %v2192_v51 = vadd.f32 %v7907_v49, %v2138_v10  ;;  %v2889_v8 = vadd.f32 %v2873_v15, %v7908_v48  ;;  %v3146_v20 = vadd.f32 %v7909_v62, %v3108_v61  ;;  %v2523_v59 = vadd.f32 %v7910_v43, %v2469_v50  ;;  %v7912_v53 = vld [vmem:[#allocation43_spill] sm:$0xff]  ;;  %v7913_v36 = vld [vmem:[#allocation50_spill] sm:$0xff]  ;;  %v7917_v50 = vld [vmem:[#allocation49_spill] sm:$0xff] }
 0x3a3   :  { %4102 = vmatpush3.bf16.msra.mxu1 %v1569_v28  ;;  %v3057_v52 = vmul.f32 %v7770_v40, %v6215_v57  ;;  %v1573_v38 = vpack.c.bf16 %v7912_v53, %v7911_v3  ;;  %v2982_v32 = vadd.f32 %v2966_v12, %v2763_v39  ;;  %v3423_v30 = vmul.f32 %v7800_v2, %v6239_v9  ;;  %v6351_v49 = vld [vmem:[#allocation2 + $0x3e] sm:$0xff]  ;;  %v7918_v27 = vld [vmem:[#allocation51_spill] sm:$0xff] }
 0x3a4   :  { %v2230_v42 = vadd.f32 %v2214_v6, %v2192_v51  ;;  %v3297_v10 = vmul.f32 %v7913_v36, %v3185_v60  ;;  %v3516_v28 = vadd.f32 %v3500_v11, %v3479_v47  ;;  %v3167_v48 = vmul.f32 %v5701_v0, %v6215_v57  ;;  %7914 = vst [vmem:[#allocation110_spill] sm:$0xff] %v6351_v49  ;;  %v6353_v43 = vld [vmem:[#allocation2 + $0x3f] sm:$0xff]  ;;  %v7923_v3 = vld [vmem:[#allocation47_spill] sm:$0xff]  ;;  %v7926_v36 = vld [vmem:[#allocation68_spill] sm:$0xff] }
 0x3a5   :  { %7915 = vst [vmem:[#allocation69_spill] sm:$0xff] %v6353_v43  ;;  %v2561_v15 = vadd.f32 %v2545_v41, %v2523_v59  ;;  %v7916_v61 = vpack.c.bf16 %v7876_v24, %v7875_v46  ;;  %v2414_v39 = vmul.f32 %v7917_v50, %v2302_v16  ;;  %v2745_v51 = vmul.f32 %v7918_v27, %v2633_v55  ;;  %v7919_v47 = vld [vmem:[#allocation57_spill] sm:$0xff]  ;;  %v7922_v59 = vld [vmem:[#allocation3_spill] sm:$0xff]  ;;  %v7924_v53 = vld [vmem:[#allocation46_spill] sm:$0xff] }
 0x3a6   :  { %v3439_v6 = vadd.f32 %v3423_v30, %v3401_v18  ;;  %v2252_v60 = vmul.f32 %v7792_v37, %v6212_v34  ;;  %v2927_v11 = vadd.f32 %v7919_v47, %v2889_v8  ;;  %v3183_v12 = vadd.f32 %v3167_v48, %v3146_v20  ;;  %v7921_v62 = vld [vmem:[#allocation121_spill] sm:$0xff]  ;;  %v7929_v47 = vld [vmem:[#allocation66_spill] sm:$0xff] }
 0x3a7   :  { %4104 = vmatmul.mubr.msk.bf16.vlgmr.msra.gmra.mxu1 %vm115_vm0, %v7916_v61  ;;  %v2583_v41 = vmul.f32 %v7794_v17, %v6229_v58  ;;  %v3073_v24 = vadd.f32 %v3057_v52, %v7920_v23  ;;  %v2289_v16 = vmul.f32 %v7773_v63, %v6351_v49  ;;  %v2620_v18 = vmul.f32 %v7775_v14, %v6353_v43  ;;  %v7927_v61 = vld [vmem:[#allocation53_spill] sm:$0xff] }
 0x3a8   :  { %4107 = vmatprep.mubr.msk.bf16.mxu1 %vm115_vm0, %v1573_v38  ;;  %v2268_v46 = vadd.f32 %v2252_v60, %v2230_v42  ;;  %v2876_v19 = vmul.f32 %v7899_v44, %v6231_v25  ;;  %v3095_v8 = vmul.f32 %v7798_v29, %v6262_v56  ;;  %v2174_v20 = vmul.f32 %v7784_v33, %v6107_v22 }
 0x3a9   :  { %v2599_v55 = vadd.f32 %v2583_v41, %v2561_v15  ;;  %v2505_v52 = vmul.f32 %v7922_v59, %v7921_v62  ;;  %v1574_v38 = vpack.c.bf16 %v7924_v53, %v7923_v3  ;;  %v6382_v30 = vadd.f32 %v3297_v10, %v2982_v32  ;;  %v6388_v15 = vld [vmem:[#allocation2 + $0x40] sm:$0xff]  ;;  %v7933_v62 = vld [vmem:[#allocation44_spill] sm:$0xff]  ;;  %v7934_v53 = vld [vmem:[#allocation55_spill] sm:$0xff] }
 0x3aa   :  { %v2761_v42 = vadd.f32 %v2745_v51, %v2414_v39  ;;  %v3477_v48 = vadd.f32 %v7926_v36, %v3439_v6  ;;  %v6386_v50 = vmul.f32 %v7927_v61, %v3516_v28  ;;  %v3111_v27 = vadd.f32 %v3095_v8, %v3073_v24  ;;  %v7930_v39 = vld [vmem:[#allocation79_spill] sm:$0xff]  ;;  %v7931_v6 = vld [vmem:[#allocation52_spill] sm:$0xff] }
 0x3ab   :  { %7925 = vst [vmem:[#allocation64_spill] sm:$0xff] %v6382_v30  ;;  %v3133_v22 = vmul.f32 %v7779_v13, %v6268_v31  ;;  %v3388_v60 = vmul.f32 %v7771_v35, %v6264_v21  ;;  %v2964_v41 = vadd.f32 %v7929_v47, %v2927_v11  ;;  %v3498_v32 = vmul.f32 %v7900_v5, %v6264_v21  ;;  %v4168_v28 = vld [vmem:[%s7418_s3 + $0x8] sm:$0xff]  }
 0x3ac   :  { %7928 = vst [vmem:[#allocation65_spill] sm:$0xff] %v6386_v50  ;;  %v2305_v10 = vadd.f32 %v2289_v16, %v2268_v46  ;;  %v2892_v51 = vadd.f32 %v2876_v19, %v7930_v39  ;;  %v3295_v23 = vmul.f32 %v7931_v6, %v3183_v12  ;;  %v2636_v24 = vadd.f32 %v2620_v18, %v2599_v55  ;;  %v6402_v8 = vld [vmem:[#allocation2 + $0x41] sm:$0xff]  ;;  %v7937_v19 = vld [vmem:[#allocation125_spill] sm:$0xff]  ;;  %v7956_v50 = vld [vmem:[#allocation56_spill] sm:$0xff] }
 0x3ad   :  { %7932 = vst [vmem:[#allocation40_spill] sm:$0xff] %v6402_v8  ;;  %v2190_v3 = vadd.f32 %v2174_v20, %v7933_v62  ;;  %v2521_v36 = vadd.f32 %v2505_v52, %v7934_v53  ;;  %v2980_v11 = vadd.f32 %v2964_v41, %v2761_v42  ;;  %v6407_v61 = vadd.f32 %v3498_v32, %v3477_v48  ;;  %v7936_v46 = vld [vmem:[#allocation15_spill] sm:$0xff]  ;;  %v7939_v18 = vld [vmem:[#allocation74_spill] sm:$0xff]  ;;  %v7941_v48 = vld [vmem:[#allocation72_spill] sm:$0xff] }
 0x3ae   :  { %v2951_v16 = vmul.f32 %v7936_v46, %v6388_v15  ;;  %4131 = vmatprep.subr.bf16.mxu1 %v4168_v28  ;;  %v6412_v47 = vadd.s32 1, %v7937_v19  ;;  %v3149_v12 = vadd.f32 %v3133_v22, %v3111_v27  ;;  %v3404_v55 = vadd.f32 %v3388_v60, %v7939_v18  ;;  %v7942_v27 = vld [vmem:[#allocation60_spill] sm:$0xff]  ;;  %v6426_v60 = vld [vmem:[#allocation2 + $0x42] sm:$0xff] }
 0x3af   :  { %4108 = vmatmul.mubr.msk.bf16.gmra.mxu1 %vm115_vm0, %v1574_v38  ;;  %7935 = vst [vmem:[#allocation70_spill] sm:$0xff] %v6407_v61  ;;  %v2212_v20 = vmul.f32 %v5556_v54, %v6109_v4  ;;  %v2543_v52 = vmul.f32 %v5572_v26, %v6119_v45  ;;  %v7940_v38 = vld [vmem:[#allocation59_spill] sm:$0xff]  ;;  %v2930_v41 = vadd.f32 %v7941_v48, %v2892_v51  ;;  %7943 = vst [vmem:[#allocation67_spill] sm:$0xff] %v6426_v60  ;;  %v7944_v62 = vld [vmem:[#allocation126_spill] sm:$0xff] }
 0x3b0   :  { %7938 = vst [vmem:[#allocation42_spill] sm:$0xff] %v6412_v47  ;;  %4132 = vmatpush3.bf16.msra.mxu1 %v4168_v28  ;;  %v2417_v42 = vmul.f32 %v7940_v38, %v2305_v10  ;;  %v3170_v32 = vmul.f32 %v5701_v0, %v6402_v8  ;;  %v3426_v39 = vmul.f32 %v7800_v2, %v6303_v1  ;;  %v7945_v53 = vld [vmem:[#allocation27_spill] sm:$0xff]  ;;  %v4169_v10 = vld [vmem:[%s7418_s3] sm:$0xff]  }
 0x3b1   :  { %v2748_v22 = vmul.f32 %v7942_v27, %v2636_v24  ;;  %v2228_v6 = vadd.f32 %v2212_v20, %v2190_v3  ;;  %v2559_v4 = vadd.f32 %v2543_v52, %v2521_v36  ;;  %v2836_v45 = vmul.f32 %v7945_v53, %v7944_v62  ;;  %v7947_v28 = vld [vmem:[#allocation39_spill] sm:$0xff]  ;;  %v7948_v18 = vld [vmem:[#allocation30_spill] sm:$0xff]  ;;  %v7949_v20 = vld [vmem:[#allocation32_spill] sm:$0xff]  ;;  %4133 = vmatprep.subr.bf16.mxu1 %v4169_v10 }
 0x3b2   :  { %v6433_v51 = vadd.f32 %v3295_v23, %v2980_v11  ;;  %v3464_v38 = vmul.f32 %v7948_v18, %v7947_v28  ;;  %v2179_v48 = vmul.f32 %v7784_v33, %v6351_v49  ;;  %v2510_v24 = vmul.f32 %v7922_v59, %v6353_v43  ;;  %v7950_v52 = vld [vmem:[#allocation14_spill] sm:$0xff] }
 0x3b3   :  { %v3186_v3 = vadd.f32 %v3170_v32, %v3149_v12  ;;  %v3442_v36 = vadd.f32 %v3426_v39, %v3404_v55  ;;  %v3017_v27 = vmul.f32 %v7950_v52, %v7949_v20  ;;  %v7951_v62 = vld [vmem:[#allocation22_spill] sm:$0xff]  ;;  %v2967_v23 = vadd.f32 %v2951_v16, %v2930_v41  ;;  %v7954_v55 = vld [vmem:[#allocation76_spill] sm:$0xff]  ;;  %v7955_v39 = vld [vmem:[#allocation77_spill] sm:$0xff] }
 0x3b4   :  { %7946 = vst [vmem:[#allocation71_spill] sm:$0xff] %v6433_v51  ;;  %v3055_v19 = vmul.f32 %v7770_v40, %v7951_v62  ;;  %v3501_v11 = vmul.f32 %v7900_v5, %v6426_v60  ;;  %v7952_v47 = vld [vmem:[#allocation26_spill] sm:$0xff]  ;;  %v7953_v51 = vld [vmem:[#allocation23_spill] sm:$0xff]  ;;  %4134 = vmatpush3.bf16.msra.mxu1 %v4169_v10  ;;  %v2764_v12 = vadd.f32 %v2748_v22, %v2417_v42  ;;  %v7960_v10 = vld [vmem:[#allocation61_spill] sm:$0xff] }
 0x3b5   :  { %v2141_v44 = vmul.f32 %v7952_v47, %v6212_v34  ;;  %v2472_v61 = vmul.f32 %v7953_v51, %v6229_v58  ;;  %v2266_v32 = vadd.f32 %v7954_v55, %v2228_v6  ;;  %v2597_v20 = vadd.f32 %v7955_v39, %v2559_v4  ;;  %v6454_v62 = vld [vmem:[#allocation2 + $0x46] sm:$0xff] }
 0x3b6   :  { %v2852_v30 = vadd.f32 %v2836_v45, %v7956_v50  ;;  %7957 = vst [vmem:[#allocation45_spill] sm:$0xff] %v6454_v62  ;;  %v6456_v16 = vld [vmem:[#allocation2 + $0x47] sm:$0xff]  ;;  %v2618_v47 = vmul.f32 %v7775_v14, %v6171_v7  ;;  %v3298_v42 = vmul.f32 %v7960_v10, %v3186_v3  ;;  %v3480_v22 = vadd.f32 %v3464_v38, %v3442_v36  ;;  %v6467_v45 = vld [vmem:[#allocation2 + $0x4f] sm:$0xff] }
 0x3b7   :  { %7958 = vst [vmem:[#allocation43_spill] sm:$0xff] %v6456_v16  ;;  %v7959_v41 = vld [vmem:[#allocation130_spill] sm:$0xff]  ;;  %v2195_v49 = vadd.f32 %v2179_v48, %v2141_v44  ;;  %v2526_v51 = vadd.f32 %v2510_v24, %v2472_v61  ;;  %v2949_v6 = vmul.f32 %v7936_v46, %v6231_v25  ;;  %v3071_v4 = vadd.f32 %v3055_v19, %v3017_v27  ;;  %v6465_v50 = vld [vmem:[#allocation2 + $0x4e] sm:$0xff] }
 0x3b8   :  { %v2287_v43 = vmul.f32 %v7773_v63, %v7959_v41  ;;  %7961 = vst [vmem:[#allocation50_spill] sm:$0xff] %v6467_v45  ;;  %v7962_v55 = vld [vmem:[#allocation19_spill] sm:$0xff]  ;;  %v3386_v34 = vmul.f32 %v7771_v35, %v6239_v9  ;;  %v2217_v44 = vmul.f32 %v5556_v54, %v6454_v62  ;;  %v2548_v61 = vmul.f32 %v5572_v26, %v6456_v16  ;;  %v7966_v46 = vld [vmem:[#allocation80_spill] sm:$0xff] }
 0x3b9   :  { %v7963_v39 = vld [vmem:[#allocation11_spill] sm:$0xff]  ;;  %v2983_v38 = vadd.f32 %v2967_v23, %v2764_v12  ;;  %v2634_v24 = vadd.f32 %v2618_v47, %v2597_v20  ;;  %v2255_v27 = vmul.f32 %v7792_v37, %v6465_v50  ;;  %v3109_v62 = vadd.f32 %v7966_v46, %v3071_v4  ;;  %v7967_v12 = vld [vmem:[#allocation58_spill] sm:$0xff] }
 0x3ba   :  { %v3348_v58 = vmul.f32 %v7963_v39, %v7962_v55  ;;  %v2303_v48 = vadd.f32 %v2287_v43, %v2266_v32  ;;  %v7964_v19 = vld [vmem:[#allocation63_spill] sm:$0xff]  ;;  %v2233_v36 = vadd.f32 %v2217_v44, %v2195_v49  ;;  %v2564_v10 = vadd.f32 %v2548_v61, %v2526_v51  ;;  %v7968_v46 = vld [vmem:[#allocation62_spill] sm:$0xff]  ;;  %v6498_v61 = vld [vmem:[#allocation2 + $0x56] sm:$0xff] }
 0x3bb   :  { %v2890_v3 = vadd.f32 %v7964_v19, %v2852_v30  ;;  %v2586_v55 = vmul.f32 %v7794_v17, %v6467_v45  ;;  %v6482_v9 = vld [vmem:[#allocation2 + $0x49] sm:$0xff]  ;;  %v3131_v16 = vmul.f32 %v7779_v13, %v6215_v57  ;;  %v3022_v43 = vmul.f32 %v7950_v52, %v6268_v31  ;;  %v7969_v4 = vld [vmem:[#allocation78_spill] sm:$0xff]  ;;  %7970 = vst [vmem:[#allocation51_spill] sm:$0xff] %v6498_v61  ;;  %v6500_v19 = vld [vmem:[#allocation2 + $0x57] sm:$0xff] }
 0x3bc   :  { %7965 = vst [vmem:[#allocation49_spill] sm:$0xff] %v6482_v9  ;;  %v3060_v49 = vmul.f32 %v7770_v40, %v6402_v8  ;;  %v3517_v30 = vadd.f32 %v3501_v11, %v3480_v22  ;;  %v3168_v47 = vmul.f32 %v5701_v0, %v6262_v56  ;;  %v3402_v51 = vadd.f32 %v3386_v34, %v3348_v58 }
 0x3bd   :  { %v2841_v23 = vmul.f32 %v7945_v53, %v6388_v15  ;;  %v2415_v32 = vmul.f32 %v7967_v12, %v2303_v48  ;;  %v2746_v20 = vmul.f32 %v7968_v46, %v2634_v24  ;;  %v2928_v44 = vadd.f32 %v7969_v4, %v2890_v3  ;;  %7971 = vst [vmem:[#allocation57_spill] sm:$0xff] %v6500_v19  ;;  %v7972_v3 = vld [vmem:[#allocation81_spill] sm:$0xff] }
 0x3be   :  { %v3098_v11 = vmul.f32 %v7798_v29, %v6482_v9  ;;  %v3314_v22 = vadd.f32 %v3298_v42, %v2983_v38  ;;  %v3462_v58 = vmul.f32 %v7948_v18, %v6264_v21  ;;  %v2271_v34 = vadd.f32 %v2255_v27, %v2233_v36  ;;  %v7973_v38 = vld [vmem:[#allocation83_spill] sm:$0xff]  ;;  %v6516_v36 = vld [vmem:[#allocation2 + $0x51] sm:$0xff] }
 0x3bf   :  { %v2602_v0 = vadd.f32 %v2586_v55, %v2564_v10  ;;  %v3147_v8 = vadd.f32 %v3131_v16, %v3109_v62  ;;  %v3076_v45 = vadd.f32 %v3060_v49, %v3022_v43  ;;  %v2177_v48 = vmul.f32 %v7784_v33, %v7959_v41  ;;  %7974 = vst [vmem:[#allocation73_spill] sm:$0xff] %v6516_v36  ;;  %v6520_v10 = vld [vmem:[#allocation2 + $0x50] sm:$0xff] }
 0x3c0   :  { %v2508_v24 = vmul.f32 %v7922_v59, %v6171_v7  ;;  %v3440_v12 = vadd.f32 %v7972_v3, %v3402_v51  ;;  %v2292_v46 = vmul.f32 %v7773_v63, %v6498_v61  ;;  %v2623_v42 = vmul.f32 %v7775_v14, %v6500_v19  ;;  %7975 = vst [vmem:[#allocation121_spill] sm:$0xff] %v6520_v10  ;;  %v6522_v43 = vld [vmem:[#allocation2 + $0x4a] sm:$0xff] }
 0x3c1   :  { %v2857_v4 = vadd.f32 %v2841_v23, %v7973_v38  ;;  %v2762_v62 = vadd.f32 %v2746_v20, %v2415_v32  ;;  %v2965_v16 = vadd.f32 %v2949_v6, %v2928_v44  ;;  %v3499_v27 = vmul.f32 %v7900_v5, %v6303_v1  ;;  %7976 = vst [vmem:[#allocation47_spill] sm:$0xff] %v6522_v43  ;;  %v7977_v32 = vld [vmem:[#allocation90_spill] sm:$0xff]  ;;  %v7978_v44 = vld [vmem:[#allocation91_spill] sm:$0xff] }
 0x3c2   :  { %v3114_v55 = vadd.f32 %v3098_v11, %v3076_v45  ;;  %v2308_v49 = vadd.f32 %v2292_v46, %v2271_v34  ;;  %v2639_v51 = vadd.f32 %v2623_v42, %v2602_v0  ;;  %v3353_v3 = vmul.f32 %v7963_v39, %v7947_v28  ;;  %v7979_v45 = vld [vmem:[#allocation84_spill] sm:$0xff]  ;;  %v7981_v19 = vld [vmem:[#allocation35_spill] sm:$0xff] }
 0x3c3   :  { %v3391_v23 = vmul.f32 %v7771_v35, %v6426_v60  ;;  %v3184_v38 = vadd.f32 %v3168_v47, %v3147_v8  ;;  %v3136_v6 = vmul.f32 %v7779_v13, %v6516_v36  ;;  %v2193_v20 = vadd.f32 %v2177_v48, %v7977_v32  ;;  %v7980_v34 = vld [vmem:[#allocation28_spill] sm:$0xff]  ;;  %v7983_v48 = vld [vmem:[#allocation93_spill] sm:$0xff]  ;;  %v7994_v61 = vld [vmem:[#allocation87_spill] sm:$0xff] }
 0x3c4   :  { %v2524_v5 = vadd.f32 %v2508_v24, %v7978_v44  ;;  %v3478_v7 = vadd.f32 %v3462_v58, %v3440_v12  ;;  %v2895_v11 = vadd.f32 %v7979_v45, %v2857_v4  ;;  %v2917_v0 = vmul.f32 %v7980_v34, %v6520_v10  ;;  %v7982_v47 = vld [vmem:[#allocation140_spill] sm:$0xff]  ;;  %v7984_v24 = vld [vmem:[#allocation94_spill] sm:$0xff] }
 0x3c5   :  { %v3429_v46 = vmul.f32 %v7800_v2, %v6522_v43  ;;  %v2981_v42 = vadd.f32 %v2965_v16, %v2762_v62  ;;  %v3152_v41 = vadd.f32 %v3136_v6, %v3114_v55  ;;  %v2215_v8 = vmul.f32 %v5556_v54, %v7981_v19  ;;  %v6545_v44 = vld [vmem:[#allocation2 + $0x52] sm:$0xff]  ;;  %v7985_v10 = vld [vmem:[#allocation110_spill] sm:$0xff] }
 0x3c6   :  { %v2546_v36 = vmul.f32 %v5572_v26, %v7982_v47  ;;  %v2420_v32 = vmul.f32 %v7983_v48, %v2308_v49  ;;  %v2751_v58 = vmul.f32 %v7984_v24, %v2639_v51  ;;  %v3407_v12 = vadd.f32 %v3391_v23, %v3353_v3  ;;  %v7986_v55 = vld [vmem:[#allocation69_spill] sm:$0xff]  ;;  %v7987_v19 = vld [vmem:[#allocation64_spill] sm:$0xff]  ;;  %v7990_v49 = vld [vmem:[#allocation70_spill] sm:$0xff] }
 0x3c7   :  { %v2839_v4 = vmul.f32 %v7945_v53, %v6231_v25  ;;  %v2231_v45 = vadd.f32 %v2215_v8, %v2193_v20  ;;  %v2253_v62 = vmul.f32 %v7792_v37, %v7985_v10  ;;  %v2584_v6 = vmul.f32 %v7794_v17, %v7986_v55  ;;  %v7988_v47 = vld [vmem:[#allocation65_spill] sm:$0xff]  ;;  %v7991_v51 = vld [vmem:[#allocation54_spill] sm:$0xff]  ;;  %v7992_v24 = vld [vmem:[#allocation75_spill] sm:$0xff] }
 0x3c8   :  { %v2562_v16 = vadd.f32 %v2546_v36, %v2524_v5  ;;  %v6553_v43 = vadd.f32 %v7988_v47, %v7987_v19  ;;  %v3626_v3 = vmul.f32 %v7991_v51, %v7990_v49  ;;  %v2933_v23 = vadd.f32 %v2917_v0, %v2895_v11  ;;  %v7993_v25 = vld [vmem:[#allocation82_spill] sm:$0xff]  ;;  %v7995_v5 = vld [vmem:[#allocation71_spill] sm:$0xff]  ;;  %v7997_v47 = vld [vmem:[#allocation92_spill] sm:$0xff] }
 0x3c9   :  { %v3445_v48 = vadd.f32 %v3429_v46, %v3407_v12  ;;  %v3629_v53 = vmul.f32 %v7992_v24, %v3517_v30  ;;  %v3296_v20 = vmul.f32 %v7993_v25, %v3184_v38  ;;  %v3515_v8 = vadd.f32 %v3499_v27, %v3478_v7  ;;  %v7999_v30 = vld [vmem:[#allocation85_spill] sm:$0xff]  ;;  %v8001_v38 = vld [vmem:[#allocation96_spill] sm:$0xff]  ;;  %v8005_v51 = vld [vmem:[#allocation26_spill] sm:$0xff] }
 0x3ca   :  { %7989 = vst [vmem:[#allocation46_spill] sm:$0xff] %v6553_v43  ;;  %v3189_v37 = vadd.f32 %v7994_v61, %v3152_v41  ;;  %v6561_v36 = vadd.f32 %v3626_v3, %v7995_v5  ;;  %v2767_v17 = vadd.f32 %v2751_v58, %v2420_v32  ;;  %v3467_v19 = vmul.f32 %v7948_v18, %v6545_v44  ;;  %v8000_v61 = vld [vmem:[#allocation89_spill] sm:$0xff] }
 0x3cb   :  { %v2855_v43 = vadd.f32 %v2839_v4, %v7997_v47  ;;  %v6566_v60 = vadd.f32 %v3629_v53, %v3314_v22  ;;  %v3312_v11 = vadd.f32 %v3296_v20, %v2981_v42  ;;  %v2269_v0 = vadd.f32 %v2253_v62, %v2231_v45  ;;  %v8002_v58 = vld [vmem:[#allocation45_spill] sm:$0xff]  ;;  %v8003_v22 = vld [vmem:[#allocation43_spill] sm:$0xff] }
 0x3cc   :  { %7996 = vst [vmem:[#allocation68_spill] sm:$0xff] %v6561_v36  ;;  %v2600_v46 = vadd.f32 %v2584_v6, %v2562_v16  ;;  %v2970_v12 = vadd.f32 %v7999_v30, %v2933_v23  ;;  %v3483_v25 = vadd.f32 %v3467_v19, %v3445_v48  ;;  %v3020_v7 = vmul.f32 %v7950_v52, %v6215_v57  ;;  %v8004_v45 = vld [vmem:[#allocation95_spill] sm:$0xff]  ;;  %v8006_v23 = vld [vmem:[#allocation88_spill] sm:$0xff]  ;;  %v8020_v36 = vld [vmem:[#allocation9_spill] sm:$0xff] }
 0x3cd   :  { %7998 = vst [vmem:[#allocation53_spill] sm:$0xff] %v6566_v60  ;;  %v3058_v41 = vmul.f32 %v7770_v40, %v6262_v56  ;;  %v3627_v27 = vmul.f32 %v8000_v61, %v3515_v8  ;;  %v3301_v32 = vmul.f32 %v8001_v38, %v3189_v37  ;;  %v2290_v53 = vmul.f32 %v7773_v63, %v8002_v58  ;;  %v8011_v61 = vld [vmem:[#allocation100_spill] sm:$0xff]  ;;  %v8012_v38 = vld [vmem:[#allocation97_spill] sm:$0xff] }
 0x3ce   :  { %v2621_v42 = vmul.f32 %v7775_v14, %v8003_v22  ;;  %v2986_v4 = vadd.f32 %v2970_v12, %v2767_v17  ;;  %v2893_v62 = vadd.f32 %v8004_v45, %v2855_v43  ;;  %v2915_v16 = vmul.f32 %v7980_v34, %v6388_v15  ;;  %v8007_v17 = vld [vmem:[#allocation23_spill] sm:$0xff]  ;;  %v8009_v12 = vld [vmem:[#allocation50_spill] sm:$0xff]  ;;  %v8019_v60 = vld [vmem:[#allocation57_spill] sm:$0xff] }
 0x3cf   :  { %v3096_v57 = vmul.f32 %v7798_v29, %v6268_v31  ;;  %v2306_v6 = vadd.f32 %v2290_v53, %v2269_v0  ;;  %v2142_v37 = vmul.f32 %v8005_v51, %v7985_v10  ;;  %v2180_v3 = vmul.f32 %v7784_v33, %v8002_v58 }
 0x3d0   :  { %v2637_v49 = vadd.f32 %v2621_v42, %v2600_v46  ;;  %v3520_v48 = vadd.f32 %v8006_v23, %v3483_v25  ;;  %v3074_v24 = vadd.f32 %v3058_v41, %v3020_v7  ;;  %v2473_v43 = vmul.f32 %v8007_v17, %v7986_v55  ;;  %v8010_v7 = vld [vmem:[#allocation99_spill] sm:$0xff]  ;;  %v8013_v42 = vld [vmem:[#allocation40_spill] sm:$0xff] }
 0x3d1   :  { %v2511_v20 = vmul.f32 %v7922_v59, %v8003_v22  ;;  %v6593_v8 = vadd.f32 %v3627_v27, %v3312_v11  ;;  %v3351_v5 = vmul.f32 %v7963_v39, %v6264_v21  ;;  %v3389_v19 = vmul.f32 %v7771_v35, %v6303_v1 }
 0x3d2   :  { %v2218_v47 = vmul.f32 %v5556_v54, %v6465_v50  ;;  %v3317_v0 = vadd.f32 %v3301_v32, %v2986_v4  ;;  %v2931_v46 = vadd.f32 %v2915_v16, %v2893_v62  ;;  %v3112_v30 = vadd.f32 %v3096_v57, %v3074_v24  ;;  %v8014_v4 = vld [vmem:[#allocation41_spill] sm:$0xff]  ;;  %v8015_v57 = vld [vmem:[#allocation67_spill] sm:$0xff]  ;;  %v8016_v24 = vld [vmem:[#allocation98_spill] sm:$0xff] }
 0x3d3   :  { %8008 = vst [vmem:[#allocation66_spill] sm:$0xff] %v6593_v8  ;;  %v2549_v25 = vmul.f32 %v5572_v26, %v8009_v12  ;;  %v2418_v41 = vmul.f32 %v8010_v7, %v2306_v6  ;;  %v2749_v11 = vmul.f32 %v8011_v61, %v2637_v49  ;;  %v3427_v27 = vmul.f32 %v7800_v2, %v7947_v28 }
 0x3d4   :  { %v2196_v21 = vadd.f32 %v2180_v3, %v2142_v37  ;;  %v3632_v53 = vmul.f32 %v8012_v38, %v3520_v48  ;;  %v3134_v45 = vmul.f32 %v7779_v13, %v8013_v42  ;;  %v2527_v23 = vadd.f32 %v2511_v20, %v2473_v43  ;;  %v8017_v20 = vld [vmem:[#allocation51_spill] sm:$0xff]  ;;  %v8018_v38 = vld [vmem:[#allocation25_spill] sm:$0xff]  ;;  %v8032_v13 = vld [vmem:[#allocation20_spill] sm:$0xff] }
 0x3d5   :  { %v3061_v32 = vmul.f32 %v7770_v40, %v6482_v9  ;;  %v3171_v62 = vmul.f32 %v8014_v4, %v6482_v9  ;;  %v3405_v16 = vadd.f32 %v3389_v19, %v3351_v5  ;;  %v3465_v6 = vmul.f32 %v7948_v18, %v8015_v57  ;;  %v8021_v19 = vld [vmem:[#allocation47_spill] sm:$0xff] }
 0x3d6   :  { %v2234_v49 = vadd.f32 %v2218_v47, %v2196_v21  ;;  %v2968_v7 = vadd.f32 %v8016_v24, %v2931_v46  ;;  %v3150_v37 = vadd.f32 %v3134_v45, %v3112_v30  ;;  %v2565_v3 = vadd.f32 %v2549_v25, %v2527_v23  ;;  %v8022_v47 = vld [vmem:[#allocation130_spill] sm:$0xff]  ;;  %v8023_v30 = vld [vmem:[#allocation35_spill] sm:$0xff]  ;;  %v8026_v23 = vld [vmem:[#allocation140_spill] sm:$0xff] }
 0x3d7   :  { %v3023_v48 = vmul.f32 %v7950_v52, %v8013_v42  ;;  %v2765_v61 = vadd.f32 %v2749_v11, %v2418_v41  ;;  %v3443_v43 = vadd.f32 %v3427_v27, %v3405_v16  ;;  %v2256_v8 = vmul.f32 %v8018_v38, %v8017_v20  ;;  %v8024_v41 = vld [vmem:[#allocation12_spill] sm:$0xff]  ;;  %v8025_v27 = vld [vmem:[#allocation133_spill] sm:$0xff] }
 0x3d8   :  { %v2587_v34 = vmul.f32 %v8020_v36, %v8019_v60  ;;  %v3392_v18 = vmul.f32 %v7771_v35, %v8021_v19  ;;  %v2140_v46 = vmul.f32 %v8005_v51, %v8022_v47  ;;  %v2178_v25 = vmul.f32 %v7784_v33, %v8023_v30  ;;  %v8027_v16 = vld [vmem:[#allocation73_spill] sm:$0xff]  ;;  %v8028_v47 = vld [vmem:[#allocation86_spill] sm:$0xff] }
 0x3d9   :  { %v3077_v5 = vadd.f32 %v3061_v32, %v3023_v48  ;;  %v2272_v21 = vadd.f32 %v2256_v8, %v2234_v49  ;;  %v2804_v11 = vmul.f32 %v8024_v41, %v6388_v15  ;;  %v2471_v45 = vmul.f32 %v8007_v17, %v8025_v27  ;;  %v8029_v17 = vld [vmem:[#allocation121_spill] sm:$0xff] }
 0x3da   :  { %v2509_v60 = vmul.f32 %v7922_v59, %v8026_v23  ;;  %v2603_v32 = vadd.f32 %v2587_v34, %v2565_v3  ;;  %v3099_v24 = vmul.f32 %v7798_v29, %v8027_v16  ;;  %v3354_v48 = vmul.f32 %v7963_v39, %v8015_v57  ;;  %v8030_v23 = vld [vmem:[#allocation10_spill] sm:$0xff] }
 0x3db   :  { %v2216_v20 = vmul.f32 %v5556_v54, %v7985_v10  ;;  %v3187_v8 = vadd.f32 %v3171_v62, %v3150_v37  ;;  %v3481_v49 = vadd.f32 %v3465_v6, %v3443_v43  ;;  %v3502_v30 = vmul.f32 %v8028_v47, %v8021_v19  ;;  %v8033_v62 = vld [vmem:[#allocation13_spill] sm:$0xff]  ;;  %v8034_v37 = vld [vmem:[#allocation103_spill] sm:$0xff] }
 0x3dc   :  { %v2547_v27 = vmul.f32 %v5572_v26, %v7986_v55  ;;  %v2880_v34 = vmul.f32 %v8030_v23, %v8029_v17  ;;  %v3115_v3 = vadd.f32 %v3099_v24, %v3077_v5  ;;  %v3408_v51 = vadd.f32 %v3392_v18, %v3354_v48  ;;  %v6654_v19 = vld [vmem:[#allocation2 + $0x76] sm:$0xff] }
 0x3dd   :  { %v2194_v4 = vadd.f32 %v2178_v25, %v2140_v46  ;;  %v6647_v16 = vadd.f32 %v3632_v53, %v3317_v0  ;;  %v2984_v57 = vadd.f32 %v2968_v7, %v2765_v61  ;;  %v2309_v9 = vadd.f32 %v8032_v13, %v2272_v21  ;;  %8035 = vst [vmem:[#allocation52_spill] sm:$0xff] %v6654_v19  ;;  %v8036_v17 = vld [vmem:[#allocation101_spill] sm:$0xff]  ;;  %v8037_v13 = vld [vmem:[#allocation107_spill] sm:$0xff] }
 0x3de   :  { %v2525_v10 = vadd.f32 %v2509_v60, %v2471_v45  ;;  %v2640_v6 = vadd.f32 %v8033_v62, %v2603_v32  ;;  %v2858_v43 = vadd.f32 %v8034_v37, %v2804_v11  ;;  %v3430_v47 = vmul.f32 %v7800_v2, %v6545_v44  ;;  %v8038_v21 = vld [vmem:[#allocation105_spill] sm:$0xff]  ;;  %v8039_v60 = vld [vmem:[#allocation106_spill] sm:$0xff] }
 0x3df   :  { %8031 = vst [vmem:[#allocation79_spill] sm:$0xff] %v6647_v16  ;;  %v2232_v55 = vadd.f32 %v2216_v20, %v2194_v4  ;;  %v3299_v5 = vmul.f32 %v8036_v17, %v3187_v8  ;;  %v3518_v18 = vadd.f32 %v3502_v30, %v3481_v49  ;;  %v3059_v0 = vmul.f32 %v7770_v40, %v6268_v31  ;;  %v8040_v24 = vld [vmem:[#allocation141_spill] sm:$0xff]  ;;  %v8042_v8 = vld [vmem:[#allocation104_spill] sm:$0xff] }
 0x3e0   :  { %v2563_v46 = vadd.f32 %v2547_v27, %v2525_v10  ;;  %v2896_v53 = vadd.f32 %v2880_v34, %v2858_v43  ;;  %v3153_v7 = vadd.f32 %v8037_v13, %v3115_v3  ;;  %v3446_v61 = vadd.f32 %v3430_v47, %v3408_v51  ;;  %v6674_v48 = vld [vmem:[#allocation2 + $0x77] sm:$0xff] }
 0x3e1   :  { %v2254_v25 = vmul.f32 %v8018_v38, %v8002_v58  ;;  %v2421_v11 = vmul.f32 %v8038_v21, %v2309_v9  ;;  %v2585_v4 = vmul.f32 %v8020_v36, %v8003_v22  ;;  %v3021_v17 = vmul.f32 %v7950_v52, %v6262_v56  ;;  %8041 = vst [vmem:[#allocation44_spill] sm:$0xff] %v6674_v48  ;;  %v8043_v30 = vld [vmem:[#allocation24_spill] sm:$0xff]  ;;  %v6683_v10 = vld [vmem:[#allocation2 + $0x7e] sm:$0xff] }
 0x3e2   :  { %v2183_v45 = vmul.f32 %v7784_v33, %v6654_v19  ;;  %v2752_v31 = vmul.f32 %v8039_v60, %v2640_v6  ;;  %v2291_v51 = vmul.f32 %v7773_v63, %v6465_v50  ;;  %v2802_v58 = vmul.f32 %v8024_v41, %v8040_v24  ;;  %v8044_v34 = vld [vmem:[#allocation108_spill] sm:$0xff]  ;;  %8045 = vst [vmem:[#allocation55_spill] sm:$0xff] %v6683_v10  ;;  %v8046_v6 = vld [vmem:[#allocation114_spill] sm:$0xff]  ;;  %v8050_v13 = vld [vmem:[#allocation5_spill] sm:$0xff] }
 0x3e3   :  { %v2270_v32 = vadd.f32 %v2254_v25, %v2232_v55  ;;  %v3315_v9 = vadd.f32 %v3299_v5, %v2984_v57  ;;  %v2601_v20 = vadd.f32 %v2585_v4, %v2563_v46  ;;  %v2622_v22 = vmul.f32 %v7775_v14, %v8009_v12  ;;  %v8047_v55 = vld [vmem:[#allocation112_spill] sm:$0xff]  ;;  %v6695_v46 = vld [vmem:[#allocation2 + $0x86] sm:$0xff] }
 0x3e4   :  { %v3075_v56 = vadd.f32 %v3059_v0, %v3021_v17  ;;  %v2934_v49 = vadd.f32 %v8042_v8, %v2896_v53  ;;  %v3190_v27 = vadd.f32 %v8043_v30, %v3153_v7  ;;  %v3484_v3 = vadd.f32 %v8044_v34, %v3446_v61  ;;  %8048 = vst [vmem:[#allocation74_spill] sm:$0xff] %v6695_v46  ;;  %v6701_v61 = vld [vmem:[#allocation2 + $0x78] sm:$0xff]  ;;  %v8051_v25 = vld [vmem:[#allocation102_spill] sm:$0xff]  ;;  %v8055_v24 = vld [vmem:[#allocation115_spill] sm:$0xff] }
 0x3e5   :  { %v3390_v50 = vmul.f32 %v7771_v35, %v7947_v28  ;;  %v2878_v62 = vmul.f32 %v8030_v23, %v6388_v15  ;;  %v3097_v57 = vmul.f32 %v7798_v29, %v8013_v42  ;;  %v2199_v12 = vadd.f32 %v2183_v45, %v8046_v6  ;;  %v8049_v15 = vld [vmem:[#allocation49_spill] sm:$0xff]  ;;  %v8057_v8 = vld [vmem:[#allocation67_spill] sm:$0xff] }
 0x3e6   :  { %v2514_v37 = vmul.f32 %v7922_v59, %v6674_v48  ;;  %v2768_v43 = vadd.f32 %v2752_v31, %v2421_v11  ;;  %v2307_v47 = vadd.f32 %v2291_v51, %v2270_v32  ;;  %v2856_v5 = vadd.f32 %v8047_v55, %v2802_v58  ;;  %v8052_v11 = vld [vmem:[#allocation16_spill] sm:$0xff]  ;;  %v8053_v17 = vld [vmem:[#allocation109_spill] sm:$0xff]  ;;  %v6714_v30 = vld [vmem:[#allocation2 + $0x87] sm:$0xff] }
 0x3e7   :  { %v3352_v28 = vmul.f32 %v7963_v39, %v6303_v1  ;;  %v2638_v0 = vadd.f32 %v2622_v22, %v2601_v20  ;;  %v3113_v53 = vadd.f32 %v3097_v57, %v3075_v56  ;;  %v3135_v7 = vmul.f32 %v8050_v13, %v8049_v15  ;;  %v6706_v1 = vld [vmem:[#allocation2 + $0x7f] sm:$0xff]  ;;  %v8056_v22 = vld [vmem:[#allocation31_spill] sm:$0xff]  ;;  %8058 = vst [vmem:[#allocation72_spill] sm:$0xff] %v6714_v30 }
 0x3e8   :  { %v2221_v42 = vmul.f32 %v5556_v54, %v6683_v10  ;;  %v3630_v21 = vmul.f32 %v8051_v25, %v3518_v18  ;;  %v2971_v4 = vadd.f32 %v8052_v11, %v2934_v49  ;;  %v3302_v45 = vmul.f32 %v8053_v17, %v3190_v27  ;;  %8054 = vst [vmem:[#allocation59_spill] sm:$0xff] %v6706_v1  ;;  %v8059_v49 = vld [vmem:[#allocation27_spill] sm:$0xff]  ;;  %v8066_v15 = vld [vmem:[#allocation41_spill] sm:$0xff] }
 0x3e9   :  { %v3406_v60 = vadd.f32 %v3390_v50, %v3352_v28  ;;  %v2894_v31 = vadd.f32 %v2878_v62, %v2856_v5  ;;  %v2259_v51 = vmul.f32 %v8018_v38, %v6695_v46  ;;  %v2530_v58 = vadd.f32 %v2514_v37, %v8055_v24  ;;  %v8060_v34 = vld [vmem:[#allocation119_spill] sm:$0xff]  ;;  %v8061_v62 = vld [vmem:[#allocation120_spill] sm:$0xff]  ;;  %v8065_v28 = vld [vmem:[#allocation73_spill] sm:$0xff] }
 0x3ea   :  { %v2237_v32 = vadd.f32 %v2221_v42, %v2199_v12  ;;  %v2987_v20 = vadd.f32 %v2971_v4, %v2768_v43  ;;  %v3521_v56 = vadd.f32 %v8056_v22, %v3484_v3  ;;  %v3428_v18 = vmul.f32 %v7800_v2, %v8057_v8  ;;  %v6722_v37 = vld [vmem:[#allocation2 + $0x71] sm:$0xff]  ;;  %v6724_v43 = vld [vmem:[#allocation2 + $0x79] sm:$0xff]  ;;  %v8064_v55 = vld [vmem:[#allocation15_spill] sm:$0xff] }
 0x3eb   :  { %v2845_v27 = vmul.f32 %v8059_v49, %v6701_v61  ;;  %v2419_v50 = vmul.f32 %v8060_v34, %v2307_v47  ;;  %v2750_v57 = vmul.f32 %v8061_v62, %v2638_v0  ;;  %v3151_v6 = vadd.f32 %v3135_v7, %v3113_v53  ;;  %8062 = vst [vmem:[#allocation60_spill] sm:$0xff] %v6722_v37  ;;  %v8063_v3 = vld [vmem:[#allocation121_spill] sm:$0xff]  ;;  %v8067_v11 = vld [vmem:[#allocation47_spill] sm:$0xff]  ;;  %v8068_v4 = vld [vmem:[#allocation30_spill] sm:$0xff] }
 0x3ec   :  { %v2552_v12 = vmul.f32 %v5572_v26, %v6706_v1  ;;  %v2953_v5 = vmul.f32 %v8064_v55, %v8063_v3  ;;  %v3172_v42 = vmul.f32 %v8066_v15, %v8065_v28  ;;  %v3444_v25 = vadd.f32 %v3428_v18, %v3406_v60  ;;  %v6732_v17 = vld [vmem:[#allocation2 + $0x8e] sm:$0xff]  ;;  %v8070_v0 = vld [vmem:[#allocation113_spill] sm:$0xff]  ;;  %v6737_v8 = vld [vmem:[#allocation2 + $0x81] sm:$0xff] }
 0x3ed   :  { %v3466_v47 = vmul.f32 %v8068_v4, %v8067_v11  ;;  %8069 = vst [vmem:[#allocation126_spill] sm:$0xff] %v6732_v17  ;;  %v2932_v53 = vadd.f32 %v8070_v0, %v2894_v31  ;;  %v2275_v7 = vadd.f32 %v2259_v51, %v2237_v32  ;;  %v2590_v22 = vmul.f32 %v8020_v36, %v6714_v30  ;;  %v6741_v62 = vld [vmem:[#allocation2 + $0x88] sm:$0xff]  ;;  %v8074_v3 = vld [vmem:[#allocation116_spill] sm:$0xff] }
 0x3ee   :  { %v2568_v24 = vadd.f32 %v2552_v12, %v2530_v58  ;;  %8071 = vst [vmem:[#allocation39_spill] sm:$0xff] %v6737_v8  ;;  %v6739_v34 = vadd.f32 %v3630_v21, %v3315_v9  ;;  %8073 = vst [vmem:[#allocation22_spill] sm:$0xff] %v6741_v62  ;;  %v2861_v60 = vadd.f32 %v2845_v27, %v8074_v3  ;;  %v8075_v12 = vld [vmem:[#allocation111_spill] sm:$0xff]  ;;  %v6754_v21 = vld [vmem:[%s7417_s8 + $0x18] ss:$0 sm:$0xff] }
 0x3ef   :  { %v3026_v18 = vmul.f32 %v7950_v52, %v6722_v37  ;;  %v3064_v28 = vmul.f32 %v7770_v40, %v6724_v43  ;;  %v3318_v31 = vadd.f32 %v3302_v45, %v2987_v20  ;;  %v2766_v32 = vadd.f32 %v2750_v57, %v2419_v50  ;;  %8076 = vst [vmem:[#allocation76_spill] sm:$0xff] %v6754_v21  ;;  %v6758_v0 = vld [vmem:[#allocation2 + $0x8f] sm:$0xff] }
 0x3f0   :  { %8072 = vst [vmem:[#allocation32_spill] sm:$0xff] %v6739_v34  ;;  %v3188_v51 = vadd.f32 %v3172_v42, %v3151_v6  ;;  %v2296_v58 = vmul.f32 %v7773_v63, %v6732_v17  ;;  %v3633_v11 = vmul.f32 %v8075_v12, %v3521_v56  ;;  %v3482_v9 = vadd.f32 %v3466_v47, %v3444_v25  ;;  %v8078_v6 = vld [vmem:[#allocation28_spill] sm:$0xff]  ;;  %v6766_v25 = vld [vmem:[#allocation2 + $0x7a] sm:$0xff]  ;;  %v8085_v55 = vld [vmem:[#allocation127_spill] sm:$0xff] }
 0x3f1   :  { %v3503_v27 = vmul.f32 %v6754_v21, %v6545_v44  ;;  %8077 = vst [vmem:[#allocation77_spill] sm:$0xff] %v6758_v0  ;;  %v3102_v45 = vmul.f32 %v7798_v29, %v6737_v8  ;;  %v2969_v20 = vadd.f32 %v2953_v5, %v2932_v53  ;;  %v2606_v57 = vadd.f32 %v2590_v22, %v2568_v24  ;;  %v6764_v42 = vld [vmem:[#allocation2 + $0x72] sm:$0xff]  ;;  %v6769_v12 = vld [vmem:[#allocation2 + $0x89] sm:$0xff]  ;;  %v8083_v24 = vld [vmem:[#allocation122_spill] sm:$0xff] }
 0x3f2   :  { %v2312_v50 = vadd.f32 %v2296_v58, %v2275_v7  ;;  %v2921_v56 = vmul.f32 %v8078_v6, %v6741_v62  ;;  %v8079_v47 = vld [vmem:[#allocation117_spill] sm:$0xff]  ;;  %8080 = vst [vmem:[#allocation56_spill] sm:$0xff] %v6769_v12  ;;  %v3080_v16 = vadd.f32 %v3064_v28, %v3026_v18  ;;  %v2257_v34 = vmul.f32 %v8018_v38, %v6654_v19 }
 0x3f3   :  { %v2899_v3 = vadd.f32 %v8079_v47, %v2861_v60  ;;  %v6771_v44 = vld [vmem:[#allocation2 + $0x91] sm:$0xff]  ;;  %v2588_v5 = vmul.f32 %v8020_v36, %v6674_v48  ;;  %v6777_v53 = vadd.f32 %v3633_v11, %v3318_v31  ;;  %v2985_v7 = vadd.f32 %v2969_v20, %v2766_v32  ;;  %v6782_v60 = vld [vmem:[#allocation2 + $0x82] sm:$0xff] }
 0x3f4   :  { %8081 = vst [vmem:[#allocation61_spill] sm:$0xff] %v6771_v44  ;;  %v3300_v22 = vmul.f32 %v8083_v24, %v3188_v51  ;;  %v2627_v58 = vmul.f32 %v7775_v14, %v6758_v0  ;;  %8084 = vst [vmem:[#allocation63_spill] sm:$0xff] %v6782_v60  ;;  %v6784_v47 = vadd.f32 %v3503_v27, %v3482_v9 }
 0x3f5   :  { %8082 = vst [vmem:[#allocation19_spill] sm:$0xff] %v6777_v53  ;;  %v3118_v49 = vadd.f32 %v3102_v45, %v3080_v16  ;;  %v3357_v18 = vmul.f32 %v7963_v39, %v6764_v42  ;;  %v3395_v28 = vmul.f32 %v7771_v35, %v6766_v25  ;;  %v2424_v31 = vmul.f32 %v8085_v55, %v2312_v50  ;;  %v8086_v16 = vld [vmem:[#allocation38_spill] sm:$0xff]  ;;  %v8087_v45 = vld [vmem:[#allocation124_spill] sm:$0xff] }
 0x3f6   :  { %v2643_v11 = vadd.f32 %v2627_v58, %v2606_v57  ;;  %v3140_v32 = vmul.f32 %v8050_v13, %v6769_v12  ;;  %v3177_v51 = vmul.f32 %v8066_v15, %v6771_v44  ;;  %v2937_v20 = vadd.f32 %v2921_v56, %v2899_v3  ;;  %v6799_v53 = vld [vmem:[#allocation2 + $0x8a] sm:$0xff]  ;;  %v8089_v39 = vld [vmem:[#allocation26_spill] sm:$0xff] }
 0x3f7   :  { %v3433_v9 = vmul.f32 %v7800_v2, %v6782_v60  ;;  %v2273_v27 = vadd.f32 %v2257_v34, %v8086_v16  ;;  %v2604_v24 = vadd.f32 %v2588_v5, %v8087_v45  ;;  %8088 = vst [vmem:[#allocation80_spill] sm:$0xff] %v6799_v53  ;;  %v2146_v55 = vmul.f32 %v8089_v39, %v6654_v19  ;;  %v8090_v57 = vld [vmem:[#allocation23_spill] sm:$0xff]  ;;  %v8091_v16 = vld [vmem:[#allocation128_spill] sm:$0xff] }
 0x3f8   :  { %v2184_v50 = vmul.f32 %v7784_v33, %v6683_v10  ;;  %v2477_v58 = vmul.f32 %v8090_v57, %v6674_v48  ;;  %v2515_v56 = vmul.f32 %v7922_v59, %v6706_v1  ;;  %v3156_v3 = vadd.f32 %v3140_v32, %v3118_v49  ;;  %v6814_v39 = vld [vmem:[#allocation2 + $0x92] sm:$0xff] }
 0x3f9   :  { %v3411_v44 = vadd.f32 %v3395_v28, %v3357_v18  ;;  %v2294_v34 = vmul.f32 %v7773_v63, %v6683_v10  ;;  %v3100_v5 = vmul.f32 %v7798_v29, %v6722_v37  ;;  %v2755_v45 = vmul.f32 %v8091_v16, %v2643_v11  ;;  %8092 = vst [vmem:[#allocation58_spill] sm:$0xff] %v6814_v39  ;;  %v8093_v37 = vld [vmem:[#allocation118_spill] sm:$0xff] }
 0x3fa   :  { %v2625_v33 = vmul.f32 %v7775_v14, %v6706_v1  ;;  %v2222_v57 = vmul.f32 %v5556_v54, %v6695_v46  ;;  %v2553_v49 = vmul.f32 %v5572_v26, %v6714_v30  ;;  %v6822_v18 = vadd.f32 %v3300_v22, %v2985_v7  ;;  %v8094_v46 = vld [vmem:[#allocation34_spill] sm:$0xff] }
 0x3fb   :  { %v3449_v28 = vadd.f32 %v3433_v9, %v3411_v44  ;;  %v3471_v32 = vmul.f32 %v8068_v4, %v6799_v53  ;;  %v2310_v59 = vadd.f32 %v2294_v34, %v2273_v27  ;;  %v2974_v11 = vadd.f32 %v8093_v37, %v2937_v20  ;;  %v6834_v9 = vld [vmem:[#allocation2 + $0x96] sm:$0xff] }
 0x3fc   :  { %v2641_v16 = vadd.f32 %v2625_v33, %v2604_v24  ;;  %v2200_v10 = vadd.f32 %v2184_v50, %v2146_v55  ;;  %v2531_v48 = vadd.f32 %v2515_v56, %v2477_v58  ;;  %v3193_v19 = vadd.f32 %v3177_v51, %v3156_v3  ;;  %8095 = vst [vmem:[#allocation62_spill] sm:$0xff] %v6834_v9  ;;  %v6836_v33 = vpop.f32.mrf.mxu0  ;;  %v8096_v51 = vld [vmem:[#allocation132_spill] sm:$0xff] }
 0x3fd   :  { %v3508_v1 = vmul.f32 %v6754_v21, %v6814_v39  ;;  %v3116_v54 = vadd.f32 %v3100_v5, %v8094_v46  ;;  %v3431_v7 = vmul.f32 %v7800_v2, %v6764_v42  ;;  %v2771_v22 = vadd.f32 %v2755_v45, %v2424_v31  ;;  %v6843_v50 = vld [vmem:[#allocation2 + $0x97] sm:$0xff]  ;;  %v8098_v31 = vld [vmem:[#allocation135_spill] sm:$0xff] }
 0x3fe   :  { %v2919_v44 = vmul.f32 %v8078_v6, %v6701_v61  ;;  %v2238_v27 = vadd.f32 %v2222_v57, %v2200_v10  ;;  %v2569_v37 = vadd.f32 %v2553_v49, %v2531_v48  ;;  %v3487_v20 = vadd.f32 %v3471_v32, %v3449_v28  ;;  %8097 = vst [vmem:[#allocation78_spill] sm:$0xff] %v6843_v50  ;;  %v8099_v57 = vld [vmem:[#allocation36_spill] sm:$0xff] }
 0x3ff   :  { %v2422_v24 = vmul.f32 %v8096_v51, %v2310_v59  ;;  %v3138_v55 = vmul.f32 %v8050_v13, %v6724_v43  ;;  %v3175_v46 = vmul.f32 %v8066_v15, %v6737_v8  ;;  %v2753_v58 = vmul.f32 %v8098_v31, %v2641_v16  ;;  %v8100_v16 = vld [vmem:[#allocation42_spill] sm:$0xff]  ;;  %v1718_v51 = vpop.f32.mrf.mxu0 }
 0x400   :  { %v2260_v56 = vmul.f32 %v8018_v38, %v6732_v17  ;;  %v2591_v48 = vmul.f32 %v8020_v36, %v6758_v0  ;;  %v3065_v10 = vmul.f32 %v7770_v40, %v6737_v8  ;;  %v3447_v3 = vadd.f32 %v3431_v7, %v8099_v57 }
 0x401   :  { %v3154_v59 = vadd.f32 %v3138_v55, %v3116_v54  ;;  %v2297_v34 = vmul.f32 %v7773_v63, %v6834_v9  ;;  %v2808_v5 = vmul.f32 %v8024_v41, %v6701_v61  ;;  %v2628_v28 = vmul.f32 %v7775_v14, %v6843_v50  ;;  %v8101_v55 = vld [vmem:[#allocation129_spill] sm:$0xff]  ;;  %v8103_v9 = vld [vmem:[#allocation138_spill] sm:$0xff]  ;;  %v4118_v8 = vpop.f32.mrf.mxu0 }
 0x402   :  { %v2276_v45 = vadd.f32 %v2260_v56, %v2238_v27  ;;  %v2607_v49 = vadd.f32 %v2591_v48, %v2569_v37  ;;  %v3027_v32 = vmul.f32 %v7950_v52, %v6724_v43  ;;  %vm3242_vm3 = vcmp.lt.s32.totalorder %v8100_v16, 8  ;;  %v8102_v27 = vld [vmem:[#allocation131_spill] sm:$0xff] }
 0x403   :  { %v2990_v54 = vadd.f32 %v2974_v11, %v2771_v22  ;;  %v2935_v7 = vadd.f32 %v2919_v44, %v8101_v55  ;;  %v3469_v31 = vmul.f32 %v8068_v4, %v6766_v25  ;;  %v2884_v57 = vmul.f32 %v8030_v23, %v6741_v62 }
 0x404   :  { %v3305_v37 = vmul.f32 %v8102_v27, %v3193_v19  ;;  %v3524_v56 = vadd.f32 %v3508_v1, %v3487_v20  ;;  %v3506_v48 = vmul.f32 %v6754_v21, %v6782_v60  ;;  %v3081_v41 = vadd.f32 %v3065_v10, %v3027_v32  ;;  %v8104_v19 = vld [vmem:[#allocation123_spill] sm:$0xff]  ;;  %v8105_v27 = vld [vmem:[#allocation136_spill] sm:$0xff] }
 0x405   :  { %v2769_v50 = vadd.f32 %v2753_v58, %v2422_v24  ;;  %v3191_v0 = vadd.f32 %v3175_v46, %v3154_v59  ;;  %v3485_v17 = vadd.f32 %v3469_v31, %v3447_v3  ;;  %v2862_v11 = vadd.f32 %v8103_v9, %v2808_v5  ;;  %v6878_v46 = vld [vmem:[#allocation2 + $0x98] sm:$0xff]  ;;  %v8107_v3 = vld [vmem:[#allocation11_spill] sm:$0xff]  ;;  %v8108_v5 = vld [vmem:[#allocation52_spill] sm:$0xff] }
 0x406   :  { %v2313_v22 = vadd.f32 %v2297_v34, %v2276_v45  ;;  %v2644_v44 = vadd.f32 %v2628_v28, %v2607_v49  ;;  %v3103_v55 = vmul.f32 %v7798_v29, %v6769_v12  ;;  %v3396_v62 = vmul.f32 %v7771_v35, %v6782_v60  ;;  %v8106_v9 = vld [vmem:[#allocation61_spill] sm:$0xff]  ;;  %v8116_v12 = vld [vmem:[#allocation139_spill] sm:$0xff] }
 0x407   :  { %v3631_v1 = vmul.f32 %v8104_v19, %v6784_v47  ;;  %v3321_v20 = vadd.f32 %v3305_v37, %v2990_v54  ;;  %v2972_v10 = vadd.f32 %v8105_v27, %v2935_v7  ;;  %v2900_v24 = vadd.f32 %v2884_v57, %v2862_v11  ;;  %v8109_v45 = vld [vmem:[#allocation17_spill] sm:$0xff]  ;;  %v8111_v47 = vld [vmem:[#allocation134_spill] sm:$0xff]  ;;  %v8113_v37 = vld [vmem:[#allocation143_spill] sm:$0xff] }
 0x408   :  { %v3119_v58 = vadd.f32 %v3103_v55, %v3081_v41  ;;  %v3141_v59 = vmul.f32 %v8050_v13, %v8106_v9  ;;  %v3358_v34 = vmul.f32 %v8107_v3, %v6766_v25  ;;  %v2220_v49 = vmul.f32 %v8109_v45, %v8108_v5  ;;  %v8112_v31 = vld [vmem:[#allocation37_spill] sm:$0xff]  ;;  %v1721_v9 = vpop.f32.mrf.mxu0  ;;  %v8117_v5 = vld [vmem:[#allocation15_spill] sm:$0xff] }
 0x409   :  { %v6887_v28 = vadd.f32 %v3631_v1, %v6822_v18  ;;  %v3636_v32 = vmul.f32 %v8111_v47, %v3524_v56  ;;  %v2988_v54 = vadd.f32 %v2972_v10, %v2769_v50  ;;  %v3522_v7 = vadd.f32 %v3506_v48, %v3485_v17  ;;  %v8114_v11 = vld [vmem:[#allocation145_spill] sm:$0xff]  ;;  %v8119_v56 = vld [vmem:[#allocation44_spill] sm:$0xff] }
 0x40a   :  { %v3303_v57 = vmul.f32 %v8112_v31, %v3191_v0  ;;  %v2425_v41 = vmul.f32 %v8113_v37, %v2313_v22  ;;  %v2756_v55 = vmul.f32 %v8114_v11, %v2644_v44  ;;  %v6893_v19 = vld [vmem:[#allocation2 + $0x99] sm:$0xff]  ;;  %v3412_v27 = vadd.f32 %v3396_v62, %v3358_v34  ;;  %v4121_v62 = vpop.f32.mrf.mxu0  ;;  %v8125_v31 = vld [vmem:[#allocation55_spill] sm:$0xff] }
 0x40b   :  { %8110 = vst [vmem:[#allocation81_spill] sm:$0xff] %v6887_v28  ;;  %8115 = vst [vmem:[#allocation83_spill] sm:$0xff] %v6893_v19  ;;  %v2938_v60 = vadd.f32 %v8116_v12, %v2900_v24  ;;  %v2959_v18 = vmul.f32 %v8117_v5, %v6878_v46  ;;  %v8118_v1 = vld [vmem:[#allocation125_spill] sm:$0xff]  ;;  %v2551_v17 = vmul.f32 %v5572_v26, %v8119_v56  ;;  %v8121_v22 = vld [vmem:[#allocation142_spill] sm:$0xff]  ;;  %v8123_v47 = vmov 0.0  }
 0x40c   :  { %v3541_v28 = vadd.s32 2, %v8118_v1  ;;  %v6901_v50 = vadd.f32 %v3636_v32, %v3321_v20  ;;  %v3157_v0 = vadd.f32 %v3141_v59, %v3119_v58  ;;  %v3434_v48 = vmul.f32 %v7800_v2, %v6799_v53  ;;  %v8122_v12 = vld [vmem:[#allocation137_spill] sm:$0xff]  ;;  %v8127_v11 = vld [vmem:[#allocation146_spill] sm:$0xff] }
 0x40d   :  { %v2236_v44 = vadd.f32 %v2220_v49, %v8121_v22  ;;  %v6906_v10 = vadd.f32 %v3303_v57, %v2988_v54  ;;  %v6909_v24 = vmul.f32 %v8122_v12, %v3522_v7  ;;  %v3178_v34 = vmul.f32 %v8066_v15, %v6893_v19  ;;  %v6916_v58 = vld [vmem:[#allocation2 + $0x9a] sm:$0xff]  ;;  %v8126_v7 = vld [vmem:[#allocation144_spill] sm:$0xff] }
 0x40e   :  { %8120 = vst [vmem:[#allocation90_spill] sm:$0xff] %v6901_v50  ;;  %v3955_v20 = vsel %vm3242_vm3, 1.0, %v8123_v47  ;;  %v2772_v32 = vadd.f32 %v2756_v55, %v2425_v41  ;;  %8124 = vst [vmem:[#allocation91_spill] sm:$0xff] %v6916_v58  ;;  %v3450_v59 = vadd.f32 %v3434_v48, %v3412_v27  ;;  %v3472_v49 = vmul.f32 %v8068_v4, %v6814_v39  ;;  %v8128_v12 = vld [vmem:[#allocation74_spill] sm:$0xff]  ;;  %v1734_v27 = vpop.f32.mrf.mxu0  ;;  %v8129_v50 = vld [vmem:[#allocation59_spill] sm:$0xff] }
 0x40f   :  { %v2258_v54 = vmul.f32 %v8018_v38, %v8125_v31  ;;  %v2975_v57 = vadd.f32 %v2959_v18, %v2938_v60  ;;  %vm3573_vm4 = vcmp.lt.s32.totalorder %v3541_v28, 8  ;;  %v2327_v37 = vadd.s32 4294967294, %v8126_v7 }
 0x410   :  { %v2567_v1 = vadd.f32 %v2551_v17, %v8127_v11  ;;  %v1719_v56 = vadd.f32 1e-06, %v1718_v51  ;;  %v3194_v22 = vadd.f32 %v3178_v34, %v3157_v0  ;;  %v2295_v41 = vmul.f32 %v7773_v63, %v8128_v12  ;;  %v4122_v19 = vpop.f32.mrf.mxu0 }
 0x411   :  { %v2274_v16 = vadd.f32 %v2258_v54, %v2236_v44  ;;  %v1727_v55 = vadd.f32 1e-06, %v6836_v33  ;;  %v3509_v48 = vmul.f32 %v6754_v21, %v6916_v58  ;;  %v2589_v60 = vmul.f32 %v8020_v36, %v8129_v50  ;;  %v8130_v33 = vld [vmem:[#allocation60_spill] sm:$0xff] }
 0x412   :  { %v2658_v28 = vadd.s32 4294967295, %v8126_v7  ;;  %v1730_v18 = vadd.f32 1e-06, %v4118_v8  ;;  %v2991_v39 = vadd.f32 %v2975_v57, %v2772_v32  ;;  %v3488_v17 = vadd.f32 %v3472_v49, %v3450_v59  ;;  %v4463_v32 = vld [vmem:[#allocation2 + $0x69] sm:$0xff] }
 0x413   :  { %v3972_v51 = vsel %vm3573_vm4, 1.0, %v8123_v47  ;;  %vm2343_vm5 = vcmp.ge.s32.totalorder %v2327_v37, 0  ;;  %v2605_v0 = vadd.f32 %v2589_v60, %v2567_v1  ;;  %v2626_v44 = vmul.f32 %v7775_v14, %v6714_v30  ;;  %v4464_v60 = vld [vmem:[#allocation2 + $0x6a] sm:$0xff] }
 0x414   :  { %v3063_v34 = vmul.f32 %v7770_v40, %v8130_v33  ;;  %4426 = vrcp.f32 %v1719_v56  ;;  %v1722_v54 = vadd.f32 1e-06, %v1721_v9  ;;  %v3306_v11 = vmul.f32 %v3955_v20, %v3194_v22  ;;  %v8131_v56 = vld [vmem:[#allocation33_spill] sm:$0xff]  ;;  %v8132_v22 = vld [vmem:[#allocation48_spill] sm:$0xff]  ;;  %v8134_v33 = vld [vmem:[#allocation39_spill] sm:$0xff] }
 0x415   :  { %v2311_v58 = vadd.f32 %v2295_v41, %v2274_v16  ;;  %4428 = vrcp.f32 %v1727_v55  ;;  %vm2674_vm6 = vcmp.ge.s32.totalorder %v2658_v28, 0  ;;  %v2882_v8 = vmul.f32 %v8030_v23, %v6701_v61 }
 0x416   :  { %v3025_v59 = vmul.f32 %v4463_v32, %v7950_v52  ;;  %4430 = vrcp.f32 %v1730_v18  ;;  %v3525_v49 = vadd.f32 %v3509_v48, %v3488_v17  ;;  %v3921_v57 = vsel %vm2343_vm5, 1.0, %v8123_v47  ;;  %v1737_v18 = vpop.f32.mrf.mxu0  ;;  %v8136_v32 = vld [vmem:[#allocation62_spill] sm:$0xff] }
 0x417   :  { %v3394_v1 = vmul.f32 %v7771_v35, %v6764_v42  ;;  %v3322_v9 = vadd.f32 %v3306_v11, %v2991_v39  ;;  %v2642_v20 = vadd.f32 %v2626_v44, %v2605_v0  ;;  %v2860_v16 = vadd.f32 %v8132_v22, %v8131_v56  ;;  %v6950_v0 = vld [vmem:[#allocation2 + $0x80] sm:$0xff] }
 0x418   :  { %v3079_v41 = vadd.f32 %v3063_v34, %v3025_v59  ;;  %4432 = vrcp.f32 %v1722_v54  ;;  %v1735_v55 = vadd.f32 1e-06, %v1734_v27  ;;  %v3937_v61 = vsel %vm2674_vm6, 1.0, %v8123_v47  ;;  %8133 = vst [vmem:[#allocation84_spill] sm:$0xff] %v6950_v0  ;;  %v8137_v59 = vld [vmem:[#allocation18_spill] sm:$0xff] }
 0x419   :  { %v3356_v28 = vmul.f32 %v4464_v60, %v8107_v3  ;;  %v1743_v48 = vadd.f32 1e-06, %v4121_v62  ;;  %v2423_v37 = vmul.f32 %v3921_v57, %v2311_v58  ;;  %v2898_v17 = vadd.f32 %v2882_v8, %v2860_v16  ;;  %v8138_v22 = vld [vmem:[#allocation22_spill] sm:$0xff] }
 0x41a   :  { %v3101_v42 = vmul.f32 %v7798_v29, %v6724_v43  ;;  %v1746_v39 = vadd.f32 1e-06, %v4122_v19  ;;  %v2920_v44 = vmul.f32 %v6950_v0, %v8078_v6  ;;  %v3139_v27 = vmul.f32 %v8050_v13, %v8134_v33  ;;  %v8135_v43 = vld [vmem:[#allocation6_spill] sm:$0xff]  ;;  %v8145_v33 = vld [vmem:[#allocation56_spill] sm:$0xff] }
 0x41b   :  { %v3410_v34 = vadd.f32 %v3394_v1, %v3356_v28  ;;  %v2754_v54 = vmul.f32 %v3937_v61, %v2642_v20  ;;  %v3208_v62 = vadd.s32 1, %v8126_v7  ;;  %v3432_v58 = vmul.f32 %v7800_v2, %v6766_v25  ;;  %v8139_v1 = vld [vmem:[#allocation63_spill] sm:$0xff]  ;;  %v8140_v25 = vld [vmem:[#allocation126_spill] sm:$0xff] }
 0x41c   :  { %v3117_v11 = vadd.f32 %v3101_v42, %v3079_v41  ;;  %4434 = vrcp.f32 %v1735_v55  ;;  %v1738_v8 = vadd.f32 1e-06, %v1737_v18  ;;  %v1921_v19 = vadd.s32 136, %v8135_v43  ;;  %v8141_v55 = vld [vmem:[#allocation26_spill] sm:$0xff] }
 0x41d   :  { %v2187_v57 = vmul.f32 %v8137_v59, %v8136_v32  ;;  %4436 = vrcp.f32 %v1743_v48  ;;  %v2936_v56 = vadd.f32 %v2920_v44, %v2898_v17  ;;  %v2957_v16 = vmul.f32 %v8117_v5, %v8138_v22  ;;  %v4081_v28 = vpop.f32.mrf.mxu1  ;;  %v6973_v44 = vld [vmem:[#allocation2 + $0x9e] sm:$0xff] }
 0x41e   :  { %v3470_v20 = vmul.f32 %v8068_v4, %v8139_v1  ;;  %4438 = vrcp.f32 %v1746_v39  ;;  %v3448_v41 = vadd.f32 %v3432_v58, %v3410_v34  ;;  %v3539_v61 = vadd.s32 2, %v8126_v7  ;;  %8143 = vst [vmem:[#allocation94_spill] sm:$0xff] %v6973_v44 }
 0x41f   :  { %v2149_v60 = vmul.f32 %v8141_v55, %v8140_v25  ;;  %v6971_v18 = vadd.f32 %v6909_v24, %v6906_v10  ;;  %v3637_v48 = vmul.f32 %v3972_v51, %v3525_v49  ;;  %v2770_v17 = vadd.f32 %v2754_v54, %v2423_v37  ;;  %v1395_v7 = vpop.f32.mrf.mxu1  ;;  %v6983_v24 = vld [vmem:[#allocation2 + $0xa6] sm:$0xff]  ;;  %v6987_v54 = vld [vmem:[#allocation2 + $0xae] sm:$0xff] }
 0x420   :  { %v3155_v42 = vadd.f32 %v3139_v27, %v3117_v11  ;;  %4440 = vrcp.f32 %v1738_v8  ;;  %vm3240_vm7 = vcmp.lt.s32.totalorder %v3208_v62, 8  ;;  %v6975_v1 = vand.u32 7, %v1921_v19  ;;  %8146 = vst [vmem:[#allocation69_spill] sm:$0xff] %v6983_v24  ;;  %8147 = vst [vmem:[#allocation64_spill] sm:$0xff] %v6987_v54 }
 0x421   :  { %8142 = vst [vmem:[#allocation93_spill] sm:$0xff] %v6971_v18  ;;  %v2203_v39 = vadd.f32 %v2187_v57, %v2149_v60  ;;  %v4427_v34 = vpop.eup %4426  ;;  %v6977_v58 = vadd.f32 %v3637_v48, %v3322_v9  ;;  %v2973_v0 = vadd.f32 %v2957_v16, %v2936_v56  ;;  %v3176_v22 = vmul.f32 %v8066_v15, %v8145_v33  ;;  %v4082_v8 = vpop.f32.mrf.mxu1 }
 0x422   :  { %v3507_v10 = vmul.f32 %v6754_v21, %v6799_v53  ;;  %v4429_v51 = vpop.eup %4428  ;;  %v1797_v49 = vmul.f32 %v4427_v34, %v1395_v7  ;;  %v3486_v37 = vadd.f32 %v3470_v20, %v3448_v41  ;;  %vm3571_vm8 = vcmp.lt.s32.totalorder %v3539_v61, 8  ;;  %v6994_v41 = vld [vmem:[#allocation2 + $0x9f] sm:$0xff]  ;;  %v6996_v34 = vld [vmem:[#allocation2 + $0xa7] sm:$0xff]  ;;  %v7008_v21 = vld [vmem:[#allocation2 + $0xaf] sm:$0xff] }
 0x423   :  { %8144 = vst [vmem:[#allocation110_spill] sm:$0xff] %v6977_v58  ;;  %v2225_v27 = vmul.f32 %v8109_v45, %v6973_v44  ;;  %v4431_v9 = vpop.eup %4430  ;;  %v1799_v11 = vmul.f32 %v4429_v51, %v4081_v28  ;;  %v2989_v19 = vadd.f32 %v2973_v0, %v2770_v17  ;;  %v3192_v57 = vadd.f32 %v3176_v22, %v3155_v42  ;;  %v1398_v58 = vpop.f32.mrf.mxu1  ;;  %v8150_v22 = vld [vmem:[#allocation77_spill] sm:$0xff]  ;;  %v8151_v28 = vld [vmem:[#allocation23_spill] sm:$0xff]  ;;  %v8152_v42 = vld [vmem:[#allocation78_spill] sm:$0xff] }
 0x424   :  { %v3953_v56 = vsel %vm3240_vm7, 1.0, %v8123_v47  ;;  %v1800_v16 = vmul.f32 %v4431_v9, %v4082_v8  ;;  %v2263_v48 = vmul.f32 %v8018_v38, %v6983_v24  ;;  %v2332_v20 = vadd.s32 4294967294, %v6975_v1  ;;  %8148 = vst [vmem:[#allocation65_spill] sm:$0xff] %v6994_v41  ;;  %8149 = vst [vmem:[#allocation70_spill] sm:$0xff] %v6996_v34  ;;  %v8155_v8 = vld [vmem:[#allocation53_spill] sm:$0xff]  ;;  %v8157_v44 = vld [vmem:[#allocation46_spill] sm:$0xff] }
 0x425   :  { %v2241_v60 = vadd.f32 %v2225_v27, %v2203_v39  ;;  %v4433_v7 = vpop.eup %4432  ;;  %v3970_v0 = vsel %vm3571_vm8, 1.0, %v8123_v47  ;;  %v2300_v62 = vmul.f32 %v7773_v63, %v6987_v54  ;;  %v2480_v17 = vmul.f32 %v8151_v28, %v8150_v22  ;;  %v8153_v39 = vld [vmem:[#allocation3_spill] sm:$0xff]  ;;  %v8154_v27 = vld [vmem:[#allocation68_spill] sm:$0xff]  ;;  %8156 = vst [vmem:[#allocation54_spill] sm:$0xff] %v7008_v21  ;;  %v4085_v33 = vpop.f32.mrf.mxu1 }
 0x426   :  { %v2518_v51 = vmul.f32 %v8153_v39, %v8152_v42  ;;  %v3658_v9 = vadd.f32 %v8154_v27, %v1797_v49  ;;  %v3661_v18 = vadd.f32 %v8155_v8, %v1800_v16  ;;  %v1798_v24 = vmul.f32 %v4433_v7, %v1398_v58  ;;  %v7018_v49 = vld [vmem:[%s7419_s9] ss:$0 sm:$0xff] }
 0x427   :  { %v3523_v53 = vadd.f32 %v3507_v10, %v3486_v37  ;;  %v3660_v61 = vadd.f32 %v8157_v44, %v1799_v11  ;;  %v3304_v4 = vmul.f32 %v3953_v56, %v3192_v57  ;;  %v2556_v54 = vmul.f32 %v5572_v26, %v6994_v41  ;;  %8158 = vst [vmem:[#allocation75_spill] sm:$0xff] %v7018_v49  ;;  %v8159_v16 = vld [vmem:[#allocation66_spill] sm:$0xff]  ;;  %v1411_v57 = vpop.f32.mrf.mxu1 }
 0x428   :  { %v2594_v63 = vmul.f32 %v8020_v36, %v6996_v34  ;;  %v3659_v58 = vadd.f32 %v8159_v16, %v1798_v24  ;;  %v2279_v10 = vadd.f32 %v2263_v48, %v2241_v60  ;;  %vm2348_vm9 = vcmp.ge.s32.totalorder %v2332_v20, 0 }
 0x429   :  { %v2663_v37 = vadd.s32 4294967295, %v6975_v1  ;;  %v4435_v44 = vpop.eup %4434  ;;  %v3684_v11 = vadd.f32 %v7018_v49, %v3661_v18  ;;  %v3320_v56 = vadd.f32 %v3304_v4, %v2989_v19  ;;  %v2534_v7 = vadd.f32 %v2518_v51, %v2480_v17  ;;  %v4086_v15 = vpop.f32.mrf.mxu1  ;;  %v7030_v4 = vld [vmem:[#allocation2 + $0x90] sm:$0xff] }
 0x42a   :  { %v2631_v27 = vmul.f32 %v7775_v14, %v7008_v21  ;;  %v4437_v8 = vpop.eup %4436  ;;  %v3681_v34 = vadd.f32 %v7018_v49, %v3658_v9  ;;  %v3682_v41 = vadd.f32 %v7018_v49, %v3659_v58  ;;  %v1801_v2 = vmul.f32 %v4435_v44, %v1411_v57  ;;  %8160 = vst [vmem:[#allocation82_spill] sm:$0xff] %v7030_v4  ;;  %v8161_v19 = vld [vmem:[#allocation12_spill] sm:$0xff]  ;;  %v7034_v58 = vld [vmem:[#allocation2 + $0xa0] sm:$0xff]  ;;  %v8165_v57 = vld [vmem:[#allocation27_spill] sm:$0xff] }
 0x42b   :  { %v3635_v24 = vmul.f32 %v3970_v0, %v3523_v53  ;;  %v4439_v60 = vpop.eup %4438  ;;  %v3683_v48 = vadd.f32 %v7018_v49, %v3660_v61  ;;  %v1803_v16 = vmul.f32 %v4437_v8, %v4085_v33  ;;  %v3926_v18 = vsel %vm2348_vm9, 1.0, %v8123_v47  ;;  %8162 = vst [vmem:[#allocation87_spill] sm:$0xff] %v7034_v58  ;;  %v7036_v53 = vld [vmem:[#allocation2 + $0xa8] sm:$0xff]  ;;  %v1414_v33 = vpop.f32.mrf.mxu1  ;;  %v8166_v14 = vld [vmem:[#allocation32_spill] sm:$0xff] }
 0x42c   :  { %v2811_v17 = vmul.f32 %v7030_v4, %v8161_v19  ;;  %v3697_v51 = vpack.c.bf16 %v3682_v41, %v3681_v34  ;;  %v1804_v21 = vmul.f32 %v4439_v60, %v4086_v15  ;;  %v2316_v9 = vadd.f32 %v2300_v62, %v2279_v10  ;;  %8163 = vst [vmem:[#allocation71_spill] sm:$0xff] %v7036_v53  ;;  %v8167_v4 = vld [vmem:[#allocation19_spill] sm:$0xff] }
 0x42d   :  { %vm2679_vm10 = vcmp.ge.s32.totalorder %v2663_v37, 0  ;;  %v4441_v0 = vpop.eup %4440  ;;  %v3698_v61 = vpack.c.bf16 %v3684_v11, %v3683_v48  ;;  %v7038_v44 = vadd.f32 %v3635_v24, %v3320_v56  ;;  %v2572_v20 = vadd.f32 %v2556_v54, %v2534_v7  ;;  %v8168_v62 = vld [vmem:[#allocation79_spill] sm:$0xff] }
 0x42e   :  { %v2849_v8 = vmul.f32 %v8165_v57, %v6878_v46  ;;  %v3662_v36 = vadd.f32 %v8166_v14, %v1801_v2  ;;  %v3665_v41 = vadd.f32 %v8167_v4, %v1804_v21  ;;  %v1802_v15 = vmul.f32 %v4441_v0, %v1414_v33  ;;  %4135 = vmatprep.mubr.msk.bf16.mxu1 %vm115_vm0, %v3697_v51  ;;  %v8169_v2 = vld [vmem:[#allocation81_spill] sm:$0xff]  ;;  %v7064_v0 = vld [vmem:[#allocation2 + $0xb0] sm:$0xff] }
 0x42f   :  { %8164 = vst [vmem:[#allocation92_spill] sm:$0xff] %v7038_v44  ;;  %v2185_v34 = vmul.f32 %v8137_v59, %v8128_v12  ;;  %v3664_v10 = vadd.f32 %v8168_v62, %v1803_v16  ;;  %4136 = vmatmul.mubr.msk.bf16.vlgmr.msra.gmra.mxu1 %vm115_vm0, %v3698_v61  ;;  %v3942_v54 = vsel %vm2679_vm10, 1.0, %v8123_v47  ;;  %v2887_v11 = vmul.f32 %v8030_v23, %v7034_v58  ;;  %v7111_v12 = vld [vmem:[#allocation2 + $0xb2] sm:$0xff] }
 0x430   :  { %v2925_v14 = vmul.f32 %v8078_v6, %v7036_v53  ;;  %v3663_v21 = vadd.f32 %v8169_v2, %v1802_v15  ;;  %v1919_v56 = vadd.s32 120, %v8135_v43  ;;  %v2147_v7 = vmul.f32 %v8141_v55, %v8125_v31  ;;  %8170 = vst [vmem:[#allocation85_spill] sm:$0xff] %v7064_v0  ;;  %v8171_v15 = vld [vmem:[#allocation61_spill] sm:$0xff]  ;;  %v7071_v2 = vld [vmem:[#allocation2 + $0xa1] sm:$0xff]  ;;  %8183 = vst [vmem:[#allocation88_spill] sm:$0xff] %v7111_v12 }
 0x431   :  { %v2516_v24 = vmul.f32 %v8153_v39, %v6714_v30  ;;  %v3688_v60 = vadd.f32 %v7018_v49, %v3665_v41  ;;  %v2428_v37 = vmul.f32 %v3926_v18, %v2316_v9  ;;  %v2610_v48 = vadd.f32 %v2594_v63, %v2572_v20  ;;  %8172 = vst [vmem:[#allocation89_spill] sm:$0xff] %v7071_v2  ;;  %v8173_v18 = vld [vmem:[#allocation83_spill] sm:$0xff]  ;;  %v8182_v30 = vld [vmem:[#allocation29_spill] sm:$0xff] }
 0x432   :  { %v2865_v16 = vadd.f32 %v2849_v8, %v2811_v17  ;;  %v3685_v4 = vadd.f32 %v7018_v49, %v3662_v36  ;;  %v3686_v51 = vadd.f32 %v7018_v49, %v3663_v21  ;;  %v2201_v61 = vadd.f32 %v2185_v34, %v2147_v7  ;;  %v7076_v9 = vld [vmem:[#allocation2 + $0xa9] sm:$0xff] }
 0x433   :  { %v2478_v33 = vmul.f32 %v8151_v28, %v8129_v50  ;;  %v3687_v31 = vadd.f32 %v7018_v49, %v3664_v10  ;;  %v3030_v62 = vmul.f32 %v7950_v52, %v8171_v15  ;;  %v3068_v63 = vmul.f32 %v7770_v40, %v8173_v18  ;;  %8174 = vst [vmem:[#allocation96_spill] sm:$0xff] %v7076_v9 }
 0x434   :  { %v3213_v36 = vadd.s32 1, %v6975_v1  ;;  %v3699_v17 = vpack.c.bf16 %v3686_v51, %v3685_v4  ;;  %v7078_v20 = vand.u32 7, %v1919_v56  ;;  %v2223_v50 = vmul.f32 %v8109_v45, %v8140_v25  ;;  %v7087_v4 = vld [vmem:[#allocation2 + $0xb1] sm:$0xff]  ;;  %v7089_v51 = vld [vmem:[#allocation2 + $0xa2] sm:$0xff] }
 0x435   :  { %v2532_v8 = vadd.f32 %v2516_v24, %v2478_v33  ;;  %v3700_v41 = vpack.c.bf16 %v3688_v60, %v3687_v31  ;;  %v2647_v34 = vadd.f32 %v2631_v27, %v2610_v48  ;;  %v2903_v10 = vadd.f32 %v2887_v11, %v2865_v16  ;;  %8175 = vst [vmem:[#allocation45_spill] sm:$0xff] %v7087_v4  ;;  %v8177_v60 = vld [vmem:[#allocation58_spill] sm:$0xff]  ;;  %v8178_v16 = vld [vmem:[#allocation91_spill] sm:$0xff] }
 0x436   :  { %v2962_v21 = vmul.f32 %v8117_v5, %v7064_v0  ;;  %4139 = vmatprep.mubr.msk.bf16.mxu1 %vm115_vm0, %v3699_v17  ;;  %v3106_v7 = vmul.f32 %v7798_v29, %v7071_v2  ;;  %8176 = vst [vmem:[#allocation43_spill] sm:$0xff] %v7089_v51  ;;  %v2239_v56 = vadd.f32 %v2223_v50, %v2201_v61  ;;  %v7102_v31 = vld [vmem:[#allocation2 + $0xaa] sm:$0xff]  ;;  %vm3245_vm11 = vcmp.lt.s32.totalorder %v3213_v36, 8  ;;  %v8180_v50 = vld [vmem:[#allocation9_spill] sm:$0xff]  ;;  %v8184_v0 = vld [vmem:[#allocation30_spill] sm:$0xff] }
 0x437   :  { %v2261_v49 = vmul.f32 %v8018_v38, %v8136_v32  ;;  %v2554_v27 = vmul.f32 %v5572_v26, %v8150_v22  ;;  %4140 = vmatmul.mubr.msk.bf16.gmra.mxu1 %vm115_vm0, %v3700_v41  ;;  %v3084_v11 = vadd.f32 %v3068_v63, %v3030_v62  ;;  %v3144_v24 = vmul.f32 %v8050_v13, %v7076_v9  ;;  %v8181_v63 = vld [vmem:[#allocation41_spill] sm:$0xff]  ;;  %v8190_v38 = vld [vmem:[#allocation7_spill] sm:$0xff] }
 0x438   :  { %v3361_v48 = vmul.f32 %v8107_v3, %v8177_v60  ;;  %v3399_v33 = vmul.f32 %v7771_v35, %v8178_v16  ;;  %8179 = vst [vmem:[#allocation95_spill] sm:$0xff] %v7102_v31  ;;  %v2330_v61 = vadd.s32 4294967294, %v7078_v20  ;;  %v2592_v44 = vmul.f32 %v8180_v50, %v8152_v42  ;;  %v8189_v50 = vld [vmem:[#allocation94_spill] sm:$0xff] }
 0x439   :  { %v2570_v17 = vadd.f32 %v2554_v27, %v2532_v8  ;;  %v2759_v41 = vmul.f32 %v3942_v54, %v2647_v34  ;;  %v2941_v62 = vadd.f32 %v2925_v14, %v2903_v10  ;;  %v3181_v22 = vmul.f32 %v8181_v63, %v7087_v4  ;;  %v8186_v54 = vld [vmem:[#allocation22_spill] sm:$0xff]  ;;  %v8187_v34 = vld [vmem:[#allocation39_spill] sm:$0xff]  ;;  %v8188_v4 = vld [vmem:[#allocation56_spill] sm:$0xff] }
 0x43a   :  { %v3437_v9 = vmul.f32 %v8182_v30, %v7089_v51  ;;  %v3122_v25 = vadd.f32 %v3106_v7, %v3084_v11  ;;  %v3475_v36 = vmul.f32 %v8184_v0, %v7102_v31  ;;  %v2277_v53 = vadd.f32 %v2261_v49, %v2239_v56  ;;  %v8191_v31 = vld [vmem:[#allocation76_spill] sm:$0xff] }
 0x43b   :  { %v2661_v8 = vadd.s32 4294967295, %v7078_v20  ;;  %v7117_v27 = vsel %vm3245_vm11, 1.0, %v8123_v47  ;;  %v2847_v14 = vmul.f32 %v8165_v57, %v8186_v54  ;;  %v3028_v10 = vmul.f32 %v7950_v52, %v8187_v34 }
 0x43c   :  { %8185 = vst [vmem:[#allocation50_spill] sm:$0xff] %v7117_v27  ;;  %v3066_v7 = vmul.f32 %v7770_v40, %v8188_v4  ;;  %v3415_v11 = vadd.f32 %v3399_v33, %v3361_v48  ;;  %v2298_v51 = vmul.f32 %v8190_v38, %v8189_v50  ;;  %vm2346_vm12 = vcmp.ge.s32.totalorder %v2330_v61, 0  ;;  %v8193_v27 = vld [vmem:[#allocation84_spill] sm:$0xff]  ;;  %v8194_v4 = vld [vmem:[#allocation65_spill] sm:$0xff] }
 0x43d   :  { %v2608_v49 = vadd.f32 %v2592_v44, %v2570_v17  ;;  %v2775_v56 = vadd.f32 %v2759_v41, %v2428_v37  ;;  %v7129_v0 = vmul.f32 %v8191_v31, %v7111_v12  ;;  %v2809_v54 = vmul.f32 %v8193_v27, %v8161_v19  ;;  %v8195_v48 = vld [vmem:[#allocation8_spill] sm:$0xff]  ;;  %v8196_v27 = vld [vmem:[#allocation82_spill] sm:$0xff] }
 0x43e   :  { %v3104_v34 = vmul.f32 %v7798_v29, %v8171_v15  ;;  %v2978_v52 = vadd.f32 %v2962_v21, %v2941_v62  ;;  %v2314_v57 = vadd.f32 %v2298_v51, %v2277_v53  ;;  %v2629_v33 = vmul.f32 %v8195_v48, %v8194_v4  ;;  %v8197_v53 = vld [vmem:[#allocation63_spill] sm:$0xff]  ;;  %v8198_v62 = vld [vmem:[#allocation80_spill] sm:$0xff] }
 0x43f   :  { %8192 = vst [vmem:[#allocation99_spill] sm:$0xff] %v7129_v0  ;;  %vm2677_vm13 = vcmp.ge.s32.totalorder %v2661_v8, 0  ;;  %v3544_v61 = vadd.s32 2, %v6975_v1  ;;  %v3924_v44 = vsel %vm2346_vm12, 1.0, %v8123_v47  ;;  %v2863_v37 = vadd.f32 %v2847_v14, %v2809_v54 }
 0x440   :  { %v3082_v17 = vadd.f32 %v3066_v7, %v3028_v10  ;;  %v3160_v41 = vadd.f32 %v3144_v24, %v3122_v25  ;;  %v3453_v0 = vadd.f32 %v3437_v9, %v3415_v11  ;;  %v2645_v12 = vadd.f32 %v2629_v33, %v2608_v49  ;;  %v4125_v33 = vpop.f32.mrf.mxu0 }
 0x441   :  { %v2885_v40 = vmul.f32 %v8196_v27, %v8030_v23  ;;  %v3940_v15 = vsel %vm2677_vm13, 1.0, %v8123_v47  ;;  %v3359_v51 = vmul.f32 %v8107_v3, %v8197_v53  ;;  %v3397_v8 = vmul.f32 %v7771_v35, %v8198_v62  ;;  %v8203_v62 = vld [vmem:[#allocation30_spill] sm:$0xff] }
 0x442   :  { %v3120_v21 = vadd.f32 %v3104_v34, %v3082_v17  ;;  %v7146_v1 = vadd.f32 %v2978_v52, %v2775_v56  ;;  %v2426_v29 = vmul.f32 %v3924_v44, %v2314_v57  ;;  %v2923_v25 = vmul.f32 %v8078_v6, %v6878_v46 }
 0x443   :  { %v1922_v9 = vadd.s32 144, %v8135_v43  ;;  %v2901_v24 = vadd.f32 %v2885_v40, %v2863_v37  ;;  %v3142_v14 = vmul.f32 %v8050_v13, %v8173_v18  ;;  %v3211_v10 = vadd.s32 1, %v7078_v20 }
 0x444   :  { %8199 = vst [vmem:[#allocation100_spill] sm:$0xff] %v7146_v1  ;;  %v3435_v7 = vmul.f32 %v8182_v30, %v8177_v60  ;;  %v2757_v11 = vmul.f32 %v3940_v15, %v2645_v12  ;;  %v3179_v52 = vmul.f32 %v8181_v63, %v7071_v2  ;;  %v2150_v57 = vmul.f32 %v8141_v55, %v8136_v32  ;;  %v8200_v15 = vld [vmem:[#allocation69_spill] sm:$0xff]  ;;  %v8201_v1 = vld [vmem:[#allocation70_spill] sm:$0xff] }
 0x445   :  { %v2188_v49 = vmul.f32 %v8137_v59, %v8189_v50  ;;  %v3158_v56 = vadd.f32 %v3142_v14, %v3120_v21  ;;  %v3413_v40 = vadd.f32 %v3397_v8, %v3359_v51  ;;  %v2481_v54 = vmul.f32 %v8151_v28, %v8152_v42 }
 0x446   :  { %v2519_v34 = vmul.f32 %v8153_v39, %v8194_v4  ;;  %v3197_v44 = vadd.f32 %v3181_v22, %v3160_v41  ;;  %vm3576_vm14 = vcmp.lt.s32.totalorder %v3544_v61, 8  ;;  %v7166_v12 = vand.u32 7, %v1922_v9  ;;  %v8209_v61 = vld [vmem:[#allocation25_spill] sm:$0xff] }
 0x447   :  { %v2226_v37 = vmul.f32 %v8109_v45, %v8200_v15  ;;  %v2939_v17 = vadd.f32 %v2923_v25, %v2901_v24  ;;  %vm3243_vm15 = vcmp.lt.s32.totalorder %v3211_v10, 8  ;;  %v3451_v53 = vadd.f32 %v3435_v7, %v3413_v40  ;;  %v1750_v25 = vpop.f32.mrf.mxu0  ;;  %v2281_v10 = vld [vmem:[#allocation2 + $0xb6] sm:$0xff] }
 0x448   :  { %v2557_v21 = vmul.f32 %v5572_v26, %v8201_v1  ;;  %v7172_v51 = vadd.f32 %v3475_v36, %v3453_v0  ;;  %v2960_v8 = vmul.f32 %v8117_v5, %v7034_v58  ;;  %v3542_v14 = vadd.s32 2, %v7078_v20 }
 0x449   :  { %v2204_v22 = vadd.f32 %v2188_v49, %v2150_v57  ;;  %v2773_v41 = vadd.f32 %v2757_v11, %v2426_v29  ;;  %v3195_v9 = vadd.f32 %v3179_v52, %v3158_v56  ;;  %v3473_v60 = vmul.f32 %v8203_v62, %v8178_v16  ;;  %v8205_v57 = vld [vmem:[#allocation43_spill] sm:$0xff]  ;;  %v8206_v52 = vld [vmem:[#allocation50_spill] sm:$0xff]  ;;  %v8208_v56 = vld [vmem:[#allocation64_spill] sm:$0xff] }
 0x44a   :  { %8202 = vst [vmem:[#allocation97_spill] sm:$0xff] %v7172_v51  ;;  %v2535_v27 = vadd.f32 %v2519_v34, %v2481_v54  ;;  %v7181_v24 = vsel %vm3576_vm14, 1.0, %v8123_v47  ;;  %v3956_v0 = vsel %vm3243_vm15, 1.0, %v8123_v47  ;;  %v2333_v7 = vadd.s32 4294967294, %v7166_v12  ;;  %v2612_v34 = vld [vmem:[#allocation2 + $0xb7] sm:$0xff]  ;;  %v8223_v62 = vld [vmem:[#allocation126_spill] sm:$0xff] }
 0x44b   :  { %8204 = vst [vmem:[#allocation40_spill] sm:$0xff] %v7181_v24  ;;  %v2242_v36 = vadd.f32 %v2226_v37, %v2204_v22  ;;  %v2976_v40 = vadd.f32 %v2960_v8, %v2939_v17  ;;  %v3489_v20 = vadd.f32 %v3473_v60, %v3451_v53  ;;  %v3510_v29 = vmul.f32 %v8191_v31, %v8205_v57  ;;  %v8212_v17 = vld [vmem:[#allocation54_spill] sm:$0xff]  ;;  %v8213_v53 = vld [vmem:[#allocation9_spill] sm:$0xff] }
 0x44c   :  { %v2573_v11 = vadd.f32 %v2557_v21, %v2535_v27  ;;  %v7188_v49 = vmul.f32 %v8206_v52, %v3197_v44  ;;  %vm3574_vm1 = vcmp.lt.s32.totalorder %v3542_v14, 8  ;;  %v2264_v54 = vmul.f32 %v8209_v61, %v8208_v56  ;;  %v4126_v27 = vpop.f32.mrf.mxu0  ;;  %v2943_v8 = vld [vmem:[#allocation2 + $0xb8] sm:$0xff] }
 0x44d   :  { %v2664_v24 = vadd.s32 4294967295, %v7166_v12  ;;  %v7193_v37 = vadd.f32 %v2976_v40, %v2773_v41  ;;  %v7195_v22 = vmul.f32 %v3956_v0, %v3195_v9  ;;  %v2301_v60 = vmul.f32 %v8190_v38, %v2281_v10  ;;  %v8214_v14 = vld [vmem:[#allocation21_spill] sm:$0xff]  ;;  %v8217_v10 = vld [vmem:[#allocation27_spill] sm:$0xff] }
 0x44e   :  { %8207 = vst [vmem:[#allocation98_spill] sm:$0xff] %v7188_v49  ;;  %v2595_v31 = vmul.f32 %v8213_v53, %v8212_v17  ;;  %v2280_v21 = vadd.f32 %v2264_v54, %v2242_v36  ;;  %vm2349_vm2 = vcmp.ge.s32.totalorder %v2333_v7, 0  ;;  %v2812_v44 = vmul.f32 %v8161_v19, %v6878_v46  ;;  %v8218_v7 = vld [vmem:[#allocation71_spill] sm:$0xff]  ;;  %v8219_v54 = vld [vmem:[#allocation14_spill] sm:$0xff] }
 0x44f   :  { %8210 = vst [vmem:[#allocation51_spill] sm:$0xff] %v7193_v37  ;;  %8211 = vst [vmem:[#allocation57_spill] sm:$0xff] %v7195_v22  ;;  %v3069_v52 = vmul.f32 %v8214_v14, %v7071_v2  ;;  %v7204_v56 = vadd.f32 %v3510_v29, %v3489_v20  ;;  %v7207_v41 = vsel %vm3574_vm1, 1.0, %v8123_v47  ;;  %v2632_v0 = vmul.f32 %v8195_v48, %v2612_v34  ;;  %v8220_v20 = vld [vmem:[#allocation85_spill] sm:$0xff]  ;;  %v1753_v34 = vpop.f32.mrf.mxu0 }
 0x450   :  { %8216 = vst [vmem:[#allocation35_spill] sm:$0xff] %v7207_v41  ;;  %v2611_v9 = vadd.f32 %v2595_v31, %v2573_v11  ;;  %vm2680_vm3 = vcmp.ge.s32.totalorder %v2664_v24, 0  ;;  %v2850_v36 = vmul.f32 %v8217_v10, %v7034_v58  ;;  %v2888_v40 = vmul.f32 %v8030_v23, %v8218_v7  ;;  %v8222_v7 = vld [vmem:[#allocation74_spill] sm:$0xff] }
 0x451   :  { %8215 = vst [vmem:[#allocation130_spill] sm:$0xff] %v7204_v56  ;;  %v3031_v17 = vmul.f32 %v8219_v54, %v8173_v18  ;;  %v3927_v22 = vsel %vm2349_vm2, 1.0, %v8123_v47  ;;  %v2926_v29 = vmul.f32 %v8078_v6, %v8220_v20  ;;  %v7220_v41 = vmul.f32 %v8117_v5, %v2943_v8  ;;  %v4129_v20 = vpop.f32.mrf.mxu0  ;;  %v8224_v8 = vld [vmem:[#allocation96_spill] sm:$0xff] }
 0x452   :  { %v1920_v11 = vadd.s32 128, %v8135_v43  ;;  %v1759_v24 = vadd.f32 1e-06, %v4125_v33  ;;  %v2317_v31 = vadd.f32 %v2301_v60, %v2280_v21  ;;  %v2866_v56 = vadd.f32 %v2850_v36, %v2812_v44  ;;  %v8226_v43 = vld [vmem:[#allocation72_spill] sm:$0xff]  ;;  %v8227_v60 = vld [vmem:[#allocation77_spill] sm:$0xff] }
 0x453   :  { %8221 = vst [vmem:[#allocation133_spill] sm:$0xff] %v7220_v41  ;;  %v3085_v37 = vadd.f32 %v3069_v52, %v3031_v17  ;;  %v2648_v51 = vadd.f32 %v2632_v0, %v2611_v9  ;;  %v3943_v49 = vsel %vm2680_vm3, 1.0, %v8123_v47  ;;  %v2148_v58 = vmul.f32 %v8141_v55, %v8222_v7  ;;  %v8225_v41 = vld [vmem:[#allocation4_spill] sm:$0xff]  ;;  %v3162_v52 = vld [vmem:[#allocation2 + $0xb9] sm:$0xff] }
 0x454   :  { %v2186_v2 = vmul.f32 %v8137_v59, %v8223_v62  ;;  %v2904_v6 = vadd.f32 %v2888_v40, %v2866_v56  ;;  %v3107_v5 = vmul.f32 %v8225_v41, %v8224_v8  ;;  %v2479_v33 = vmul.f32 %v8151_v28, %v8226_v43  ;;  %v8228_v56 = vld [vmem:[#allocation45_spill] sm:$0xff]  ;;  %v1766_v40 = vpop.f32.mrf.mxu0 }
 0x455   :  { %v2517_v21 = vmul.f32 %v8153_v39, %v8227_v60  ;;  %v1751_v44 = vadd.f32 1e-06, %v1750_v25  ;;  %v3214_v9 = vadd.s32 1, %v7166_v12  ;;  %v7235_v0 = vand.u32 7, %v1920_v11 }
 0x456   :  { %v2224_v59 = vmul.f32 %v8109_v45, %v8136_v32  ;;  %v1762_v55 = vadd.f32 1e-06, %v4126_v27  ;;  %v3123_v62 = vadd.f32 %v3107_v5, %v3085_v37  ;;  %v3145_v36 = vmul.f32 %v8050_v13, %v8228_v56 }
 0x457   :  { %v2555_v28 = vmul.f32 %v5572_v26, %v8152_v42  ;;  %4442 = vrcp.f32 %v1759_v24  ;;  %v2429_v7 = vmul.f32 %v3927_v22, %v2317_v31  ;;  %v2760_v39 = vmul.f32 %v3943_v49, %v2648_v51  ;;  %v4130_v22 = vpop.f32.mrf.mxu0  ;;  %v8229_v31 = vld [vmem:[#allocation61_spill] sm:$0xff] }
 0x458   :  { %v2202_v25 = vadd.f32 %v2186_v2, %v2148_v58  ;;  %v7243_v17 = vadd.f32 %v2926_v29, %v2904_v6  ;;  %v7246_v11 = vmul.f32 %v8181_v63, %v3162_v52  ;;  %v3400_v45 = vmul.f32 %v7771_v35, %v8205_v57  ;;  %v8230_v52 = vld [vmem:[#allocation56_spill] sm:$0xff] }
 0x459   :  { %v2533_v5 = vadd.f32 %v2517_v21, %v2479_v33  ;;  %4444 = vrcp.f32 %v1751_v44  ;;  %vm3246_vm4 = vcmp.lt.s32.totalorder %v3214_v9, 8  ;;  %v2331_v37 = vadd.s32 4294967294, %v7235_v0  ;;  %v4467_v21 = vld [vmem:[#allocation2 + $0x88] sm:$0xff] }
 0x45a   :  { %v2240_v32 = vadd.f32 %v2224_v59, %v2202_v25  ;;  %4446 = vrcp.f32 %v1762_v55  ;;  %v3161_v26 = vadd.f32 %v3145_v36, %v3123_v62  ;;  %v3362_v42 = vmul.f32 %v8107_v3, %v8178_v16 }
 0x45b   :  { %v2571_v58 = vadd.f32 %v2555_v28, %v2533_v5  ;;  %v1754_v6 = vadd.f32 1e-06, %v1753_v34  ;;  %v7253_v2 = vadd.f32 %v2760_v39, %v2429_v7  ;;  %v2262_v51 = vmul.f32 %v8209_v61, %v8189_v50  ;;  %v8234_v7 = vld [vmem:[#allocation80_spill] sm:$0xff] }
 0x45c   :  { %v2662_v49 = vadd.s32 4294967295, %v7235_v0  ;;  %v7259_v27 = vsel %vm3246_vm4, 1.0, %v8123_v47  ;;  %v3416_v29 = vadd.f32 %v3400_v45, %v3362_v42  ;;  %v2593_v24 = vmul.f32 %v8213_v53, %v8194_v4  ;;  %v8231_v53 = vld [vmem:[#allocation95_spill] sm:$0xff]  ;;  %v8235_v45 = vld [vmem:[#allocation89_spill] sm:$0xff] }
 0x45d   :  { %v3067_v43 = vmul.f32 %v8214_v14, %v8229_v31  ;;  %v1775_v33 = vadd.f32 1e-06, %v4129_v20  ;;  %v2278_v34 = vadd.f32 %v2262_v51, %v2240_v32  ;;  %v2299_v60 = vmul.f32 %v8190_v38, %v8200_v15  ;;  %v1769_v20 = vpop.f32.mrf.mxu0  ;;  %v8232_v38 = vld [vmem:[#allocation82_spill] sm:$0xff] }
 0x45e   :  { %vm2347_vm5 = vcmp.ge.s32.totalorder %v2331_v37, 0  ;;  %v2609_v50 = vadd.f32 %v2593_v24, %v2571_v58  ;;  %v2630_v61 = vmul.f32 %v8195_v48, %v8201_v1  ;;  %v2810_v44 = vmul.f32 %v4467_v21, %v8161_v19  ;;  %v8233_v1 = vld [vmem:[#allocation58_spill] sm:$0xff] }
 0x45f   :  { %v3029_v9 = vmul.f32 %v8219_v54, %v8230_v52  ;;  %4448 = vrcp.f32 %v1754_v6  ;;  %v1767_v4 = vadd.f32 1e-06, %v1766_v40  ;;  %v3438_v14 = vmul.f32 %v8182_v30, %v8231_v53  ;;  %v3493_v6 = vld [vmem:[#allocation2 + $0xba] sm:$0xff] }
 0x460   :  { %vm2678_vm6 = vcmp.ge.s32.totalorder %v2662_v49, 0  ;;  %v2848_v15 = vmul.f32 %v8232_v38, %v8217_v10  ;;  %v2886_v59 = vmul.f32 %v8030_v23, %v6878_v46  ;;  %v3398_v19 = vmul.f32 %v7771_v35, %v8233_v1 }
 0x461   :  { %v3083_v48 = vadd.f32 %v3067_v43, %v3029_v9  ;;  %4450 = vrcp.f32 %v1775_v33  ;;  %v1778_v55 = vadd.f32 1e-06, %v4130_v22  ;;  %v2315_v54 = vadd.f32 %v2299_v60, %v2278_v34  ;;  %v8239_v22 = vld [vmem:[#allocation28_spill] sm:$0xff]  ;;  %v8240_v33 = vld [vmem:[#allocation71_spill] sm:$0xff]  ;;  %v8242_v9 = vld [vmem:[#allocation133_spill] sm:$0xff] }
 0x462   :  { %v3925_v62 = vsel %vm2347_vm5, 1.0, %v8123_v47  ;;  %v2646_v56 = vadd.f32 %v2630_v61, %v2609_v50  ;;  %v2864_v36 = vadd.f32 %v2848_v15, %v2810_v44  ;;  %v3105_v28 = vmul.f32 %v8225_v41, %v8173_v18  ;;  %v8236_v18 = vld [vmem:[#allocation88_spill] sm:$0xff]  ;;  %v8237_v41 = vld [vmem:[#allocation30_spill] sm:$0xff]  ;;  %v8241_v34 = vld [vmem:[#allocation15_spill] sm:$0xff] }
 0x463   :  { %v3360_v10 = vmul.f32 %v8107_v3, %v8234_v7  ;;  %4452 = vrcp.f32 %v1767_v4  ;;  %v1770_v23 = vadd.f32 1e-06, %v1769_v20  ;;  %v3545_v46 = vadd.s32 2, %v7166_v12  ;;  %v8238_v12 = vld [vmem:[#allocation87_spill] sm:$0xff]  ;;  %v8244_v7 = vld [vmem:[#allocation110_spill] sm:$0xff] }
 0x464   :  { %v3941_v35 = vsel %vm2678_vm6, 1.0, %v8123_v47  ;;  %v4443_v39 = vpop.eup %4442  ;;  %v2902_v25 = vadd.f32 %v2886_v59, %v2864_v36  ;;  %v3121_v40 = vadd.f32 %v3105_v28, %v3083_v48  ;;  %v3143_v5 = vmul.f32 %v8050_v13, %v8235_v45  ;;  %v8243_v28 = vld [vmem:[#allocation93_spill] sm:$0xff] }
 0x465   :  { %v3414_v32 = vadd.f32 %v3398_v19, %v3360_v10  ;;  %4454 = vrcp.f32 %v1778_v55  ;;  %v3454_v37 = vadd.f32 %v3438_v14, %v3416_v29  ;;  %v3476_v42 = vmul.f32 %v8237_v41, %v8236_v18  ;;  %v8250_v18 = vld [vmem:[#allocation51_spill] sm:$0xff] }
 0x466   :  { %v2427_v3 = vmul.f32 %v3925_v62, %v2315_v54  ;;  %v4445_v58 = vpop.eup %4444  ;;  %v2758_v51 = vmul.f32 %v3941_v35, %v2646_v56  ;;  %v2924_v49 = vmul.f32 %v8239_v22, %v8238_v12  ;;  %v3212_v24 = vadd.s32 1, %v7235_v0  ;;  %v8253_v22 = vld [vmem:[#allocation75_spill] sm:$0xff] }
 0x467   :  { %v3436_v31 = vmul.f32 %v8182_v30, %v8178_v16  ;;  %v4447_v43 = vpop.eup %4446  ;;  %4456 = vrcp.f32 %v1770_v23  ;;  %v4105_v13 = vpop.f32.mrf.mxu1  ;;  %v3198_v29 = vadd.f32 %v7246_v11, %v3161_v26  ;;  %vm3577_vm7 = vcmp.lt.s32.totalorder %v3545_v46, 8  ;;  %v4468_v16 = vld [vmem:[%s7417_s8 + $0x18] ss:$0 sm:$0xff]  ;;  %v8245_v46 = vld [vmem:[#allocation90_spill] sm:$0xff] }
 0x468   :  { %v2961_v60 = vmul.f32 %v8241_v34, %v8240_v33  ;;  %v2940_v50 = vadd.f32 %v2924_v49, %v2902_v25  ;;  %v3159_v61 = vadd.f32 %v3143_v5, %v3121_v40  ;;  %v3474_v44 = vmul.f32 %v8237_v41, %v8205_v57  ;;  %v8246_v25 = vld [vmem:[#allocation100_spill] sm:$0xff]  ;;  %v8247_v40 = vld [vmem:[#allocation98_spill] sm:$0xff]  ;;  %v8248_v5 = vld [vmem:[#allocation97_spill] sm:$0xff] }
 0x469   :  { %v3452_v21 = vadd.f32 %v3436_v31, %v3414_v32  ;;  %v1621_v52 = vpop.f32.mrf.mxu1  ;;  %v2979_v4 = vadd.f32 %v8242_v9, %v7243_v17  ;;  %v3492_v30 = vadd.f32 %v3476_v42, %v3454_v37  ;;  %v3513_v11 = vmul.f32 %v4468_v16, %v3493_v6  ;;  %v8249_v32 = vld [vmem:[#allocation99_spill] sm:$0xff]  ;;  %v8251_v41 = vld [vmem:[#allocation57_spill] sm:$0xff]  ;;  %v8254_v31 = vld [vmem:[#allocation130_spill] sm:$0xff] }
 0x46a   :  { %v3543_v26 = vadd.s32 2, %v7235_v0  ;;  %v1805_v14 = vmul.f32 %v4445_v58, %v1621_v52  ;;  %v2774_v20 = vadd.f32 %v2758_v51, %v2427_v3  ;;  %v3180_v38 = vmul.f32 %v8181_v63, %v8224_v8  ;;  %v8252_v3 = vld [vmem:[#allocation92_spill] sm:$0xff] }
 0x46b   :  { %vm3244_vm8 = vcmp.lt.s32.totalorder %v3212_v24, 8  ;;  %v1807_v15 = vmul.f32 %v4443_v39, %v4105_v13  ;;  %v4106_v57 = vpop.f32.mrf.mxu1  ;;  %v2995_v59 = vadd.f32 %v2979_v4, %v7253_v2  ;;  %v3310_v17 = vmul.f32 %v7259_v27, %v3198_v29  ;;  %v8256_v9 = vld [vmem:[#allocation40_spill] sm:$0xff] }
 0x46c   :  { %v3976_v48 = vsel %vm3577_vm7, 1.0, %v8123_v47  ;;  %v4449_v1 = vpop.eup %4448  ;;  %v1808_v19 = vmul.f32 %v4447_v43, %v4106_v57  ;;  %v2977_v55 = vadd.f32 %v2961_v60, %v2940_v50  ;;  %v3196_v54 = vadd.f32 %v3180_v38, %v3159_v61  ;;  %v8255_v43 = vld [vmem:[#allocation35_spill] sm:$0xff] }
 0x46d   :  { %v3490_v0 = vadd.f32 %v3474_v44, %v3452_v21  ;;  %v1624_v62 = vpop.f32.mrf.mxu1  ;;  %v3529_v56 = vadd.f32 %v3513_v11, %v3492_v30  ;;  %v3957_v36 = vsel %vm3244_vm8, 1.0, %v8123_v47  ;;  %v3511_v63 = vmul.f32 %v4468_v16, %v8231_v53 }
 0x46e   :  { %vm3575_vm9 = vcmp.lt.s32.totalorder %v3543_v26, 8  ;;  %v4451_v8 = vpop.eup %4450  ;;  %v3666_v2 = vadd.f32 %v8243_v28, %v1805_v14  ;;  %v3669_v27 = vadd.f32 %v8244_v7, %v1808_v19  ;;  %v1806_v10 = vmul.f32 %v4449_v1, %v1624_v62 }
 0x46f   :  { %v2993_v23 = vadd.f32 %v2977_v55, %v2774_v20  ;;  %v3668_v35 = vadd.f32 %v8245_v46, %v1807_v15  ;;  %v4109_v39 = vpop.f32.mrf.mxu1  ;;  %v3325_v45 = vadd.f32 %v8247_v40, %v8246_v25  ;;  %v3528_v37 = vadd.f32 %v8249_v32, %v8248_v5 }
 0x470   :  { %v3323_v53 = vadd.f32 %v8251_v41, %v8250_v18  ;;  %v4453_v42 = vpop.eup %4452  ;;  %v3667_v58 = vadd.f32 %v8252_v3, %v1806_v10  ;;  %v3326_v6 = vadd.f32 %v3310_v17, %v2995_v59  ;;  %v3308_v51 = vmul.f32 %v3957_v36, %v3196_v54 }
 0x471   :  { %v3527_v12 = vadd.f32 %v3511_v63, %v3490_v0  ;;  %v3692_v49 = vadd.f32 %v8253_v22, %v3669_v27  ;;  %v1637_v24 = vpop.f32.mrf.mxu1  ;;  %v3638_v13 = vmul.f32 %v8255_v43, %v8254_v31  ;;  %v3641_v29 = vmul.f32 %v3976_v48, %v3529_v56 }
 0x472   :  { %v3974_v33 = vsel %vm3575_vm9, 1.0, %v8123_v47  ;;  %v4455_v34 = vpop.eup %4454  ;;  %v3689_v60 = vadd.f32 %v8253_v22, %v3666_v2  ;;  %v3690_v50 = vadd.f32 %v8253_v22, %v3667_v58  ;;  %v1809_v61 = vmul.f32 %v4453_v42, %v1637_v24 }
 0x473   :  { %v3324_v21 = vadd.f32 %v3308_v51, %v2993_v23  ;;  %v3691_v44 = vadd.f32 %v8253_v22, %v3668_v35  ;;  %v1811_v52 = vmul.f32 %v4451_v8, %v4109_v39  ;;  %v3640_v4 = vmul.f32 %v8256_v9, %v3528_v37  ;;  %v4110_v16 = vpop.f32.mrf.mxu1  ;;  %v3978_v8 = vld [vmem:[%s7420_s4] ss:$0 sm:$0xff] }
 0x474   :  { %v3654_v30 = vadd.f32 %v3638_v13, %v3323_v53  ;;  %v4457_v11 = vpop.eup %4456  ;;  %v3701_v14 = vpack.c.bf16 %v3690_v50, %v3689_v60  ;;  %v1812_v20 = vmul.f32 %v4455_v34, %v4110_v16  ;;  %v3657_v38 = vadd.f32 %v3641_v29, %v3326_v6 }
 0x475   :  { %v3639_v26 = vmul.f32 %v3974_v33, %v3527_v12  ;;  %v3702_v47 = vpack.c.bf16 %v3692_v49, %v3691_v44  ;;  %v3656_v15 = vadd.f32 %v3640_v4, %v3325_v45  ;;  %v1640_v57 = vpop.f32.mrf.mxu1 }
 0x476   :  { %v3670_v59 = vadd.f32 %v3654_v30, %v1809_v61  ;;  %v3673_v17 = vadd.f32 %v3657_v38, %v1812_v20  ;;  %v1810_v48 = vmul.f32 %v4457_v11, %v1640_v57  ;;  %4143 = vmatprep.mubr.msk.bf16.mxu1 %vm115_vm0, %v3701_v14 }
 0x477   :  { %v3655_v1 = vadd.f32 %v3639_v26, %v3324_v21  ;;  %v3672_v19 = vadd.f32 %v3656_v15, %v1811_v52  ;;  %4144 = vmatmul.mubr.msk.bf16.gmra.mxu1 %vm115_vm0, %v3702_v47 }
 0x478   :  { %v3696_v54 = vadd.f32 %v8253_v22, %v3673_v17  ;;  %v3693_v0 = vadd.f32 %v8253_v22, %v3670_v59 }
 0x479   :  { %v3671_v55 = vadd.f32 %v3655_v1, %v1810_v48  ;;  %v3695_v56 = vadd.f32 %v8253_v22, %v3672_v19 }
 0x47b   :  { %v3694_v62 = vadd.f32 %v8253_v22, %v3671_v55  ;;  %v3704_v63 = vpack.c.bf16 %v3696_v54, %v3695_v56 }
 0x47d   :  { %v3703_v36 = vpack.c.bf16 %v3694_v62, %v3693_v0 }
 0x47f   :  { %4147 = vmatprep.mubr.msk.bf16.mxu1 %vm115_vm0, %v3703_v36 }
 0x480   :  { %4148 = vmatmul.mubr.msk.bf16.gmra.mxu1 %vm115_vm0, %v3704_v63 }
 0x4ef   :  { %v4137_v28 = vpop.f32.mrf.mxu1 }
 0x4f0   :  { %v3795_v2 = vadd.f32 %v4137_v28, %v3978_v8 }
 0x4f1   :  { %v3786_v7 = vpop.f32.mrf.mxu1 }
 0x4f2   :  { %3851 = vst.msk [vmem:[%s7421_s10 + $0x10] sm:$0xff] %vm115_vm0, %v3795_v2  ;;  %v3787_v27 = vadd.f32 %v3978_v8, %v3786_v7 }
 0x4f3   :  { %v4138_v10 = vpop.f32.mrf.mxu1 }
 0x4f4   :  { %3849 = vst.msk [vmem:[%s7421_s10] sm:$0xff] %vm115_vm0, %v3787_v27  ;;  %v3798_v23 = vadd.f32 %v4138_v10, %v3978_v8 }
 0x4f5   :  { %v3789_v46 = vpop.f32.mrf.mxu1 }
 0x4f6   :  { %3852 = vst.msk [vmem:[%s7421_s10 + $0x18] sm:$0xff] %vm115_vm0, %v3798_v23  ;;  %v3790_v35 = vadd.f32 %v3978_v8, %v3789_v46 }
 0x4f7   :  { %v4141_v39 = vpop.f32.mrf.mxu1 }
 0x4f8   :  { %3850 = vst.msk [vmem:[%s7421_s10 + $0x8] sm:$0xff] %vm115_vm0, %v3790_v35  ;;  %v3811_v25 = vadd.f32 %v4141_v39, %v3978_v8 }
 0x4f9   :  { %v3802_v40 = vpop.f32.mrf.mxu1 }
 0x4fa   :  { %3855 = vst.msk [vmem:[%s7421_s10 + $0x30] sm:$0xff] %vm115_vm0, %v3811_v25  ;;  %v3803_v45 = vadd.f32 %v3978_v8, %v3802_v40 }
 0x4fb   :  { %v4142_v5 = vpop.f32.mrf.mxu1 }
 0x4fc   :  { %3853 = vst.msk [vmem:[%s7421_s10 + $0x20] sm:$0xff] %vm115_vm0, %v3803_v45  ;;  %v3814_v32 = vadd.f32 %v4142_v5, %v3978_v8 }
 0x4fd   :  { %v3805_v37 = vpop.f32.mrf.mxu1 }
 0x4fe   :  { %3856 = vst.msk [vmem:[%s7421_s10 + $0x38] sm:$0xff] %vm115_vm0, %v3814_v32  ;;  %v3806_v18 = vadd.f32 %v3978_v8, %v3805_v37 }
 0x500   :  { %3854 = vst.msk [vmem:[%s7421_s10 + $0x28] sm:$0xff] %vm115_vm0, %v3806_v18 }
 0x537   :  { %v4145_v41 = vpop.f32.mrf.mxu1 }
 0x538   :  { %v3827_v53 = vadd.f32 %v4145_v41, %v3978_v8 }
 0x539   :  { %v3818_v42 = vpop.f32.mrf.mxu1 }
 0x53a   :  { %3859 = vst.msk [vmem:[%s7421_s10 + $0x50] sm:$0xff] %vm115_vm0, %v3827_v53  ;;  %v3819_v3 = vadd.f32 %v3978_v8, %v3818_v42 }
 0x53b   :  { %v4146_v58 = vpop.f32.mrf.mxu1 }
 0x53c   :  { %3857 = vst.msk [vmem:[%s7421_s10 + $0x40] sm:$0xff] %vm115_vm0, %v3819_v3  ;;  %v3830_v6 = vadd.f32 %v4146_v58, %v3978_v8 }
 0x53d   :  { %v3821_v51 = vpop.f32.mrf.mxu1 }
 0x53e   :  { %3860 = vst.msk [vmem:[%s7421_s10 + $0x58] sm:$0xff] %vm115_vm0, %v3830_v6  ;;  %v3822_v12 = vadd.f32 %v3978_v8, %v3821_v51 }
 0x540   :  { %v4149_v22 = vpop.f32.mrf.mxu1  ;;  %3858 = vst.msk [vmem:[%s7421_s10 + $0x48] sm:$0xff] %vm115_vm0, %v3822_v12 }
 0x541   :  { %v3843_v49 = vadd.f32 %v4149_v22, %v3978_v8 }
 0x542   :  { %v3834_v24 = vpop.f32.mrf.mxu1 }
 0x543   :  { %3863 = vst.msk [vmem:[%s7421_s10 + $0x70] sm:$0xff] %vm115_vm0, %v3843_v49  ;;  %v3835_v31 = vadd.f32 %v3978_v8, %v3834_v24 }
 0x544   :  { %v4150_v43 = vpop.f32.mrf.mxu1 }
 0x545   :  { %3861 = vst.msk [vmem:[%s7421_s10 + $0x60] sm:$0xff] %vm115_vm0, %v3835_v31  ;;  %v3846_v13 = vadd.f32 %v4150_v43, %v3978_v8 }
 0x546   :  { %v3837_v29 = vpop.f32.mrf.mxu1 }
 0x547   :  { %3864 = vst.msk [vmem:[%s7421_s10 + $0x78] sm:$0xff] %vm115_vm0, %v3846_v13  ;;  %v3838_v33 = vadd.f32 %v3978_v8, %v3837_v29 }
 0x549   :  { %3862 = vst.msk [vmem:[%s7421_s10 + $0x68] sm:$0xff] %vm115_vm0, %v3838_v33 }

</bundles_post_ra>
